<compile_context>
chip_gen: v5e
topology: v5e:2x2
jax: 0.10.0
libtpu: 0.0.40
codegen_flags: <defaults>
</compile_context>

<pallas_src>
import functools

import jax
import jax.numpy as jnp
from jax.experimental import pallas as pl
from jax.experimental.pallas import tpu as pltpu

BN_EPS = 1e-5
LANES = 128


def _round_up(x, m):
    return (x + m - 1) // m * m


def _vmem_limit_bytes():
    """Generation-aware scoped-VMEM limit (~52 MiB on v7x, ~100 MiB on v5e/v6e)."""
    cap = 64 * 1024 * 1024
    try:
        info = pltpu.get_tpu_info()
        for attr in ("vmem_capacity_bytes", "vmem_size_bytes", "vmem_bytes"):
            v = getattr(info, attr, None)
            if v:
                cap = int(v)
                break
    except Exception:
        pass
    return max(32 * 1024 * 1024, min(100 * 1024 * 1024, cap - 12 * 1024 * 1024))


def _compiler_params():
    # Per-image grid steps are independent -> "parallel" (megacore shard on v7x).
    return pltpu.CompilerParams(
        dimension_semantics=("parallel",),
        vmem_limit_bytes=_vmem_limit_bytes(),
    )


# ------------------------------- kernel helpers ------------------------------


def _pack_stats(y):
    """Per-image BN partials from the f32 conv output y (M, N).

    Rows of the (8, N) result: 0 = count, 1 = sum, 2 = sum((y - mean)^2).
    The per-image shifted form avoids E[x^2]-E[x]^2 cancellation.
    """
    m = y.shape[0]
    s = jnp.sum(y, axis=0, keepdims=True)
    mu = s * (1.0 / m)
    ssd = jnp.sum(jnp.square(y - mu), axis=0, keepdims=True)
    row = jax.lax.broadcasted_iota(jnp.int32, (8, y.shape[1]), 0)
    return jnp.where(row == 0, jnp.float32(m),
                     jnp.where(row == 1, s,
                               jnp.where(row == 2, ssd, 0.0)))


# ---------------------------------- kernels ----------------------------------


def _conv3x3_s1_kernel(x_ref, sc_ref, bi_ref, w_ref, y_ref, st_ref, xp_ref, *,
                       H, W, C, N):
    """3x3 stride-1 pad-1 conv on one image; previous BN affine + ReLU fused on load."""
    sc = sc_ref[...].reshape(1, 1, C)
    bi = bi_ref[...].reshape(1, 1, C)
    a = jnp.maximum(x_ref[0].astype(jnp.float32) * sc + bi, 0.0).astype(xp_ref.dtype)
    xp_ref[...] = jnp.zeros_like(xp_ref)             # zero halo border (VMEM memset)
    xp_ref[pl.ds(1, H), pl.ds(1, W), :] = a
    acc = None
    for ky in range(3):
        for kx in range(3):
            tap = xp_ref[pl.ds(ky, H), pl.ds(kx, W), :]             # (H, W, C) bf16
            part = jnp.dot(tap.reshape(H * W, C), w_ref[ky * 3 + kx],
                           preferred_element_type=jnp.float32)
            acc = part if acc is None else acc + part
    y_ref[0] = acc.astype(y_ref.dtype)
    st_ref[0] = _pack_stats(acc)


def _conv3x3_s2_kernel(*refs, Hh, Wh, C, N, fused):
    """3x3 stride-2 pad-1 conv on one image (implicit GEMM, parity-organised scratch).

    Inputs are free row-major views of shape (1, H/2, 2, W/2, 2*C) so every tap of
    the stride-2 conv is a contiguous slice of the halo scratch (no strided loads).
      fused=True : act = bn(y_main) + relu(bn(y_resid))   (conv3a)
      fused=False: act = raw input                        (conv1)
    """
    if fused:
        (x_ref, sc_ref, bi_ref, r_ref, rsc_ref, rbi_ref,
         w_ref, y_ref, st_ref, xp_ref) = refs
    else:
        x_ref, w_ref, y_ref, st_ref, xp_ref = refs
    CC = 2 * C
    if fused:
        sc = sc_ref[...].reshape(1, 1, 1, CC)
        bi = bi_ref[...].reshape(1, 1, 1, CC)
        rsc = rsc_ref[...].reshape(1, 1, 1, CC)
        rbi = rbi_ref[...].reshape(1, 1, 1, CC)
        a = (x_ref[0].astype(jnp.float32) * sc + bi
             + jnp.maximum(r_ref[0].astype(jnp.float32) * rsc + rbi, 0.0))
    else:
        a = x_ref[0].astype(jnp.float32)
    a = a.astype(xp_ref.dtype)                                       # (Hh, 2, Wh, CC)
    xp_ref[...] = jnp.zeros_like(xp_ref)
    xp_ref[pl.ds(1, Hh), :, pl.ds(1, Wh), :] = a
    Ho, Wo = Hh, Wh
    acc = None
    for ky in range(3):
        pr, ar = (ky + 1) % 2, (ky + 1) // 2
        for kx in range(3):
            qc, bc = (kx + 1) % 2, (kx + 1) // 2
            win = xp_ref[pl.ds(ar, Ho), pr, pl.ds(bc, Wo), :]        # (Ho, Wo, 2C)
            tap = win[:, :, qc * C:(qc + 1) * C]                     # (Ho, Wo, C)
            part = jnp.dot(tap.reshape(Ho * Wo, C), w_ref[ky * 3 + kx],
                           preferred_element_type=jnp.float32)
            acc = part if acc is None else acc + part
    y_ref[0] = acc.astype(y_ref.dtype)
    st_ref[0] = _pack_stats(acc)


def _project_kernel(y_ref, sc_ref, bi_ref, w_ref, z_ref, st_ref):
    """conv3b: relu(bn3a(y3a)) fused on load, then the 1x1 projection matmul."""
    h = jnp.maximum(y_ref[0].astype(jnp.float32) * sc_ref[...] + bi_ref[...], 0.0)
    z = jnp.dot(h.astype(jnp.bfloat16), w_ref[...], preferred_element_type=jnp.float32)
    z_ref[0] = z.astype(z_ref.dtype)
    st_ref[0] = _pack_stats(z)


def _final_bn_kernel(z_ref, sc_ref, bi_ref, o_ref):
    o_ref[0] = (z_ref[0].astype(jnp.float32) * sc_ref[...] + bi_ref[...]).astype(o_ref.dtype)


# ------------------------------ pallas_call wrappers -------------------------


def conv3x3_s1(x_4d, scale, bias, w_taps):
    B, H, W, C = x_4d.shape
    N = w_taps.shape[-1]
    kernel = functools.partial(_conv3x3_s1_kernel, H=H, W=W, C=C, N=N)
    return pl.pallas_call(
        kernel,
        out_shape=(jax.ShapeDtypeStruct((B, H * W, N), jnp.bfloat16),
                   jax.ShapeDtypeStruct((B, 8, N), jnp.float32)),
        grid=(B,),
        in_specs=[
            pl.BlockSpec((1, H, W, C), lambda b: (b, 0, 0, 0)),
            pl.BlockSpec((1, C), lambda b: (0, 0)),
            pl.BlockSpec((1, C), lambda b: (0, 0)),
            pl.BlockSpec((9, C, N), lambda b: (0, 0, 0)),      # tap weights resident
        ],
        out_specs=(pl.BlockSpec((1, H * W, N), lambda b: (b, 0, 0)),
                   pl.BlockSpec((1, 8, N), lambda b: (b, 0, 0))),
        scratch_shapes=[pltpu.VMEM((H + 2, W + 2, C), jnp.bfloat16)],
        compiler_params=_compiler_params(),
    )(x_4d, scale, bias, w_taps)


def conv3x3_s2(x_4d, w_taps, main_affine=None, resid=None, resid_affine=None):
    B, H, W, C = x_4d.shape
    N = w_taps.shape[-1]
    Hh, Wh = H // 2, W // 2
    CC = 2 * C
    xv = x_4d.reshape(B, Hh, 2, Wh, CC)                        # free row-major view
    fused = resid is not None
    inputs = [xv]
    in_specs = [pl.BlockSpec((1, Hh, 2, Wh, CC), lambda b: (b, 0, 0, 0, 0))]
    if fused:
        sc, bi = main_affine
        rsc, rbi = resid_affine
        rv = resid.reshape(B, Hh, 2, Wh, CC)
        vec_spec = pl.BlockSpec((1, CC), lambda b: (0, 0))
        inputs += [jnp.tile(sc, (1, 2)), jnp.tile(bi, (1, 2)), rv,
                   jnp.tile(rsc, (1, 2)), jnp.tile(rbi, (1, 2))]
        in_specs += [vec_spec, vec_spec,
                     pl.BlockSpec((1, Hh, 2, Wh, CC), lambda b: (b, 0, 0, 0, 0)),
                     vec_spec, vec_spec]
    inputs.append(w_taps)
    in_specs.append(pl.BlockSpec((9, C, N), lambda b: (0, 0, 0)))
    kernel = functools.partial(_conv3x3_s2_kernel, Hh=Hh, Wh=Wh, C=C, N=N, fused=fused)
    return pl.pallas_call(
        kernel,
        out_shape=(jax.ShapeDtypeStruct((B, Hh * Wh, N), jnp.bfloat16),
                   jax.ShapeDtypeStruct((B, 8, N), jnp.float32)),
        grid=(B,),
        in_specs=in_specs,
        out_specs=(pl.BlockSpec((1, Hh * Wh, N), lambda b: (b, 0, 0)),
                   pl.BlockSpec((1, 8, N), lambda b: (b, 0, 0))),
        scratch_shapes=[pltpu.VMEM((Hh + 2, 2, Wh + 2, CC), jnp.bfloat16)],
        compiler_params=_compiler_params(),
    )(*inputs)


def project_call(y3a, sc3a, bi3a, w3b_mat):
    B, M3, Wp = y3a.shape
    E = w3b_mat.shape[-1]
    return pl.pallas_call(
        _project_kernel,
        out_shape=(jax.ShapeDtypeStruct((B, M3, E), jnp.bfloat16),
                   jax.ShapeDtypeStruct((B, 8, E), jnp.float32)),
        grid=(B,),
        in_specs=[pl.BlockSpec((1, M3, Wp), lambda b: (b, 0, 0)),
                  pl.BlockSpec((1, Wp), lambda b: (0, 0)),
                  pl.BlockSpec((1, Wp), lambda b: (0, 0)),
                  pl.BlockSpec((Wp, E), lambda b: (0, 0))],
        out_specs=(pl.BlockSpec((1, M3, E), lambda b: (b, 0, 0)),
                   pl.BlockSpec((1, 8, E), lambda b: (b, 0, 0))),
        compiler_params=_compiler_params(),
    )(y3a, sc3a, bi3a, w3b_mat)


def final_bn_call(z, scale, bias):
    B, M3, E = z.shape
    return pl.pallas_call(
        _final_bn_kernel,
        out_shape=jax.ShapeDtypeStruct((B, M3, E), jnp.float32),
        grid=(B,),
        in_specs=[pl.BlockSpec((1, M3, E), lambda b: (b, 0, 0)),
                  pl.BlockSpec((1, E), lambda b: (0, 0)),
                  pl.BlockSpec((1, E), lambda b: (0, 0))],
        out_specs=pl.BlockSpec((1, M3, E), lambda b: (b, 0, 0)),
        compiler_params=_compiler_params(),
    )(z, scale, bias)


# --------------------------------- JAX glue ----------------------------------


def bn_scale_bias(stats, gamma_pad, beta_pad):
    """Combine per-image partials (Chan) -> per-channel BN scale/bias (train mode)."""
    cnt, s, ssd = stats[:, 0, :], stats[:, 1, :], stats[:, 2, :]
    total = jnp.maximum(jnp.sum(cnt, axis=0), 1.0)
    mean = jnp.sum(s, axis=0) / total
    mean_t = s / jnp.maximum(cnt, 1.0)
    var = (jnp.sum(ssd, axis=0)
           + jnp.sum(cnt * jnp.square(mean_t - mean[None, :]), axis=0)) / total
    var = jnp.maximum(var, 0.0)
    scale = gamma_pad * jax.lax.rsqrt(var + BN_EPS)
    bias = beta_pad - mean * scale
    n = scale.shape[0]
    return (scale.reshape(1, n).astype(jnp.float32),
            bias.reshape(1, n).astype(jnp.float32))


def _conv_tap_weights(w_oihw, cin_pad, cout_pad):
    """(Cout, Cin, 3, 3) -> zero-padded bf16 tap weights (9, cin_pad, cout_pad)."""
    cout, cin, kh, kw = w_oihw.shape
    w = jnp.transpose(w_oihw, (2, 3, 1, 0))
    w = jnp.pad(w, ((0, 0), (0, 0), (0, cin_pad - cin), (0, cout_pad - cout)))
    return w.reshape(kh * kw, cin_pad, cout_pad).astype(jnp.bfloat16)


def prepare_params(raw, in_chans, embed_dim):
    """One-time parameter packing (transpose/pad/bf16) + gamma/beta lane padding."""
    mid = embed_dim // 2
    wide = embed_dim * 4
    c1p = _round_up(mid, LANES)
    wpad = _round_up(wide, LANES)
    epad = _round_up(embed_dim, LANES)
    pp = {}
    pp["w1"] = _conv_tap_weights(raw["w1"], in_chans, c1p)
    pp["w2a"] = _conv_tap_weights(raw["w2a"], c1p, c1p)
    pp["w2b"] = _conv_tap_weights(raw["w2b"], c1p, c1p)
    pp["w3a"] = _conv_tap_weights(raw["w3a"], c1p, wpad)
    w3b = jnp.transpose(raw["w3b"][:, :, 0, 0], (1, 0))               # (wide, embed)
    pp["w3b"] = jnp.pad(w3b, ((0, wpad - wide),
                              (0, epad - embed_dim))).astype(jnp.bfloat16)
    for name, cp in (("1", c1p), ("2a", c1p), ("2b", c1p), ("3a", wpad), ("3b", epad)):
        g = raw["g" + name].reshape(-1)
        b = raw["b" + name].reshape(-1)
        pp["g" + name] = jnp.pad(g, (0, cp - g.shape[0]),
                                 constant_values=1.0).astype(jnp.float32)
        pp["b" + name] = jnp.pad(b, (0, cp - b.shape[0])).astype(jnp.float32)
    return pp


def stem_forward(x_nchw, pp, *, embed_dim):
    """Stem.forward: NCHW input -> (B, num_patches, embed_dim) f32."""
    B, _, H, W = x_nchw.shape
    x = jnp.transpose(x_nchw, (0, 2, 3, 1)).astype(jnp.float32)       # NHWC

    # conv1: 3x3 s2 p1 (raw conv); its BN1+ReLU is folded into downstream loads.
    y1, st1 = conv3x3_s2(x, pp["w1"])
    sc1, bi1 = bn_scale_bias(st1, pp["g1"], pp["b1"])
    H1, W1 = H // 2, W // 2
    c1p = pp["w1"].shape[-1]
    y1_4d = y1.reshape(B, H1, W1, c1p)

    # conv2a: input = relu(bn1(y1)) applied on load.
    y2a, st2a = conv3x3_s1(y1_4d, sc1, bi1, pp["w2a"])
    sc2a, bi2a = bn_scale_bias(st2a, pp["g2a"], pp["b2a"])
    y2a_4d = y2a.reshape(B, H1, W1, c1p)

    # conv2b: input = relu(bn2a(y2a)); no activation on its own BN.
    y2b, st2b = conv3x3_s1(y2a_4d, sc2a, bi2a, pp["w2b"])
    sc2b, bi2b = bn_scale_bias(st2b, pp["g2b"], pp["b2b"])
    y2b_4d = y2b.reshape(B, H1, W1, c1p)

    # conv3a: input = bn2b(y2b) + relu(bn1(y1)) (residual) fused on load, stride 2.
    y3a, st3a = conv3x3_s2(y2b_4d, pp["w3a"],
                           main_affine=(sc2b, bi2b),
                           resid=y1_4d, resid_affine=(sc1, bi1))
    sc3a, bi3a = bn_scale_bias(st3a, pp["g3a"], pp["b3a"])

    # conv3b (1x1): relu(bn3a) fused on load; then final BN3b affine.
    z, st3b = project_call(y3a, sc3a, bi3a, pp["w3b"])
    sc3b, bi3b = bn_scale_bias(st3b, pp["g3b"], pp["b3b"])
    out = final_bn_call(z, sc3b, bi3b)                # (B, Ho*Wo, Epad) f32

    # x.flatten(2).transpose(1, 2) in NCHW == NHWC reshaped to (B, Ho*Wo, C).
    return out[:, :, :embed_dim]


# ------------------------------ reference & setup ----------------------------


def init_params(key, in_chans, embed_dim):
    mid = embed_dim // 2
    wide = embed_dim * 4

    def conv_w(k, cout, cin, ksz):
        return 0.1 * jax.random.normal(k, (cout, cin, ksz, ksz), jnp.float32)

    def bn_p(k, c):
        kg, kb = jax.random.split(k)
        return (1.0 + 0.05 * jax.random.normal(kg, (c,), jnp.float32),
                0.05 * jax.random.normal(kb, (c,), jnp.float32))

    keys = jax.random.split(key, 10)
    p = {}
    p["w1"] = conv_w(keys[0], mid, in_chans, 3);    p["g1"], p["b1"] = bn_p(keys[1], mid)
    p["w2a"] = conv_w(keys[2], mid, mid, 3);        p["g2a"], p["b2a"] = bn_p(keys[3], mid)
    p["w2b"] = conv_w(keys[4], mid, mid, 3);        p["g2b"], p["b2b"] = bn_p(keys[5], mid)
    p["w3a"] = conv_w(keys[6], wide, mid, 3);       p["g3a"], p["b3a"] = bn_p(keys[7], wide)
    p["w3b"] = conv_w(keys[8], embed_dim, wide, 1); p["g3b"], p["b3b"] = bn_p(keys[9], embed_dim)
    return p


def stem_reference(x_nchw, raw, *, embed_dim):
    """Pure-JAX f32 reference of Stem.forward (training-mode BatchNorm)."""
    def conv(x, w, stride, pad):
        return jax.lax.conv_general_dilated(
            x, w, window_strides=(stride, stride),
            padding=((pad, pad), (pad, pad)),
            dimension_numbers=("NCHW", "OIHW", "NCHW"),
            precision=jax.lax.Precision.HIGHEST)

    def bn(x, g, b):
        mean = jnp.mean(x, axis=(0, 2, 3), keepdims=True)
        var = jnp.mean(jnp.square(x - mean), axis=(0, 2, 3), keepdims=True)
        xn = (x - mean) * jax.lax.rsqrt(var + BN_EPS)
        return xn * g.reshape(1, -1, 1, 1) + b.reshape(1, -1, 1, 1)

    x1 = jax.nn.relu(bn(conv(x_nchw, raw["w1"], 2, 1), raw["g1"], raw["b1"]))
    t = jax.nn.relu(bn(conv(x1, raw["w2a"], 1, 1), raw["g2a"], raw["b2a"]))
    x2 = bn(conv(t, raw["w2b"], 1, 1), raw["g2b"], raw["b2b"]) + x1
    x3 = jax.nn.relu(bn(conv(x2, raw["w3a"], 2, 1), raw["g3a"], raw["b3a"]))
    z = bn(conv(x3, raw["w3b"], 1, 0), raw["g3b"], raw["b3b"])
    B = x_nchw.shape[0]
    return z.reshape(B, embed_dim, -1).transpose(0, 2, 1)


if __name__ == "__main__":
    # Small Stem: img_size=16, patch_size=4, in_chans=4, embed_dim=32
    B, C, H, W = 2, 4, 16, 16
    embed_dim = 32

    key = jax.random.PRNGKey(0)
    kx, kp = jax.random.split(key)
    x = jax.random.normal(kx, (B, C, H, W), jnp.float32)
    raw = init_params(kp, C, embed_dim)
    prepped = prepare_params(raw, C, embed_dim)

    run = jax.jit(functools.partial(stem_forward, embed_dim=embed_dim))
    out = run(x, prepped)
    jax.block_until_ready(out)

    expected = (B, (H // 4) * (W // 4), embed_dim)
    assert out.shape == expected, (out.shape, expected)
    assert bool(jnp.all(jnp.isfinite(out)))

    # Loose check vs an f32 XLA reference (kernel uses bf16 matmul operands and
    # bf16 intermediates -> ~1e-2 level differences are expected / documented).
    ref = jax.jit(functools.partial(stem_reference, embed_dim=embed_dim))(x, raw)
    err = float(jnp.max(jnp.abs(out - ref)))
    assert err < 0.35, f"max abs err vs f32 reference too large: {err}"

    print("KERNEL_OK")
</pallas_src>

<mosaic_0001>
module attributes {stable_mosaic.version = 11 : i64} {
  func.func @_conv3x3_s2_kernel(%arg0: i32, %arg1: memref<1x8x2x8x8xf32, #tpu.memory_space<vmem>>, %arg2: memref<9x4x128xbf16, #tpu.memory_space<vmem>>, %arg3: memref<1x64x128xbf16, #tpu.memory_space<vmem>>, %arg4: memref<1x8x128xf32, #tpu.memory_space<vmem>>, %arg5: memref<10x2x10x8xbf16, #tpu.memory_space<vmem>>) attributes {dimension_semantics = [#tpu.dimension_semantics<parallel>], iteration_bounds = array<i64: 2>, scalar_prefetch = 0 : i64, scratch_operands = 1 : i64, tpu.core_type = #tpu.core_type<tc>, window_params = [{transform_indices = @transform_0, window_bounds = array<i64: 1, 8, 2, 8, 8>}, {pipeline_mode = #tpu.pipeline_mode<synchronous>, transform_indices = @transform_1, window_bounds = array<i64: 9, 4, 128>}, {transform_indices = @transform_2, window_bounds = array<i64: 1, 64, 128>}, {transform_indices = @transform_3, window_bounds = array<i64: 1, 8, 128>}]} {
    %c0 = arith.constant 0 : index
    %c0_0 = arith.constant 0 : index
    %c0_1 = arith.constant 0 : index
    %c0_2 = arith.constant 0 : index
    %c0_3 = arith.constant 0 : index
    %0 = vector.load %arg1[%c0, %c0_0, %c0_1, %c0_2, %c0_3] : memref<1x8x2x8x8xf32, #tpu.memory_space<vmem>>, vector<1x8x2x8x8xf32>
    %1 = vector.shape_cast %0 : vector<1x8x2x8x8xf32> to vector<8x2x8x8xf32>
    %2 = arith.truncf %1 : vector<8x2x8x8xf32> to vector<8x2x8x8xbf16>
    %cst = arith.constant 0.000000e+00 : bf16
    %3 = vector.broadcast %cst : bf16 to vector<10x2x10x8xbf16>
    %c0_4 = arith.constant 0 : index
    %c0_5 = arith.constant 0 : index
    %c0_6 = arith.constant 0 : index
    %c0_7 = arith.constant 0 : index
    %4 = vector.load %arg5[%c0_4, %c0_5, %c0_6, %c0_7] : memref<10x2x10x8xbf16, #tpu.memory_space<vmem>>, vector<10x2x10x8xbf16>
    tpu.vector_store %arg5[%c0_4, %c0_5, %c0_6, %c0_7], %3 {strides = array<i32>} : memref<10x2x10x8xbf16, #tpu.memory_space<vmem>>, vector<10x2x10x8xbf16>,
    %c1 = arith.constant 1 : index
    %c0_8 = arith.constant 0 : index
    %c1_9 = arith.constant 1 : index
    %c0_10 = arith.constant 0 : index
    %5 = vector.load %arg5[%c1, %c0_8, %c1_9, %c0_10] : memref<10x2x10x8xbf16, #tpu.memory_space<vmem>>, vector<8x2x8x8xbf16>
    tpu.vector_store %arg5[%c1, %c0_8, %c1_9, %c0_10], %2 {strides = array<i32>} : memref<10x2x10x8xbf16, #tpu.memory_space<vmem>>, vector<8x2x8x8xbf16>,
    %c0_11 = arith.constant 0 : index
    %c1_12 = arith.constant 1 : index
    %c0_13 = arith.constant 0 : index
    %c0_14 = arith.constant 0 : index
    %6 = vector.load %arg5[%c0_11, %c1_12, %c0_13, %c0_14] : memref<10x2x10x8xbf16, #tpu.memory_space<vmem>>, vector<8x1x8x8xbf16>
    %7 = vector.shape_cast %6 : vector<8x1x8x8xbf16> to vector<8x8x8xbf16>
    %8 = vector.extract_strided_slice %7 {offsets = [0, 0, 4], sizes = [8, 8, 4], strides = [1, 1, 1]} : vector<8x8x8xbf16> to vector<8x8x4xbf16>
    %9 = vector.shape_cast %8 : vector<8x8x4xbf16> to vector<64x4xbf16>
    %c0_15 = arith.constant 0 : index
    %c0_16 = arith.constant 0 : index
    %c0_17 = arith.constant 0 : index
    %10 = vector.load %arg2[%c0_15, %c0_16, %c0_17] : memref<9x4x128xbf16, #tpu.memory_space<vmem>>, vector<1x4x128xbf16>
    %11 = vector.shape_cast %10 : vector<1x4x128xbf16> to vector<4x128xbf16>
    %cst_18 = arith.constant dense<0.000000e+00> : vector<64x128xf32>
    %12 = tpu.matmul %9, %11, %cst_18 {dimension_numbers = #tpu.dot_dimension_numbers<[1], [0], [0], [1], [0, 0, 1, 1], [], []>} : vector<64x4xbf16>, vector<4x128xbf16>, vector<64x128xf32> -> vector<64x128xf32>
    %c0_19 = arith.constant 0 : index
    %c1_20 = arith.constant 1 : index
    %c1_21 = arith.constant 1 : index
    %c0_22 = arith.constant 0 : index
    %13 = vector.load %arg5[%c0_19, %c1_20, %c1_21, %c0_22] : memref<10x2x10x8xbf16, #tpu.memory_space<vmem>>, vector<8x1x8x8xbf16>
    %14 = vector.shape_cast %13 : vector<8x1x8x8xbf16> to vector<8x8x8xbf16>
    %15 = vector.extract_strided_slice %14 {offsets = [0, 0, 0], sizes = [8, 8, 4], strides = [1, 1, 1]} : vector<8x8x8xbf16> to vector<8x8x4xbf16>
    %16 = vector.shape_cast %15 : vector<8x8x4xbf16> to vector<64x4xbf16>
    %c1_23 = arith.constant 1 : index
    %c0_24 = arith.constant 0 : index
    %c0_25 = arith.constant 0 : index
    %17 = vector.load %arg2[%c1_23, %c0_24, %c0_25] : memref<9x4x128xbf16, #tpu.memory_space<vmem>>, vector<1x4x128xbf16>
    %18 = vector.shape_cast %17 : vector<1x4x128xbf16> to vector<4x128xbf16>
    %cst_26 = arith.constant dense<0.000000e+00> : vector<64x128xf32>
    %19 = tpu.matmul %16, %18, %cst_26 {dimension_numbers = #tpu.dot_dimension_numbers<[1], [0], [0], [1], [0, 0, 1, 1], [], []>} : vector<64x4xbf16>, vector<4x128xbf16>, vector<64x128xf32> -> vector<64x128xf32>
    %20 = arith.addf %12, %19 : vector<64x128xf32>
    %c0_27 = arith.constant 0 : index
    %c1_28 = arith.constant 1 : index
    %c1_29 = arith.constant 1 : index
    %c0_30 = arith.constant 0 : index
    %21 = vector.load %arg5[%c0_27, %c1_28, %c1_29, %c0_30] : memref<10x2x10x8xbf16, #tpu.memory_space<vmem>>, vector<8x1x8x8xbf16>
    %22 = vector.shape_cast %21 : vector<8x1x8x8xbf16> to vector<8x8x8xbf16>
    %23 = vector.extract_strided_slice %22 {offsets = [0, 0, 4], sizes = [8, 8, 4], strides = [1, 1, 1]} : vector<8x8x8xbf16> to vector<8x8x4xbf16>
    %24 = vector.shape_cast %23 : vector<8x8x4xbf16> to vector<64x4xbf16>
    %c2 = arith.constant 2 : index
    %c0_31 = arith.constant 0 : index
    %c0_32 = arith.constant 0 : index
    %25 = vector.load %arg2[%c2, %c0_31, %c0_32] : memref<9x4x128xbf16, #tpu.memory_space<vmem>>, vector<1x4x128xbf16>
    %26 = vector.shape_cast %25 : vector<1x4x128xbf16> to vector<4x128xbf16>
    %cst_33 = arith.constant dense<0.000000e+00> : vector<64x128xf32>
    %27 = tpu.matmul %24, %26, %cst_33 {dimension_numbers = #tpu.dot_dimension_numbers<[1], [0], [0], [1], [0, 0, 1, 1], [], []>} : vector<64x4xbf16>, vector<4x128xbf16>, vector<64x128xf32> -> vector<64x128xf32>
    %28 = arith.addf %20, %27 : vector<64x128xf32>
    %c1_34 = arith.constant 1 : index
    %c0_35 = arith.constant 0 : index
    %c0_36 = arith.constant 0 : index
    %c0_37 = arith.constant 0 : index
    %29 = vector.load %arg5[%c1_34, %c0_35, %c0_36, %c0_37] : memref<10x2x10x8xbf16, #tpu.memory_space<vmem>>, vector<8x1x8x8xbf16>
    %30 = vector.shape_cast %29 : vector<8x1x8x8xbf16> to vector<8x8x8xbf16>
    %31 = vector.extract_strided_slice %30 {offsets = [0, 0, 4], sizes = [8, 8, 4], strides = [1, 1, 1]} : vector<8x8x8xbf16> to vector<8x8x4xbf16>
    %32 = vector.shape_cast %31 : vector<8x8x4xbf16> to vector<64x4xbf16>
    %c3 = arith.constant 3 : index
    %c0_38 = arith.constant 0 : index
    %c0_39 = arith.constant 0 : index
    %33 = vector.load %arg2[%c3, %c0_38, %c0_39] : memref<9x4x128xbf16, #tpu.memory_space<vmem>>, vector<1x4x128xbf16>
    %34 = vector.shape_cast %33 : vector<1x4x128xbf16> to vector<4x128xbf16>
    %cst_40 = arith.constant dense<0.000000e+00> : vector<64x128xf32>
    %35 = tpu.matmul %32, %34, %cst_40 {dimension_numbers = #tpu.dot_dimension_numbers<[1], [0], [0], [1], [0, 0, 1, 1], [], []>} : vector<64x4xbf16>, vector<4x128xbf16>, vector<64x128xf32> -> vector<64x128xf32>
    %36 = arith.addf %28, %35 : vector<64x128xf32>
    %c1_41 = arith.constant 1 : index
    %c0_42 = arith.constant 0 : index
    %c1_43 = arith.constant 1 : index
    %c0_44 = arith.constant 0 : index
    %37 = vector.load %arg5[%c1_41, %c0_42, %c1_43, %c0_44] : memref<10x2x10x8xbf16, #tpu.memory_space<vmem>>, vector<8x1x8x8xbf16>
    %38 = vector.shape_cast %37 : vector<8x1x8x8xbf16> to vector<8x8x8xbf16>
    %39 = vector.extract_strided_slice %38 {offsets = [0, 0, 0], sizes = [8, 8, 4], strides = [1, 1, 1]} : vector<8x8x8xbf16> to vector<8x8x4xbf16>
    %40 = vector.shape_cast %39 : vector<8x8x4xbf16> to vector<64x4xbf16>
    %c4 = arith.constant 4 : index
    %c0_45 = arith.constant 0 : index
    %c0_46 = arith.constant 0 : index
    %41 = vector.load %arg2[%c4, %c0_45, %c0_46] : memref<9x4x128xbf16, #tpu.memory_space<vmem>>, vector<1x4x128xbf16>
    %42 = vector.shape_cast %41 : vector<1x4x128xbf16> to vector<4x128xbf16>
    %cst_47 = arith.constant dense<0.000000e+00> : vector<64x128xf32>
    %43 = tpu.matmul %40, %42, %cst_47 {dimension_numbers = #tpu.dot_dimension_numbers<[1], [0], [0], [1], [0, 0, 1, 1], [], []>} : vector<64x4xbf16>, vector<4x128xbf16>, vector<64x128xf32> -> vector<64x128xf32>
    %44 = arith.addf %36, %43 : vector<64x128xf32>
    %c1_48 = arith.constant 1 : index
    %c0_49 = arith.constant 0 : index
    %c1_50 = arith.constant 1 : index
    %c0_51 = arith.constant 0 : index
    %45 = vector.load %arg5[%c1_48, %c0_49, %c1_50, %c0_51] : memref<10x2x10x8xbf16, #tpu.memory_space<vmem>>, vector<8x1x8x8xbf16>
    %46 = vector.shape_cast %45 : vector<8x1x8x8xbf16> to vector<8x8x8xbf16>
    %47 = vector.extract_strided_slice %46 {offsets = [0, 0, 4], sizes = [8, 8, 4], strides = [1, 1, 1]} : vector<8x8x8xbf16> to vector<8x8x4xbf16>
    %48 = vector.shape_cast %47 : vector<8x8x4xbf16> to vector<64x4xbf16>
    %c5 = arith.constant 5 : index
    %c0_52 = arith.constant 0 : index
    %c0_53 = arith.constant 0 : index
    %49 = vector.load %arg2[%c5, %c0_52, %c0_53] : memref<9x4x128xbf16, #tpu.memory_space<vmem>>, vector<1x4x128xbf16>
    %50 = vector.shape_cast %49 : vector<1x4x128xbf16> to vector<4x128xbf16>
    %cst_54 = arith.constant dense<0.000000e+00> : vector<64x128xf32>
    %51 = tpu.matmul %48, %50, %cst_54 {dimension_numbers = #tpu.dot_dimension_numbers<[1], [0], [0], [1], [0, 0, 1, 1], [], []>} : vector<64x4xbf16>, vector<4x128xbf16>, vector<64x128xf32> -> vector<64x128xf32>
    %52 = arith.addf %44, %51 : vector<64x128xf32>
    %c1_55 = arith.constant 1 : index
    %c1_56 = arith.constant 1 : index
    %c0_57 = arith.constant 0 : index
    %c0_58 = arith.constant 0 : index
    %53 = vector.load %arg5[%c1_55, %c1_56, %c0_57, %c0_58] : memref<10x2x10x8xbf16, #tpu.memory_space<vmem>>, vector<8x1x8x8xbf16>
    %54 = vector.shape_cast %53 : vector<8x1x8x8xbf16> to vector<8x8x8xbf16>
    %55 = vector.extract_strided_slice %54 {offsets = [0, 0, 4], sizes = [8, 8, 4], strides = [1, 1, 1]} : vector<8x8x8xbf16> to vector<8x8x4xbf16>
    %56 = vector.shape_cast %55 : vector<8x8x4xbf16> to vector<64x4xbf16>
    %c6 = arith.constant 6 : index
    %c0_59 = arith.constant 0 : index
    %c0_60 = arith.constant 0 : index
    %57 = vector.load %arg2[%c6, %c0_59, %c0_60] : memref<9x4x128xbf16, #tpu.memory_space<vmem>>, vector<1x4x128xbf16>
    %58 = vector.shape_cast %57 : vector<1x4x128xbf16> to vector<4x128xbf16>
    %cst_61 = arith.constant dense<0.000000e+00> : vector<64x128xf32>
    %59 = tpu.matmul %56, %58, %cst_61 {dimension_numbers = #tpu.dot_dimension_numbers<[1], [0], [0], [1], [0, 0, 1, 1], [], []>} : vector<64x4xbf16>, vector<4x128xbf16>, vector<64x128xf32> -> vector<64x128xf32>
    %60 = arith.addf %52, %59 : vector<64x128xf32>
    %c1_62 = arith.constant 1 : index
    %c1_63 = arith.constant 1 : index
    %c1_64 = arith.constant 1 : index
    %c0_65 = arith.constant 0 : index
    %61 = vector.load %arg5[%c1_62, %c1_63, %c1_64, %c0_65] : memref<10x2x10x8xbf16, #tpu.memory_space<vmem>>, vector<8x1x8x8xbf16>
    %62 = vector.shape_cast %61 : vector<8x1x8x8xbf16> to vector<8x8x8xbf16>
    %63 = vector.extract_strided_slice %62 {offsets = [0, 0, 0], sizes = [8, 8, 4], strides = [1, 1, 1]} : vector<8x8x8xbf16> to vector<8x8x4xbf16>
    %64 = vector.shape_cast %63 : vector<8x8x4xbf16> to vector<64x4xbf16>
    %c7 = arith.constant 7 : index
    %c0_66 = arith.constant 0 : index
    %c0_67 = arith.constant 0 : index
    %65 = vector.load %arg2[%c7, %c0_66, %c0_67] : memref<9x4x128xbf16, #tpu.memory_space<vmem>>, vector<1x4x128xbf16>
    %66 = vector.shape_cast %65 : vector<1x4x128xbf16> to vector<4x128xbf16>
    %cst_68 = arith.constant dense<0.000000e+00> : vector<64x128xf32>
    %67 = tpu.matmul %64, %66, %cst_68 {dimension_numbers = #tpu.dot_dimension_numbers<[1], [0], [0], [1], [0, 0, 1, 1], [], []>} : vector<64x4xbf16>, vector<4x128xbf16>, vector<64x128xf32> -> vector<64x128xf32>
    %68 = arith.addf %60, %67 : vector<64x128xf32>
    %c1_69 = arith.constant 1 : index
    %c1_70 = arith.constant 1 : index
    %c1_71 = arith.constant 1 : index
    %c0_72 = arith.constant 0 : index
    %69 = vector.load %arg5[%c1_69, %c1_70, %c1_71, %c0_72] : memref<10x2x10x8xbf16, #tpu.memory_space<vmem>>, vector<8x1x8x8xbf16>
    %70 = vector.shape_cast %69 : vector<8x1x8x8xbf16> to vector<8x8x8xbf16>
    %71 = vector.extract_strided_slice %70 {offsets = [0, 0, 4], sizes = [8, 8, 4], strides = [1, 1, 1]} : vector<8x8x8xbf16> to vector<8x8x4xbf16>
    %72 = vector.shape_cast %71 : vector<8x8x4xbf16> to vector<64x4xbf16>
    %c8 = arith.constant 8 : index
    %c0_73 = arith.constant 0 : index
    %c0_74 = arith.constant 0 : index
    %73 = vector.load %arg2[%c8, %c0_73, %c0_74] : memref<9x4x128xbf16, #tpu.memory_space<vmem>>, vector<1x4x128xbf16>
    %74 = vector.shape_cast %73 : vector<1x4x128xbf16> to vector<4x128xbf16>
    %cst_75 = arith.constant dense<0.000000e+00> : vector<64x128xf32>
    %75 = tpu.matmul %72, %74, %cst_75 {dimension_numbers = #tpu.dot_dimension_numbers<[1], [0], [0], [1], [0, 0, 1, 1], [], []>} : vector<64x4xbf16>, vector<4x128xbf16>, vector<64x128xf32> -> vector<64x128xf32>
    %76 = arith.addf %68, %75 : vector<64x128xf32>
    %77 = arith.truncf %76 : vector<64x128xf32> to vector<64x128xbf16>
    %c0_76 = arith.constant 0 : index
    %c0_77 = arith.constant 0 : index
    %c0_78 = arith.constant 0 : index
    %78 = vector.load %arg3[%c0_76, %c0_77, %c0_78] : memref<1x64x128xbf16, #tpu.memory_space<vmem>>, vector<1x64x128xbf16>
    %79 = vector.shape_cast %78 : vector<1x64x128xbf16> to vector<64x128xbf16>
    %80 = vector.shape_cast %77 : vector<64x128xbf16> to vector<1x64x128xbf16>
    tpu.vector_store %arg3[%c0_76, %c0_77, %c0_78], %80 {strides = array<i32>} : memref<1x64x128xbf16, #tpu.memory_space<vmem>>, vector<1x64x128xbf16>,
    %cst_79 = arith.constant dense<0.000000e+00> : vector<128xf32>
    %81 = vector.multi_reduction <add>, %76, %cst_79 [0] : vector<64x128xf32> to vector<128xf32>
    %82 = vector.shape_cast %81 : vector<128xf32> to vector<1x128xf32>
    %cst_80 = arith.constant 1.562500e-02 : f32
    %83 = vector.broadcast %cst_80 : f32 to vector<1x128xf32>
    %84 = arith.mulf %82, %83 : vector<1x128xf32>
    %85 = vector.broadcast %84 : vector<1x128xf32> to vector<64x128xf32>
    %86 = arith.subf %76, %85 : vector<64x128xf32>
    %87 = arith.mulf %86, %86 : vector<64x128xf32>
    %cst_81 = arith.constant dense<0.000000e+00> : vector<128xf32>
    %88 = vector.multi_reduction <add>, %87, %cst_81 [0] : vector<64x128xf32> to vector<128xf32>
    %89 = vector.shape_cast %88 : vector<128xf32> to vector<1x128xf32>
    %90 = tpu.iota {dimensions = array<i32: 0>} : vector<8x128xi32>
    %c0_i32 = arith.constant 0 : i32
    %91 = vector.broadcast %c0_i32 : i32 to vector<8x128xi32>
    %92 = arith.cmpi eq, %90, %91 : vector<8x128xi32>
    %c1_i32 = arith.constant 1 : i32
    %93 = vector.broadcast %c1_i32 : i32 to vector<8x128xi32>
    %94 = arith.cmpi eq, %90, %93 : vector<8x128xi32>
    %c2_i32 = arith.constant 2 : i32
    %95 = vector.broadcast %c2_i32 : i32 to vector<8x128xi32>
    %96 = arith.cmpi eq, %90, %95 : vector<8x128xi32>
    %cst_82 = arith.constant 0.000000e+00 : f32
    %97 = vector.shape_cast %89 : vector<1x128xf32> to vector<1x128xf32>
    %98 = vector.broadcast %97 : vector<1x128xf32> to vector<8x128xf32>
    %99 = vector.broadcast %cst_82 : f32 to vector<8x128xf32>
    %100 = arith.select %96, %98, %99 : vector<8x128xi1>, vector<8x128xf32>
    %101 = vector.shape_cast %82 : vector<1x128xf32> to vector<1x128xf32>
    %102 = vector.broadcast %101 : vector<1x128xf32> to vector<8x128xf32>
    %103 = arith.select %94, %102, %100 : vector<8x128xi1>, vector<8x128xf32>
    %cst_83 = arith.constant 6.400000e+01 : f32
    %104 = vector.broadcast %cst_83 : f32 to vector<8x128xf32>
    %105 = arith.select %92, %104, %103 : vector<8x128xi1>, vector<8x128xf32>
    %c0_84 = arith.constant 0 : index
    %c0_85 = arith.constant 0 : index
    %c0_86 = arith.constant 0 : index
    %106 = vector.load %arg4[%c0_84, %c0_85, %c0_86] : memref<1x8x128xf32, #tpu.memory_space<vmem>>, vector<1x8x128xf32>
    %107 = vector.shape_cast %106 : vector<1x8x128xf32> to vector<8x128xf32>
    %108 = vector.shape_cast %105 : vector<8x128xf32> to vector<1x8x128xf32>
    tpu.vector_store %arg4[%c0_84, %c0_85, %c0_86], %108 {strides = array<i32>} : memref<1x8x128xf32, #tpu.memory_space<vmem>>, vector<1x8x128xf32>,
    return
  }
  func.func @transform_0(%arg0: i32) -> (i32, i32, i32, i32, i32) {
    %c0_i32 = arith.constant 0 : i32
    %c0_i32_0 = arith.constant 0 : i32
    %c0_i32_1 = arith.constant 0 : i32
    %c0_i32_2 = arith.constant 0 : i32
    %c0_i32_3 = arith.constant 0 : i32
    return %arg0, %c0_i32, %c0_i32_0, %c0_i32_1, %c0_i32_2 : i32, i32, i32, i32, i32
  }
  func.func @transform_1(%arg0: i32) -> (i32, i32, i32) {
    %c0_i32 = arith.constant 0 : i32
    %c0_i32_0 = arith.constant 0 : i32
    %c0_i32_1 = arith.constant 0 : i32
    %c0_i32_2 = arith.constant 0 : i32
    return %c0_i32, %c0_i32_0, %c0_i32_1 : i32, i32, i32
  }
  func.func @transform_2(%arg0: i32) -> (i32, i32, i32) {
    %c0_i32 = arith.constant 0 : i32
    %c0_i32_0 = arith.constant 0 : i32
    %c0_i32_1 = arith.constant 0 : i32
    return %arg0, %c0_i32, %c0_i32_0 : i32, i32, i32
  }
  func.func @transform_3(%arg0: i32) -> (i32, i32, i32) {
    %c0_i32 = arith.constant 0 : i32
    %c0_i32_0 = arith.constant 0 : i32
    %c0_i32_1 = arith.constant 0 : i32
    return %arg0, %c0_i32, %c0_i32_0 : i32, i32, i32
  }
}

module attributes {stable_mosaic.version = 11 : i64} {
  func.func @_conv3x3_s1_kernel(%arg0: i32, %arg1: memref<1x8x8x128xbf16, #tpu.memory_space<vmem>>, %arg2: memref<1x128xf32, #tpu.memory_space<vmem>>, %arg3: memref<1x128xf32, #tpu.memory_space<vmem>>, %arg4: memref<9x128x128xbf16, #tpu.memory_space<vmem>>, %arg5: memref<1x64x128xbf16, #tpu.memory_space<vmem>>, %arg6: memref<1x8x128xf32, #tpu.memory_space<vmem>>, %arg7: memref<10x10x128xbf16, #tpu.memory_space<vmem>>) attributes {dimension_semantics = [#tpu.dimension_semantics<parallel>], iteration_bounds = array<i64: 2>, scalar_prefetch = 0 : i64, scratch_operands = 1 : i64, tpu.core_type = #tpu.core_type<tc>, window_params = [{transform_indices = @transform_0, window_bounds = array<i64: 1, 8, 8, 128>}, {pipeline_mode = #tpu.pipeline_mode<synchronous>, transform_indices = @transform_1, window_bounds = array<i64: 1, 128>}, {pipeline_mode = #tpu.pipeline_mode<synchronous>, transform_indices = @transform_2, window_bounds = array<i64: 1, 128>}, {pipeline_mode = #tpu.pipeline_mode<synchronous>, transform_indices = @transform_3, window_bounds = array<i64: 9, 128, 128>}, {transform_indices = @transform_4, window_bounds = array<i64: 1, 64, 128>}, {transform_indices = @transform_5, window_bounds = array<i64: 1, 8, 128>}]} {
    %c0 = arith.constant 0 : index
    %c0_0 = arith.constant 0 : index
    %0 = vector.load %arg2[%c0, %c0_0] : memref<1x128xf32, #tpu.memory_space<vmem>>, vector<1x128xf32>
    %1 = vector.shape_cast %0 : vector<1x128xf32> to vector<1x1x128xf32>
    %c0_1 = arith.constant 0 : index
    %c0_2 = arith.constant 0 : index
    %2 = vector.load %arg3[%c0_1, %c0_2] : memref<1x128xf32, #tpu.memory_space<vmem>>, vector<1x128xf32>
    %3 = vector.shape_cast %2 : vector<1x128xf32> to vector<1x1x128xf32>
    %c0_3 = arith.constant 0 : index
    %c0_4 = arith.constant 0 : index
    %c0_5 = arith.constant 0 : index
    %c0_6 = arith.constant 0 : index
    %4 = vector.load %arg1[%c0_3, %c0_4, %c0_5, %c0_6] : memref<1x8x8x128xbf16, #tpu.memory_space<vmem>>, vector<1x8x8x128xbf16>
    %5 = vector.shape_cast %4 : vector<1x8x8x128xbf16> to vector<8x8x128xbf16>
    %6 = arith.extf %5 : vector<8x8x128xbf16> to vector<8x8x128xf32>
    %7 = vector.broadcast %1 : vector<1x1x128xf32> to vector<8x8x128xf32>
    %8 = arith.mulf %6, %7 : vector<8x8x128xf32>
    %9 = vector.broadcast %3 : vector<1x1x128xf32> to vector<8x8x128xf32>
    %10 = arith.addf %8, %9 : vector<8x8x128xf32>
    %cst = arith.constant 0.000000e+00 : f32
    %11 = vector.broadcast %cst : f32 to vector<8x8x128xf32>
    %12 = arith.maximumf %10, %11 : vector<8x8x128xf32>
    %13 = arith.truncf %12 : vector<8x8x128xf32> to vector<8x8x128xbf16>
    %cst_7 = arith.constant 0.000000e+00 : bf16
    %14 = vector.broadcast %cst_7 : bf16 to vector<10x10x128xbf16>
    %c0_8 = arith.constant 0 : index
    %c0_9 = arith.constant 0 : index
    %c0_10 = arith.constant 0 : index
    %15 = vector.load %arg7[%c0_8, %c0_9, %c0_10] : memref<10x10x128xbf16, #tpu.memory_space<vmem>>, vector<10x10x128xbf16>
    tpu.vector_store %arg7[%c0_8, %c0_9, %c0_10], %14 {strides = array<i32>} : memref<10x10x128xbf16, #tpu.memory_space<vmem>>, vector<10x10x128xbf16>,
    %c1 = arith.constant 1 : index
    %c1_11 = arith.constant 1 : index
    %c0_12 = arith.constant 0 : index
    %16 = vector.load %arg7[%c1, %c1_11, %c0_12] : memref<10x10x128xbf16, #tpu.memory_space<vmem>>, vector<8x8x128xbf16>
    tpu.vector_store %arg7[%c1, %c1_11, %c0_12], %13 {strides = array<i32>} : memref<10x10x128xbf16, #tpu.memory_space<vmem>>, vector<8x8x128xbf16>,
    %c0_13 = arith.constant 0 : index
    %c0_14 = arith.constant 0 : index
    %c0_15 = arith.constant 0 : index
    %17 = vector.load %arg7[%c0_13, %c0_14, %c0_15] : memref<10x10x128xbf16, #tpu.memory_space<vmem>>, vector<8x8x128xbf16>
    %18 = vector.shape_cast %17 : vector<8x8x128xbf16> to vector<64x128xbf16>
    %c0_16 = arith.constant 0 : index
    %c0_17 = arith.constant 0 : index
    %c0_18 = arith.constant 0 : index
    %19 = vector.load %arg4[%c0_16, %c0_17, %c0_18] : memref<9x128x128xbf16, #tpu.memory_space<vmem>>, vector<1x128x128xbf16>
    %20 = vector.shape_cast %19 : vector<1x128x128xbf16> to vector<128x128xbf16>
    %cst_19 = arith.constant dense<0.000000e+00> : vector<64x128xf32>
    %21 = tpu.matmul %18, %20, %cst_19 {dimension_numbers = #tpu.dot_dimension_numbers<[1], [0], [0], [1], [0, 0, 1, 1], [], []>} : vector<64x128xbf16>, vector<128x128xbf16>, vector<64x128xf32> -> vector<64x128xf32>
    %c0_20 = arith.constant 0 : index
    %c1_21 = arith.constant 1 : index
    %c0_22 = arith.constant 0 : index
    %22 = vector.load %arg7[%c0_20, %c1_21, %c0_22] : memref<10x10x128xbf16, #tpu.memory_space<vmem>>, vector<8x8x128xbf16>
    %23 = vector.shape_cast %22 : vector<8x8x128xbf16> to vector<64x128xbf16>
    %c1_23 = arith.constant 1 : index
    %c0_24 = arith.constant 0 : index
    %c0_25 = arith.constant 0 : index
    %24 = vector.load %arg4[%c1_23, %c0_24, %c0_25] : memref<9x128x128xbf16, #tpu.memory_space<vmem>>, vector<1x128x128xbf16>
    %25 = vector.shape_cast %24 : vector<1x128x128xbf16> to vector<128x128xbf16>
    %cst_26 = arith.constant dense<0.000000e+00> : vector<64x128xf32>
    %26 = tpu.matmul %23, %25, %cst_26 {dimension_numbers = #tpu.dot_dimension_numbers<[1], [0], [0], [1], [0, 0, 1, 1], [], []>} : vector<64x128xbf16>, vector<128x128xbf16>, vector<64x128xf32> -> vector<64x128xf32>
    %27 = arith.addf %21, %26 : vector<64x128xf32>
    %c0_27 = arith.constant 0 : index
    %c2 = arith.constant 2 : index
    %c0_28 = arith.constant 0 : index
    %28 = vector.load %arg7[%c0_27, %c2, %c0_28] : memref<10x10x128xbf16, #tpu.memory_space<vmem>>, vector<8x8x128xbf16>
    %29 = vector.shape_cast %28 : vector<8x8x128xbf16> to vector<64x128xbf16>
    %c2_29 = arith.constant 2 : index
    %c0_30 = arith.constant 0 : index
    %c0_31 = arith.constant 0 : index
    %30 = vector.load %arg4[%c2_29, %c0_30, %c0_31] : memref<9x128x128xbf16, #tpu.memory_space<vmem>>, vector<1x128x128xbf16>
    %31 = vector.shape_cast %30 : vector<1x128x128xbf16> to vector<128x128xbf16>
    %cst_32 = arith.constant dense<0.000000e+00> : vector<64x128xf32>
    %32 = tpu.matmul %29, %31, %cst_32 {dimension_numbers = #tpu.dot_dimension_numbers<[1], [0], [0], [1], [0, 0, 1, 1], [], []>} : vector<64x128xbf16>, vector<128x128xbf16>, vector<64x128xf32> -> vector<64x128xf32>
    %33 = arith.addf %27, %32 : vector<64x128xf32>
    %c1_33 = arith.constant 1 : index
    %c0_34 = arith.constant 0 : index
    %c0_35 = arith.constant 0 : index
    %34 = vector.load %arg7[%c1_33, %c0_34, %c0_35] : memref<10x10x128xbf16, #tpu.memory_space<vmem>>, vector<8x8x128xbf16>
    %35 = vector.shape_cast %34 : vector<8x8x128xbf16> to vector<64x128xbf16>
    %c3 = arith.constant 3 : index
    %c0_36 = arith.constant 0 : index
    %c0_37 = arith.constant 0 : index
    %36 = vector.load %arg4[%c3, %c0_36, %c0_37] : memref<9x128x128xbf16, #tpu.memory_space<vmem>>, vector<1x128x128xbf16>
    %37 = vector.shape_cast %36 : vector<1x128x128xbf16> to vector<128x128xbf16>
    %cst_38 = arith.constant dense<0.000000e+00> : vector<64x128xf32>
    %38 = tpu.matmul %35, %37, %cst_38 {dimension_numbers = #tpu.dot_dimension_numbers<[1], [0], [0], [1], [0, 0, 1, 1], [], []>} : vector<64x128xbf16>, vector<128x128xbf16>, vector<64x128xf32> -> vector<64x128xf32>
    %39 = arith.addf %33, %38 : vector<64x128xf32>
    %c1_39 = arith.constant 1 : index
    %c1_40 = arith.constant 1 : index
    %c0_41 = arith.constant 0 : index
    %40 = vector.load %arg7[%c1_39, %c1_40, %c0_41] : memref<10x10x128xbf16, #tpu.memory_space<vmem>>, vector<8x8x128xbf16>
    %41 = vector.shape_cast %40 : vector<8x8x128xbf16> to vector<64x128xbf16>
    %c4 = arith.constant 4 : index
    %c0_42 = arith.constant 0 : index
    %c0_43 = arith.constant 0 : index
    %42 = vector.load %arg4[%c4, %c0_42, %c0_43] : memref<9x128x128xbf16, #tpu.memory_space<vmem>>, vector<1x128x128xbf16>
    %43 = vector.shape_cast %42 : vector<1x128x128xbf16> to vector<128x128xbf16>
    %cst_44 = arith.constant dense<0.000000e+00> : vector<64x128xf32>
    %44 = tpu.matmul %41, %43, %cst_44 {dimension_numbers = #tpu.dot_dimension_numbers<[1], [0], [0], [1], [0, 0, 1, 1], [], []>} : vector<64x128xbf16>, vector<128x128xbf16>, vector<64x128xf32> -> vector<64x128xf32>
    %45 = arith.addf %39, %44 : vector<64x128xf32>
    %c1_45 = arith.constant 1 : index
    %c2_46 = arith.constant 2 : index
    %c0_47 = arith.constant 0 : index
    %46 = vector.load %arg7[%c1_45, %c2_46, %c0_47] : memref<10x10x128xbf16, #tpu.memory_space<vmem>>, vector<8x8x128xbf16>
    %47 = vector.shape_cast %46 : vector<8x8x128xbf16> to vector<64x128xbf16>
    %c5 = arith.constant 5 : index
    %c0_48 = arith.constant 0 : index
    %c0_49 = arith.constant 0 : index
    %48 = vector.load %arg4[%c5, %c0_48, %c0_49] : memref<9x128x128xbf16, #tpu.memory_space<vmem>>, vector<1x128x128xbf16>
    %49 = vector.shape_cast %48 : vector<1x128x128xbf16> to vector<128x128xbf16>
    %cst_50 = arith.constant dense<0.000000e+00> : vector<64x128xf32>
    %50 = tpu.matmul %47, %49, %cst_50 {dimension_numbers = #tpu.dot_dimension_numbers<[1], [0], [0], [1], [0, 0, 1, 1], [], []>} : vector<64x128xbf16>, vector<128x128xbf16>, vector<64x128xf32> -> vector<64x128xf32>
    %51 = arith.addf %45, %50 : vector<64x128xf32>
    %c2_51 = arith.constant 2 : index
    %c0_52 = arith.constant 0 : index
    %c0_53 = arith.constant 0 : index
    %52 = vector.load %arg7[%c2_51, %c0_52, %c0_53] : memref<10x10x128xbf16, #tpu.memory_space<vmem>>, vector<8x8x128xbf16>
    %53 = vector.shape_cast %52 : vector<8x8x128xbf16> to vector<64x128xbf16>
    %c6 = arith.constant 6 : index
    %c0_54 = arith.constant 0 : index
    %c0_55 = arith.constant 0 : index
    %54 = vector.load %arg4[%c6, %c0_54, %c0_55] : memref<9x128x128xbf16, #tpu.memory_space<vmem>>, vector<1x128x128xbf16>
    %55 = vector.shape_cast %54 : vector<1x128x128xbf16> to vector<128x128xbf16>
    %cst_56 = arith.constant dense<0.000000e+00> : vector<64x128xf32>
    %56 = tpu.matmul %53, %55, %cst_56 {dimension_numbers = #tpu.dot_dimension_numbers<[1], [0], [0], [1], [0, 0, 1, 1], [], []>} : vector<64x128xbf16>, vector<128x128xbf16>, vector<64x128xf32> -> vector<64x128xf32>
    %57 = arith.addf %51, %56 : vector<64x128xf32>
    %c2_57 = arith.constant 2 : index
    %c1_58 = arith.constant 1 : index
    %c0_59 = arith.constant 0 : index
    %58 = vector.load %arg7[%c2_57, %c1_58, %c0_59] : memref<10x10x128xbf16, #tpu.memory_space<vmem>>, vector<8x8x128xbf16>
    %59 = vector.shape_cast %58 : vector<8x8x128xbf16> to vector<64x128xbf16>
    %c7 = arith.constant 7 : index
    %c0_60 = arith.constant 0 : index
    %c0_61 = arith.constant 0 : index
    %60 = vector.load %arg4[%c7, %c0_60, %c0_61] : memref<9x128x128xbf16, #tpu.memory_space<vmem>>, vector<1x128x128xbf16>
    %61 = vector.shape_cast %60 : vector<1x128x128xbf16> to vector<128x128xbf16>
    %cst_62 = arith.constant dense<0.000000e+00> : vector<64x128xf32>
    %62 = tpu.matmul %59, %61, %cst_62 {dimension_numbers = #tpu.dot_dimension_numbers<[1], [0], [0], [1], [0, 0, 1, 1], [], []>} : vector<64x128xbf16>, vector<128x128xbf16>, vector<64x128xf32> -> vector<64x128xf32>
    %63 = arith.addf %57, %62 : vector<64x128xf32>
    %c2_63 = arith.constant 2 : index
    %c2_64 = arith.constant 2 : index
    %c0_65 = arith.constant 0 : index
    %64 = vector.load %arg7[%c2_63, %c2_64, %c0_65] : memref<10x10x128xbf16, #tpu.memory_space<vmem>>, vector<8x8x128xbf16>
    %65 = vector.shape_cast %64 : vector<8x8x128xbf16> to vector<64x128xbf16>
    %c8 = arith.constant 8 : index
    %c0_66 = arith.constant 0 : index
    %c0_67 = arith.constant 0 : index
    %66 = vector.load %arg4[%c8, %c0_66, %c0_67] : memref<9x128x128xbf16, #tpu.memory_space<vmem>>, vector<1x128x128xbf16>
    %67 = vector.shape_cast %66 : vector<1x128x128xbf16> to vector<128x128xbf16>
    %cst_68 = arith.constant dense<0.000000e+00> : vector<64x128xf32>
    %68 = tpu.matmul %65, %67, %cst_68 {dimension_numbers = #tpu.dot_dimension_numbers<[1], [0], [0], [1], [0, 0, 1, 1], [], []>} : vector<64x128xbf16>, vector<128x128xbf16>, vector<64x128xf32> -> vector<64x128xf32>
    %69 = arith.addf %63, %68 : vector<64x128xf32>
    %70 = arith.truncf %69 : vector<64x128xf32> to vector<64x128xbf16>
    %c0_69 = arith.constant 0 : index
    %c0_70 = arith.constant 0 : index
    %c0_71 = arith.constant 0 : index
    %71 = vector.load %arg5[%c0_69, %c0_70, %c0_71] : memref<1x64x128xbf16, #tpu.memory_space<vmem>>, vector<1x64x128xbf16>
    %72 = vector.shape_cast %71 : vector<1x64x128xbf16> to vector<64x128xbf16>
    %73 = vector.shape_cast %70 : vector<64x128xbf16> to vector<1x64x128xbf16>
    tpu.vector_store %arg5[%c0_69, %c0_70, %c0_71], %73 {strides = array<i32>} : memref<1x64x128xbf16, #tpu.memory_space<vmem>>, vector<1x64x128xbf16>,
    %cst_72 = arith.constant dense<0.000000e+00> : vector<128xf32>
    %74 = vector.multi_reduction <add>, %69, %cst_72 [0] : vector<64x128xf32> to vector<128xf32>
    %75 = vector.shape_cast %74 : vector<128xf32> to vector<1x128xf32>
    %cst_73 = arith.constant 1.562500e-02 : f32
    %76 = vector.broadcast %cst_73 : f32 to vector<1x128xf32>
    %77 = arith.mulf %75, %76 : vector<1x128xf32>
    %78 = vector.broadcast %77 : vector<1x128xf32> to vector<64x128xf32>
    %79 = arith.subf %69, %78 : vector<64x128xf32>
    %80 = arith.mulf %79, %79 : vector<64x128xf32>
    %cst_74 = arith.constant dense<0.000000e+00> : vector<128xf32>
    %81 = vector.multi_reduction <add>, %80, %cst_74 [0] : vector<64x128xf32> to vector<128xf32>
    %82 = vector.shape_cast %81 : vector<128xf32> to vector<1x128xf32>
    %83 = tpu.iota {dimensions = array<i32: 0>} : vector<8x128xi32>
    %c0_i32 = arith.constant 0 : i32
    %84 = vector.broadcast %c0_i32 : i32 to vector<8x128xi32>
    %85 = arith.cmpi eq, %83, %84 : vector<8x128xi32>
    %c1_i32 = arith.constant 1 : i32
    %86 = vector.broadcast %c1_i32 : i32 to vector<8x128xi32>
    %87 = arith.cmpi eq, %83, %86 : vector<8x128xi32>
    %c2_i32 = arith.constant 2 : i32
    %88 = vector.broadcast %c2_i32 : i32 to vector<8x128xi32>
    %89 = arith.cmpi eq, %83, %88 : vector<8x128xi32>
    %cst_75 = arith.constant 0.000000e+00 : f32
    %90 = vector.shape_cast %82 : vector<1x128xf32> to vector<1x128xf32>
    %91 = vector.broadcast %90 : vector<1x128xf32> to vector<8x128xf32>
    %92 = vector.broadcast %cst_75 : f32 to vector<8x128xf32>
    %93 = arith.select %89, %91, %92 : vector<8x128xi1>, vector<8x128xf32>
    %94 = vector.shape_cast %75 : vector<1x128xf32> to vector<1x128xf32>
    %95 = vector.broadcast %94 : vector<1x128xf32> to vector<8x128xf32>
    %96 = arith.select %87, %95, %93 : vector<8x128xi1>, vector<8x128xf32>
    %cst_76 = arith.constant 6.400000e+01 : f32
    %97 = vector.broadcast %cst_76 : f32 to vector<8x128xf32>
    %98 = arith.select %85, %97, %96 : vector<8x128xi1>, vector<8x128xf32>
    %c0_77 = arith.constant 0 : index
    %c0_78 = arith.constant 0 : index
    %c0_79 = arith.constant 0 : index
    %99 = vector.load %arg6[%c0_77, %c0_78, %c0_79] : memref<1x8x128xf32, #tpu.memory_space<vmem>>, vector<1x8x128xf32>
    %100 = vector.shape_cast %99 : vector<1x8x128xf32> to vector<8x128xf32>
    %101 = vector.shape_cast %98 : vector<8x128xf32> to vector<1x8x128xf32>
    tpu.vector_store %arg6[%c0_77, %c0_78, %c0_79], %101 {strides = array<i32>} : memref<1x8x128xf32, #tpu.memory_space<vmem>>, vector<1x8x128xf32>,
    return
  }
  func.func @transform_0(%arg0: i32) -> (i32, i32, i32, i32) {
    %c0_i32 = arith.constant 0 : i32
    %c0_i32_0 = arith.constant 0 : i32
    %c0_i32_1 = arith.constant 0 : i32
    %c0_i32_2 = arith.constant 0 : i32
    return %arg0, %c0_i32, %c0_i32_0, %c0_i32_1 : i32, i32, i32, i32
  }
  func.func @transform_1(%arg0: i32) -> (i32, i32) {
    %c0_i32 = arith.constant 0 : i32
    %c0_i32_0 = arith.constant 0 : i32
    %c0_i32_1 = arith.constant 0 : i32
    return %c0_i32, %c0_i32_0 : i32, i32
  }
  func.func @transform_2(%arg0: i32) -> (i32, i32) {
    %c0_i32 = arith.constant 0 : i32
    %c0_i32_0 = arith.constant 0 : i32
    %c0_i32_1 = arith.constant 0 : i32
    return %c0_i32, %c0_i32_0 : i32, i32
  }
  func.func @transform_3(%arg0: i32) -> (i32, i32, i32) {
    %c0_i32 = arith.constant 0 : i32
    %c0_i32_0 = arith.constant 0 : i32
    %c0_i32_1 = arith.constant 0 : i32
    %c0_i32_2 = arith.constant 0 : i32
    return %c0_i32, %c0_i32_0, %c0_i32_1 : i32, i32, i32
  }
  func.func @transform_4(%arg0: i32) -> (i32, i32, i32) {
    %c0_i32 = arith.constant 0 : i32
    %c0_i32_0 = arith.constant 0 : i32
    %c0_i32_1 = arith.constant 0 : i32
    return %arg0, %c0_i32, %c0_i32_0 : i32, i32, i32
  }
  func.func @transform_5(%arg0: i32) -> (i32, i32, i32) {
    %c0_i32 = arith.constant 0 : i32
    %c0_i32_0 = arith.constant 0 : i32
    %c0_i32_1 = arith.constant 0 : i32
    return %arg0, %c0_i32, %c0_i32_0 : i32, i32, i32
  }
}

module attributes {stable_mosaic.version = 11 : i64} {
  func.func @_conv3x3_s2_kernel(%arg0: i32, %arg1: memref<1x4x2x4x256xbf16, #tpu.memory_space<vmem>>, %arg2: memref<1x256xf32, #tpu.memory_space<vmem>>, %arg3: memref<1x256xf32, #tpu.memory_space<vmem>>, %arg4: memref<1x4x2x4x256xbf16, #tpu.memory_space<vmem>>, %arg5: memref<1x256xf32, #tpu.memory_space<vmem>>, %arg6: memref<1x256xf32, #tpu.memory_space<vmem>>, %arg7: memref<9x128x128xbf16, #tpu.memory_space<vmem>>, %arg8: memref<1x16x128xbf16, #tpu.memory_space<vmem>>, %arg9: memref<1x8x128xf32, #tpu.memory_space<vmem>>, %arg10: memref<6x2x6x256xbf16, #tpu.memory_space<vmem>>) attributes {dimension_semantics = [#tpu.dimension_semantics<parallel>], iteration_bounds = array<i64: 2>, scalar_prefetch = 0 : i64, scratch_operands = 1 : i64, tpu.core_type = #tpu.core_type<tc>, window_params = [{transform_indices = @transform_0, window_bounds = array<i64: 1, 4, 2, 4, 256>}, {pipeline_mode = #tpu.pipeline_mode<synchronous>, transform_indices = @transform_1, window_bounds = array<i64: 1, 256>}, {pipeline_mode = #tpu.pipeline_mode<synchronous>, transform_indices = @transform_2, window_bounds = array<i64: 1, 256>}, {transform_indices = @transform_3, window_bounds = array<i64: 1, 4, 2, 4, 256>}, {pipeline_mode = #tpu.pipeline_mode<synchronous>, transform_indices = @transform_4, window_bounds = array<i64: 1, 256>}, {pipeline_mode = #tpu.pipeline_mode<synchronous>, transform_indices = @transform_5, window_bounds = array<i64: 1, 256>}, {pipeline_mode = #tpu.pipeline_mode<synchronous>, transform_indices = @transform_6, window_bounds = array<i64: 9, 128, 128>}, {transform_indices = @transform_7, window_bounds = array<i64: 1, 16, 128>}, {transform_indices = @transform_8, window_bounds = array<i64: 1, 8, 128>}]} {
    %c0 = arith.constant 0 : index
    %c0_0 = arith.constant 0 : index
    %0 = vector.load %arg2[%c0, %c0_0] : memref<1x256xf32, #tpu.memory_space<vmem>>, vector<1x256xf32>
    %1 = vector.shape_cast %0 : vector<1x256xf32> to vector<1x1x1x256xf32>
    %c0_1 = arith.constant 0 : index
    %c0_2 = arith.constant 0 : index
    %2 = vector.load %arg3[%c0_1, %c0_2] : memref<1x256xf32, #tpu.memory_space<vmem>>, vector<1x256xf32>
    %3 = vector.shape_cast %2 : vector<1x256xf32> to vector<1x1x1x256xf32>
    %c0_3 = arith.constant 0 : index
    %c0_4 = arith.constant 0 : index
    %4 = vector.load %arg5[%c0_3, %c0_4] : memref<1x256xf32, #tpu.memory_space<vmem>>, vector<1x256xf32>
    %5 = vector.shape_cast %4 : vector<1x256xf32> to vector<1x1x1x256xf32>
    %c0_5 = arith.constant 0 : index
    %c0_6 = arith.constant 0 : index
    %6 = vector.load %arg6[%c0_5, %c0_6] : memref<1x256xf32, #tpu.memory_space<vmem>>, vector<1x256xf32>
    %7 = vector.shape_cast %6 : vector<1x256xf32> to vector<1x1x1x256xf32>
    %c0_7 = arith.constant 0 : index
    %c0_8 = arith.constant 0 : index
    %c0_9 = arith.constant 0 : index
    %c0_10 = arith.constant 0 : index
    %c0_11 = arith.constant 0 : index
    %8 = vector.load %arg1[%c0_7, %c0_8, %c0_9, %c0_10, %c0_11] : memref<1x4x2x4x256xbf16, #tpu.memory_space<vmem>>, vector<1x4x2x4x256xbf16>
    %9 = vector.shape_cast %8 : vector<1x4x2x4x256xbf16> to vector<4x2x4x256xbf16>
    %10 = arith.extf %9 : vector<4x2x4x256xbf16> to vector<4x2x4x256xf32>
    %11 = vector.broadcast %1 : vector<1x1x1x256xf32> to vector<4x2x4x256xf32>
    %12 = arith.mulf %10, %11 : vector<4x2x4x256xf32>
    %13 = vector.broadcast %3 : vector<1x1x1x256xf32> to vector<4x2x4x256xf32>
    %14 = arith.addf %12, %13 : vector<4x2x4x256xf32>
    %c0_12 = arith.constant 0 : index
    %c0_13 = arith.constant 0 : index
    %c0_14 = arith.constant 0 : index
    %c0_15 = arith.constant 0 : index
    %c0_16 = arith.constant 0 : index
    %15 = vector.load %arg4[%c0_12, %c0_13, %c0_14, %c0_15, %c0_16] : memref<1x4x2x4x256xbf16, #tpu.memory_space<vmem>>, vector<1x4x2x4x256xbf16>
    %16 = vector.shape_cast %15 : vector<1x4x2x4x256xbf16> to vector<4x2x4x256xbf16>
    %17 = arith.extf %16 : vector<4x2x4x256xbf16> to vector<4x2x4x256xf32>
    %18 = vector.broadcast %5 : vector<1x1x1x256xf32> to vector<4x2x4x256xf32>
    %19 = arith.mulf %17, %18 : vector<4x2x4x256xf32>
    %20 = vector.broadcast %7 : vector<1x1x1x256xf32> to vector<4x2x4x256xf32>
    %21 = arith.addf %19, %20 : vector<4x2x4x256xf32>
    %cst = arith.constant 0.000000e+00 : f32
    %22 = vector.broadcast %cst : f32 to vector<4x2x4x256xf32>
    %23 = arith.maximumf %21, %22 : vector<4x2x4x256xf32>
    %24 = arith.addf %14, %23 : vector<4x2x4x256xf32>
    %25 = arith.truncf %24 : vector<4x2x4x256xf32> to vector<4x2x4x256xbf16>
    %cst_17 = arith.constant 0.000000e+00 : bf16
    %26 = vector.broadcast %cst_17 : bf16 to vector<6x2x6x256xbf16>
    %c0_18 = arith.constant 0 : index
    %c0_19 = arith.constant 0 : index
    %c0_20 = arith.constant 0 : index
    %c0_21 = arith.constant 0 : index
    %27 = vector.load %arg10[%c0_18, %c0_19, %c0_20, %c0_21] : memref<6x2x6x256xbf16, #tpu.memory_space<vmem>>, vector<6x2x6x256xbf16>
    tpu.vector_store %arg10[%c0_18, %c0_19, %c0_20, %c0_21], %26 {strides = array<i32>} : memref<6x2x6x256xbf16, #tpu.memory_space<vmem>>, vector<6x2x6x256xbf16>,
    %c1 = arith.constant 1 : index
    %c0_22 = arith.constant 0 : index
    %c1_23 = arith.constant 1 : index
    %c0_24 = arith.constant 0 : index
    %28 = vector.load %arg10[%c1, %c0_22, %c1_23, %c0_24] : memref<6x2x6x256xbf16, #tpu.memory_space<vmem>>, vector<4x2x4x256xbf16>
    tpu.vector_store %arg10[%c1, %c0_22, %c1_23, %c0_24], %25 {strides = array<i32>} : memref<6x2x6x256xbf16, #tpu.memory_space<vmem>>, vector<4x2x4x256xbf16>,
    %c0_25 = arith.constant 0 : index
    %c1_26 = arith.constant 1 : index
    %c0_27 = arith.constant 0 : index
    %c0_28 = arith.constant 0 : index
    %29 = vector.load %arg10[%c0_25, %c1_26, %c0_27, %c0_28] : memref<6x2x6x256xbf16, #tpu.memory_space<vmem>>, vector<4x1x4x256xbf16>
    %30 = vector.shape_cast %29 : vector<4x1x4x256xbf16> to vector<4x4x256xbf16>
    %31 = vector.extract_strided_slice %30 {offsets = [0, 0, 128], sizes = [4, 4, 128], strides = [1, 1, 1]} : vector<4x4x256xbf16> to vector<4x4x128xbf16>
    %32 = vector.shape_cast %31 : vector<4x4x128xbf16> to vector<16x128xbf16>
    %c0_29 = arith.constant 0 : index
    %c0_30 = arith.constant 0 : index
    %c0_31 = arith.constant 0 : index
    %33 = vector.load %arg7[%c0_29, %c0_30, %c0_31] : memref<9x128x128xbf16, #tpu.memory_space<vmem>>, vector<1x128x128xbf16>
    %34 = vector.shape_cast %33 : vector<1x128x128xbf16> to vector<128x128xbf16>
    %cst_32 = arith.constant dense<0.000000e+00> : vector<16x128xf32>
    %35 = tpu.matmul %32, %34, %cst_32 {dimension_numbers = #tpu.dot_dimension_numbers<[1], [0], [0], [1], [0, 0, 1, 1], [], []>} : vector<16x128xbf16>, vector<128x128xbf16>, vector<16x128xf32> -> vector<16x128xf32>
    %c0_33 = arith.constant 0 : index
    %c1_34 = arith.constant 1 : index
    %c1_35 = arith.constant 1 : index
    %c0_36 = arith.constant 0 : index
    %36 = vector.load %arg10[%c0_33, %c1_34, %c1_35, %c0_36] : memref<6x2x6x256xbf16, #tpu.memory_space<vmem>>, vector<4x1x4x256xbf16>
    %37 = vector.shape_cast %36 : vector<4x1x4x256xbf16> to vector<4x4x256xbf16>
    %38 = vector.extract_strided_slice %37 {offsets = [0, 0, 0], sizes = [4, 4, 128], strides = [1, 1, 1]} : vector<4x4x256xbf16> to vector<4x4x128xbf16>
    %39 = vector.shape_cast %38 : vector<4x4x128xbf16> to vector<16x128xbf16>
    %c1_37 = arith.constant 1 : index
    %c0_38 = arith.constant 0 : index
    %c0_39 = arith.constant 0 : index
    %40 = vector.load %arg7[%c1_37, %c0_38, %c0_39] : memref<9x128x128xbf16, #tpu.memory_space<vmem>>, vector<1x128x128xbf16>
    %41 = vector.shape_cast %40 : vector<1x128x128xbf16> to vector<128x128xbf16>
    %cst_40 = arith.constant dense<0.000000e+00> : vector<16x128xf32>
    %42 = tpu.matmul %39, %41, %cst_40 {dimension_numbers = #tpu.dot_dimension_numbers<[1], [0], [0], [1], [0, 0, 1, 1], [], []>} : vector<16x128xbf16>, vector<128x128xbf16>, vector<16x128xf32> -> vector<16x128xf32>
    %43 = arith.addf %35, %42 : vector<16x128xf32>
    %c0_41 = arith.constant 0 : index
    %c1_42 = arith.constant 1 : index
    %c1_43 = arith.constant 1 : index
    %c0_44 = arith.constant 0 : index
    %44 = vector.load %arg10[%c0_41, %c1_42, %c1_43, %c0_44] : memref<6x2x6x256xbf16, #tpu.memory_space<vmem>>, vector<4x1x4x256xbf16>
    %45 = vector.shape_cast %44 : vector<4x1x4x256xbf16> to vector<4x4x256xbf16>
    %46 = vector.extract_strided_slice %45 {offsets = [0, 0, 128], sizes = [4, 4, 128], strides = [1, 1, 1]} : vector<4x4x256xbf16> to vector<4x4x128xbf16>
    %47 = vector.shape_cast %46 : vector<4x4x128xbf16> to vector<16x128xbf16>
    %c2 = arith.constant 2 : index
    %c0_45 = arith.constant 0 : index
    %c0_46 = arith.constant 0 : index
    %48 = vector.load %arg7[%c2, %c0_45, %c0_46] : memref<9x128x128xbf16, #tpu.memory_space<vmem>>, vector<1x128x128xbf16>
    %49 = vector.shape_cast %48 : vector<1x128x128xbf16> to vector<128x128xbf16>
    %cst_47 = arith.constant dense<0.000000e+00> : vector<16x128xf32>
    %50 = tpu.matmul %47, %49, %cst_47 {dimension_numbers = #tpu.dot_dimension_numbers<[1], [0], [0], [1], [0, 0, 1, 1], [], []>} : vector<16x128xbf16>, vector<128x128xbf16>, vector<16x128xf32> -> vector<16x128xf32>
    %51 = arith.addf %43, %50 : vector<16x128xf32>
    %c1_48 = arith.constant 1 : index
    %c0_49 = arith.constant 0 : index
    %c0_50 = arith.constant 0 : index
    %c0_51 = arith.constant 0 : index
    %52 = vector.load %arg10[%c1_48, %c0_49, %c0_50, %c0_51] : memref<6x2x6x256xbf16, #tpu.memory_space<vmem>>, vector<4x1x4x256xbf16>
    %53 = vector.shape_cast %52 : vector<4x1x4x256xbf16> to vector<4x4x256xbf16>
    %54 = vector.extract_strided_slice %53 {offsets = [0, 0, 128], sizes = [4, 4, 128], strides = [1, 1, 1]} : vector<4x4x256xbf16> to vector<4x4x128xbf16>
    %55 = vector.shape_cast %54 : vector<4x4x128xbf16> to vector<16x128xbf16>
    %c3 = arith.constant 3 : index
    %c0_52 = arith.constant 0 : index
    %c0_53 = arith.constant 0 : index
    %56 = vector.load %arg7[%c3, %c0_52, %c0_53] : memref<9x128x128xbf16, #tpu.memory_space<vmem>>, vector<1x128x128xbf16>
    %57 = vector.shape_cast %56 : vector<1x128x128xbf16> to vector<128x128xbf16>
    %cst_54 = arith.constant dense<0.000000e+00> : vector<16x128xf32>
    %58 = tpu.matmul %55, %57, %cst_54 {dimension_numbers = #tpu.dot_dimension_numbers<[1], [0], [0], [1], [0, 0, 1, 1], [], []>} : vector<16x128xbf16>, vector<128x128xbf16>, vector<16x128xf32> -> vector<16x128xf32>
    %59 = arith.addf %51, %58 : vector<16x128xf32>
    %c1_55 = arith.constant 1 : index
    %c0_56 = arith.constant 0 : index
    %c1_57 = arith.constant 1 : index
    %c0_58 = arith.constant 0 : index
    %60 = vector.load %arg10[%c1_55, %c0_56, %c1_57, %c0_58] : memref<6x2x6x256xbf16, #tpu.memory_space<vmem>>, vector<4x1x4x256xbf16>
    %61 = vector.shape_cast %60 : vector<4x1x4x256xbf16> to vector<4x4x256xbf16>
    %62 = vector.extract_strided_slice %61 {offsets = [0, 0, 0], sizes = [4, 4, 128], strides = [1, 1, 1]} : vector<4x4x256xbf16> to vector<4x4x128xbf16>
    %63 = vector.shape_cast %62 : vector<4x4x128xbf16> to vector<16x128xbf16>
    %c4 = arith.constant 4 : index
    %c0_59 = arith.constant 0 : index
    %c0_60 = arith.constant 0 : index
    %64 = vector.load %arg7[%c4, %c0_59, %c0_60] : memref<9x128x128xbf16, #tpu.memory_space<vmem>>, vector<1x128x128xbf16>
    %65 = vector.shape_cast %64 : vector<1x128x128xbf16> to vector<128x128xbf16>
    %cst_61 = arith.constant dense<0.000000e+00> : vector<16x128xf32>
    %66 = tpu.matmul %63, %65, %cst_61 {dimension_numbers = #tpu.dot_dimension_numbers<[1], [0], [0], [1], [0, 0, 1, 1], [], []>} : vector<16x128xbf16>, vector<128x128xbf16>, vector<16x128xf32> -> vector<16x128xf32>
    %67 = arith.addf %59, %66 : vector<16x128xf32>
    %c1_62 = arith.constant 1 : index
    %c0_63 = arith.constant 0 : index
    %c1_64 = arith.constant 1 : index
    %c0_65 = arith.constant 0 : index
    %68 = vector.load %arg10[%c1_62, %c0_63, %c1_64, %c0_65] : memref<6x2x6x256xbf16, #tpu.memory_space<vmem>>, vector<4x1x4x256xbf16>
    %69 = vector.shape_cast %68 : vector<4x1x4x256xbf16> to vector<4x4x256xbf16>
    %70 = vector.extract_strided_slice %69 {offsets = [0, 0, 128], sizes = [4, 4, 128], strides = [1, 1, 1]} : vector<4x4x256xbf16> to vector<4x4x128xbf16>
    %71 = vector.shape_cast %70 : vector<4x4x128xbf16> to vector<16x128xbf16>
    %c5 = arith.constant 5 : index
    %c0_66 = arith.constant 0 : index
    %c0_67 = arith.constant 0 : index
    %72 = vector.load %arg7[%c5, %c0_66, %c0_67] : memref<9x128x128xbf16, #tpu.memory_space<vmem>>, vector<1x128x128xbf16>
    %73 = vector.shape_cast %72 : vector<1x128x128xbf16> to vector<128x128xbf16>
    %cst_68 = arith.constant dense<0.000000e+00> : vector<16x128xf32>
    %74 = tpu.matmul %71, %73, %cst_68 {dimension_numbers = #tpu.dot_dimension_numbers<[1], [0], [0], [1], [0, 0, 1, 1], [], []>} : vector<16x128xbf16>, vector<128x128xbf16>, vector<16x128xf32> -> vector<16x128xf32>
    %75 = arith.addf %67, %74 : vector<16x128xf32>
    %c1_69 = arith.constant 1 : index
    %c1_70 = arith.constant 1 : index
    %c0_71 = arith.constant 0 : index
    %c0_72 = arith.constant 0 : index
    %76 = vector.load %arg10[%c1_69, %c1_70, %c0_71, %c0_72] : memref<6x2x6x256xbf16, #tpu.memory_space<vmem>>, vector<4x1x4x256xbf16>
    %77 = vector.shape_cast %76 : vector<4x1x4x256xbf16> to vector<4x4x256xbf16>
    %78 = vector.extract_strided_slice %77 {offsets = [0, 0, 128], sizes = [4, 4, 128], strides = [1, 1, 1]} : vector<4x4x256xbf16> to vector<4x4x128xbf16>
    %79 = vector.shape_cast %78 : vector<4x4x128xbf16> to vector<16x128xbf16>
    %c6 = arith.constant 6 : index
    %c0_73 = arith.constant 0 : index
    %c0_74 = arith.constant 0 : index
    %80 = vector.load %arg7[%c6, %c0_73, %c0_74] : memref<9x128x128xbf16, #tpu.memory_space<vmem>>, vector<1x128x128xbf16>
    %81 = vector.shape_cast %80 : vector<1x128x128xbf16> to vector<128x128xbf16>
    %cst_75 = arith.constant dense<0.000000e+00> : vector<16x128xf32>
    %82 = tpu.matmul %79, %81, %cst_75 {dimension_numbers = #tpu.dot_dimension_numbers<[1], [0], [0], [1], [0, 0, 1, 1], [], []>} : vector<16x128xbf16>, vector<128x128xbf16>, vector<16x128xf32> -> vector<16x128xf32>
    %83 = arith.addf %75, %82 : vector<16x128xf32>
    %c1_76 = arith.constant 1 : index
    %c1_77 = arith.constant 1 : index
    %c1_78 = arith.constant 1 : index
    %c0_79 = arith.constant 0 : index
    %84 = vector.load %arg10[%c1_76, %c1_77, %c1_78, %c0_79] : memref<6x2x6x256xbf16, #tpu.memory_space<vmem>>, vector<4x1x4x256xbf16>
    %85 = vector.shape_cast %84 : vector<4x1x4x256xbf16> to vector<4x4x256xbf16>
    %86 = vector.extract_strided_slice %85 {offsets = [0, 0, 0], sizes = [4, 4, 128], strides = [1, 1, 1]} : vector<4x4x256xbf16> to vector<4x4x128xbf16>
    %87 = vector.shape_cast %86 : vector<4x4x128xbf16> to vector<16x128xbf16>
    %c7 = arith.constant 7 : index
    %c0_80 = arith.constant 0 : index
    %c0_81 = arith.constant 0 : index
    %88 = vector.load %arg7[%c7, %c0_80, %c0_81] : memref<9x128x128xbf16, #tpu.memory_space<vmem>>, vector<1x128x128xbf16>
    %89 = vector.shape_cast %88 : vector<1x128x128xbf16> to vector<128x128xbf16>
    %cst_82 = arith.constant dense<0.000000e+00> : vector<16x128xf32>
    %90 = tpu.matmul %87, %89, %cst_82 {dimension_numbers = #tpu.dot_dimension_numbers<[1], [0], [0], [1], [0, 0, 1, 1], [], []>} : vector<16x128xbf16>, vector<128x128xbf16>, vector<16x128xf32> -> vector<16x128xf32>
    %91 = arith.addf %83, %90 : vector<16x128xf32>
    %c1_83 = arith.constant 1 : index
    %c1_84 = arith.constant 1 : index
    %c1_85 = arith.constant 1 : index
    %c0_86 = arith.constant 0 : index
    %92 = vector.load %arg10[%c1_83, %c1_84, %c1_85, %c0_86] : memref<6x2x6x256xbf16, #tpu.memory_space<vmem>>, vector<4x1x4x256xbf16>
    %93 = vector.shape_cast %92 : vector<4x1x4x256xbf16> to vector<4x4x256xbf16>
    %94 = vector.extract_strided_slice %93 {offsets = [0, 0, 128], sizes = [4, 4, 128], strides = [1, 1, 1]} : vector<4x4x256xbf16> to vector<4x4x128xbf16>
    %95 = vector.shape_cast %94 : vector<4x4x128xbf16> to vector<16x128xbf16>
    %c8 = arith.constant 8 : index
    %c0_87 = arith.constant 0 : index
    %c0_88 = arith.constant 0 : index
    %96 = vector.load %arg7[%c8, %c0_87, %c0_88] : memref<9x128x128xbf16, #tpu.memory_space<vmem>>, vector<1x128x128xbf16>
    %97 = vector.shape_cast %96 : vector<1x128x128xbf16> to vector<128x128xbf16>
    %cst_89 = arith.constant dense<0.000000e+00> : vector<16x128xf32>
    %98 = tpu.matmul %95, %97, %cst_89 {dimension_numbers = #tpu.dot_dimension_numbers<[1], [0], [0], [1], [0, 0, 1, 1], [], []>} : vector<16x128xbf16>, vector<128x128xbf16>, vector<16x128xf32> -> vector<16x128xf32>
    %99 = arith.addf %91, %98 : vector<16x128xf32>
    %100 = arith.truncf %99 : vector<16x128xf32> to vector<16x128xbf16>
    %c0_90 = arith.constant 0 : index
    %c0_91 = arith.constant 0 : index
    %c0_92 = arith.constant 0 : index
    %101 = vector.load %arg8[%c0_90, %c0_91, %c0_92] : memref<1x16x128xbf16, #tpu.memory_space<vmem>>, vector<1x16x128xbf16>
    %102 = vector.shape_cast %101 : vector<1x16x128xbf16> to vector<16x128xbf16>
    %103 = vector.shape_cast %100 : vector<16x128xbf16> to vector<1x16x128xbf16>
    tpu.vector_store %arg8[%c0_90, %c0_91, %c0_92], %103 {strides = array<i32>} : memref<1x16x128xbf16, #tpu.memory_space<vmem>>, vector<1x16x128xbf16>,
    %cst_93 = arith.constant dense<0.000000e+00> : vector<128xf32>
    %104 = vector.multi_reduction <add>, %99, %cst_93 [0] : vector<16x128xf32> to vector<128xf32>
    %105 = vector.shape_cast %104 : vector<128xf32> to vector<1x128xf32>
    %cst_94 = arith.constant 6.250000e-02 : f32
    %106 = vector.broadcast %cst_94 : f32 to vector<1x128xf32>
    %107 = arith.mulf %105, %106 : vector<1x128xf32>
    %108 = vector.broadcast %107 : vector<1x128xf32> to vector<16x128xf32>
    %109 = arith.subf %99, %108 : vector<16x128xf32>
    %110 = arith.mulf %109, %109 : vector<16x128xf32>
    %cst_95 = arith.constant dense<0.000000e+00> : vector<128xf32>
    %111 = vector.multi_reduction <add>, %110, %cst_95 [0] : vector<16x128xf32> to vector<128xf32>
    %112 = vector.shape_cast %111 : vector<128xf32> to vector<1x128xf32>
    %113 = tpu.iota {dimensions = array<i32: 0>} : vector<8x128xi32>
    %c0_i32 = arith.constant 0 : i32
    %114 = vector.broadcast %c0_i32 : i32 to vector<8x128xi32>
    %115 = arith.cmpi eq, %113, %114 : vector<8x128xi32>
    %c1_i32 = arith.constant 1 : i32
    %116 = vector.broadcast %c1_i32 : i32 to vector<8x128xi32>
    %117 = arith.cmpi eq, %113, %116 : vector<8x128xi32>
    %c2_i32 = arith.constant 2 : i32
    %118 = vector.broadcast %c2_i32 : i32 to vector<8x128xi32>
    %119 = arith.cmpi eq, %113, %118 : vector<8x128xi32>
    %cst_96 = arith.constant 0.000000e+00 : f32
    %120 = vector.shape_cast %112 : vector<1x128xf32> to vector<1x128xf32>
    %121 = vector.broadcast %120 : vector<1x128xf32> to vector<8x128xf32>
    %122 = vector.broadcast %cst_96 : f32 to vector<8x128xf32>
    %123 = arith.select %119, %121, %122 : vector<8x128xi1>, vector<8x128xf32>
    %124 = vector.shape_cast %105 : vector<1x128xf32> to vector<1x128xf32>
    %125 = vector.broadcast %124 : vector<1x128xf32> to vector<8x128xf32>
    %126 = arith.select %117, %125, %123 : vector<8x128xi1>, vector<8x128xf32>
    %cst_97 = arith.constant 1.600000e+01 : f32
    %127 = vector.broadcast %cst_97 : f32 to vector<8x128xf32>
    %128 = arith.select %115, %127, %126 : vector<8x128xi1>, vector<8x128xf32>
    %c0_98 = arith.constant 0 : index
    %c0_99 = arith.constant 0 : index
    %c0_100 = arith.constant 0 : index
    %129 = vector.load %arg9[%c0_98, %c0_99, %c0_100] : memref<1x8x128xf32, #tpu.memory_space<vmem>>, vector<1x8x128xf32>
    %130 = vector.shape_cast %129 : vector<1x8x128xf32> to vector<8x128xf32>
    %131 = vector.shape_cast %128 : vector<8x128xf32> to vector<1x8x128xf32>
    tpu.vector_store %arg9[%c0_98, %c0_99, %c0_100], %131 {strides = array<i32>} : memref<1x8x128xf32, #tpu.memory_space<vmem>>, vector<1x8x128xf32>,
    return
  }
  func.func @transform_0(%arg0: i32) -> (i32, i32, i32, i32, i32) {
    %c0_i32 = arith.constant 0 : i32
    %c0_i32_0 = arith.constant 0 : i32
    %c0_i32_1 = arith.constant 0 : i32
    %c0_i32_2 = arith.constant 0 : i32
    %c0_i32_3 = arith.constant 0 : i32
    return %arg0, %c0_i32, %c0_i32_0, %c0_i32_1, %c0_i32_2 : i32, i32, i32, i32, i32
  }
  func.func @transform_1(%arg0: i32) -> (i32, i32) {
    %c0_i32 = arith.constant 0 : i32
    %c0_i32_0 = arith.constant 0 : i32
    %c0_i32_1 = arith.constant 0 : i32
    return %c0_i32, %c0_i32_0 : i32, i32
  }
  func.func @transform_2(%arg0: i32) -> (i32, i32) {
    %c0_i32 = arith.constant 0 : i32
    %c0_i32_0 = arith.constant 0 : i32
    %c0_i32_1 = arith.constant 0 : i32
    return %c0_i32, %c0_i32_0 : i32, i32
  }
  func.func @transform_3(%arg0: i32) -> (i32, i32, i32, i32, i32) {
    %c0_i32 = arith.constant 0 : i32
    %c0_i32_0 = arith.constant 0 : i32
    %c0_i32_1 = arith.constant 0 : i32
    %c0_i32_2 = arith.constant 0 : i32
    %c0_i32_3 = arith.constant 0 : i32
    return %arg0, %c0_i32, %c0_i32_0, %c0_i32_1, %c0_i32_2 : i32, i32, i32, i32, i32
  }
  func.func @transform_4(%arg0: i32) -> (i32, i32) {
    %c0_i32 = arith.constant 0 : i32
    %c0_i32_0 = arith.constant 0 : i32
    %c0_i32_1 = arith.constant 0 : i32
    return %c0_i32, %c0_i32_0 : i32, i32
  }
  func.func @transform_5(%arg0: i32) -> (i32, i32) {
    %c0_i32 = arith.constant 0 : i32
    %c0_i32_0 = arith.constant 0 : i32
    %c0_i32_1 = arith.constant 0 : i32
    return %c0_i32, %c0_i32_0 : i32, i32
  }
  func.func @transform_6(%arg0: i32) -> (i32, i32, i32) {
    %c0_i32 = arith.constant 0 : i32
    %c0_i32_0 = arith.constant 0 : i32
    %c0_i32_1 = arith.constant 0 : i32
    %c0_i32_2 = arith.constant 0 : i32
    return %c0_i32, %c0_i32_0, %c0_i32_1 : i32, i32, i32
  }
  func.func @transform_7(%arg0: i32) -> (i32, i32, i32) {
    %c0_i32 = arith.constant 0 : i32
    %c0_i32_0 = arith.constant 0 : i32
    %c0_i32_1 = arith.constant 0 : i32
    return %arg0, %c0_i32, %c0_i32_0 : i32, i32, i32
  }
  func.func @transform_8(%arg0: i32) -> (i32, i32, i32) {
    %c0_i32 = arith.constant 0 : i32
    %c0_i32_0 = arith.constant 0 : i32
    %c0_i32_1 = arith.constant 0 : i32
    return %arg0, %c0_i32, %c0_i32_0 : i32, i32, i32
  }
}

module attributes {stable_mosaic.version = 11 : i64} {
  func.func @_project_kernel(%arg0: i32, %arg1: memref<1x16x128xbf16, #tpu.memory_space<vmem>>, %arg2: memref<1x128xf32, #tpu.memory_space<vmem>>, %arg3: memref<1x128xf32, #tpu.memory_space<vmem>>, %arg4: memref<128x128xbf16, #tpu.memory_space<vmem>>, %arg5: memref<1x16x128xbf16, #tpu.memory_space<vmem>>, %arg6: memref<1x8x128xf32, #tpu.memory_space<vmem>>) attributes {dimension_semantics = [#tpu.dimension_semantics<parallel>], iteration_bounds = array<i64: 2>, scalar_prefetch = 0 : i64, scratch_operands = 0 : i64, tpu.core_type = #tpu.core_type<tc>, window_params = [{transform_indices = @transform_0, window_bounds = array<i64: 1, 16, 128>}, {pipeline_mode = #tpu.pipeline_mode<synchronous>, transform_indices = @transform_1, window_bounds = array<i64: 1, 128>}, {pipeline_mode = #tpu.pipeline_mode<synchronous>, transform_indices = @transform_2, window_bounds = array<i64: 1, 128>}, {pipeline_mode = #tpu.pipeline_mode<synchronous>, transform_indices = @transform_3, window_bounds = array<i64: 128, 128>}, {transform_indices = @transform_4, window_bounds = array<i64: 1, 16, 128>}, {transform_indices = @transform_5, window_bounds = array<i64: 1, 8, 128>}]} {
    %c0 = arith.constant 0 : index
    %c0_0 = arith.constant 0 : index
    %c0_1 = arith.constant 0 : index
    %0 = vector.load %arg1[%c0, %c0_0, %c0_1] : memref<1x16x128xbf16, #tpu.memory_space<vmem>>, vector<1x16x128xbf16>
    %1 = vector.shape_cast %0 : vector<1x16x128xbf16> to vector<16x128xbf16>
    %2 = arith.extf %1 : vector<16x128xbf16> to vector<16x128xf32>
    %c0_2 = arith.constant 0 : index
    %c0_3 = arith.constant 0 : index
    %3 = vector.load %arg2[%c0_2, %c0_3] : memref<1x128xf32, #tpu.memory_space<vmem>>, vector<1x128xf32>
    %4 = vector.broadcast %3 : vector<1x128xf32> to vector<16x128xf32>
    %5 = arith.mulf %2, %4 : vector<16x128xf32>
    %c0_4 = arith.constant 0 : index
    %c0_5 = arith.constant 0 : index
    %6 = vector.load %arg3[%c0_4, %c0_5] : memref<1x128xf32, #tpu.memory_space<vmem>>, vector<1x128xf32>
    %7 = vector.broadcast %6 : vector<1x128xf32> to vector<16x128xf32>
    %8 = arith.addf %5, %7 : vector<16x128xf32>
    %cst = arith.constant 0.000000e+00 : f32
    %9 = vector.broadcast %cst : f32 to vector<16x128xf32>
    %10 = arith.maximumf %8, %9 : vector<16x128xf32>
    %11 = arith.truncf %10 : vector<16x128xf32> to vector<16x128xbf16>
    %c0_6 = arith.constant 0 : index
    %c0_7 = arith.constant 0 : index
    %12 = vector.load %arg4[%c0_6, %c0_7] : memref<128x128xbf16, #tpu.memory_space<vmem>>, vector<128x128xbf16>
    %cst_8 = arith.constant dense<0.000000e+00> : vector<16x128xf32>
    %13 = tpu.matmul %11, %12, %cst_8 {dimension_numbers = #tpu.dot_dimension_numbers<[1], [0], [0], [1], [0, 0, 1, 1], [], []>} : vector<16x128xbf16>, vector<128x128xbf16>, vector<16x128xf32> -> vector<16x128xf32>
    %14 = arith.truncf %13 : vector<16x128xf32> to vector<16x128xbf16>
    %c0_9 = arith.constant 0 : index
    %c0_10 = arith.constant 0 : index
    %c0_11 = arith.constant 0 : index
    %15 = vector.load %arg5[%c0_9, %c0_10, %c0_11] : memref<1x16x128xbf16, #tpu.memory_space<vmem>>, vector<1x16x128xbf16>
    %16 = vector.shape_cast %15 : vector<1x16x128xbf16> to vector<16x128xbf16>
    %17 = vector.shape_cast %14 : vector<16x128xbf16> to vector<1x16x128xbf16>
    tpu.vector_store %arg5[%c0_9, %c0_10, %c0_11], %17 {strides = array<i32>} : memref<1x16x128xbf16, #tpu.memory_space<vmem>>, vector<1x16x128xbf16>,
    %cst_12 = arith.constant dense<0.000000e+00> : vector<128xf32>
    %18 = vector.multi_reduction <add>, %13, %cst_12 [0] : vector<16x128xf32> to vector<128xf32>
    %19 = vector.shape_cast %18 : vector<128xf32> to vector<1x128xf32>
    %cst_13 = arith.constant 6.250000e-02 : f32
    %20 = vector.broadcast %cst_13 : f32 to vector<1x128xf32>
    %21 = arith.mulf %19, %20 : vector<1x128xf32>
    %22 = vector.broadcast %21 : vector<1x128xf32> to vector<16x128xf32>
    %23 = arith.subf %13, %22 : vector<16x128xf32>
    %24 = arith.mulf %23, %23 : vector<16x128xf32>
    %cst_14 = arith.constant dense<0.000000e+00> : vector<128xf32>
    %25 = vector.multi_reduction <add>, %24, %cst_14 [0] : vector<16x128xf32> to vector<128xf32>
    %26 = vector.shape_cast %25 : vector<128xf32> to vector<1x128xf32>
    %27 = tpu.iota {dimensions = array<i32: 0>} : vector<8x128xi32>
    %c0_i32 = arith.constant 0 : i32
    %28 = vector.broadcast %c0_i32 : i32 to vector<8x128xi32>
    %29 = arith.cmpi eq, %27, %28 : vector<8x128xi32>
    %c1_i32 = arith.constant 1 : i32
    %30 = vector.broadcast %c1_i32 : i32 to vector<8x128xi32>
    %31 = arith.cmpi eq, %27, %30 : vector<8x128xi32>
    %c2_i32 = arith.constant 2 : i32
    %32 = vector.broadcast %c2_i32 : i32 to vector<8x128xi32>
    %33 = arith.cmpi eq, %27, %32 : vector<8x128xi32>
    %cst_15 = arith.constant 0.000000e+00 : f32
    %34 = vector.shape_cast %26 : vector<1x128xf32> to vector<1x128xf32>
    %35 = vector.broadcast %34 : vector<1x128xf32> to vector<8x128xf32>
    %36 = vector.broadcast %cst_15 : f32 to vector<8x128xf32>
    %37 = arith.select %33, %35, %36 : vector<8x128xi1>, vector<8x128xf32>
    %38 = vector.shape_cast %19 : vector<1x128xf32> to vector<1x128xf32>
    %39 = vector.broadcast %38 : vector<1x128xf32> to vector<8x128xf32>
    %40 = arith.select %31, %39, %37 : vector<8x128xi1>, vector<8x128xf32>
    %cst_16 = arith.constant 1.600000e+01 : f32
    %41 = vector.broadcast %cst_16 : f32 to vector<8x128xf32>
    %42 = arith.select %29, %41, %40 : vector<8x128xi1>, vector<8x128xf32>
    %c0_17 = arith.constant 0 : index
    %c0_18 = arith.constant 0 : index
    %c0_19 = arith.constant 0 : index
    %43 = vector.load %arg6[%c0_17, %c0_18, %c0_19] : memref<1x8x128xf32, #tpu.memory_space<vmem>>, vector<1x8x128xf32>
    %44 = vector.shape_cast %43 : vector<1x8x128xf32> to vector<8x128xf32>
    %45 = vector.shape_cast %42 : vector<8x128xf32> to vector<1x8x128xf32>
    tpu.vector_store %arg6[%c0_17, %c0_18, %c0_19], %45 {strides = array<i32>} : memref<1x8x128xf32, #tpu.memory_space<vmem>>, vector<1x8x128xf32>,
    return
  }
  func.func @transform_0(%arg0: i32) -> (i32, i32, i32) {
    %c0_i32 = arith.constant 0 : i32
    %c0_i32_0 = arith.constant 0 : i32
    %c0_i32_1 = arith.constant 0 : i32
    return %arg0, %c0_i32, %c0_i32_0 : i32, i32, i32
  }
  func.func @transform_1(%arg0: i32) -> (i32, i32) {
    %c0_i32 = arith.constant 0 : i32
    %c0_i32_0 = arith.constant 0 : i32
    %c0_i32_1 = arith.constant 0 : i32
    return %c0_i32, %c0_i32_0 : i32, i32
  }
  func.func @transform_2(%arg0: i32) -> (i32, i32) {
    %c0_i32 = arith.constant 0 : i32
    %c0_i32_0 = arith.constant 0 : i32
    %c0_i32_1 = arith.constant 0 : i32
    return %c0_i32, %c0_i32_0 : i32, i32
  }
  func.func @transform_3(%arg0: i32) -> (i32, i32) {
    %c0_i32 = arith.constant 0 : i32
    %c0_i32_0 = arith.constant 0 : i32
    %c0_i32_1 = arith.constant 0 : i32
    return %c0_i32, %c0_i32_0 : i32, i32
  }
  func.func @transform_4(%arg0: i32) -> (i32, i32, i32) {
    %c0_i32 = arith.constant 0 : i32
    %c0_i32_0 = arith.constant 0 : i32
    %c0_i32_1 = arith.constant 0 : i32
    return %arg0, %c0_i32, %c0_i32_0 : i32, i32, i32
  }
  func.func @transform_5(%arg0: i32) -> (i32, i32, i32) {
    %c0_i32 = arith.constant 0 : i32
    %c0_i32_0 = arith.constant 0 : i32
    %c0_i32_1 = arith.constant 0 : i32
    return %arg0, %c0_i32, %c0_i32_0 : i32, i32, i32
  }
}

module attributes {stable_mosaic.version = 11 : i64} {
  func.func @_final_bn_kernel(%arg0: i32, %arg1: memref<1x16x128xbf16, #tpu.memory_space<vmem>>, %arg2: memref<1x128xf32, #tpu.memory_space<vmem>>, %arg3: memref<1x128xf32, #tpu.memory_space<vmem>>, %arg4: memref<1x16x128xf32, #tpu.memory_space<vmem>>) attributes {dimension_semantics = [#tpu.dimension_semantics<parallel>], iteration_bounds = array<i64: 2>, scalar_prefetch = 0 : i64, scratch_operands = 0 : i64, tpu.core_type = #tpu.core_type<tc>, window_params = [{transform_indices = @transform_0, window_bounds = array<i64: 1, 16, 128>}, {pipeline_mode = #tpu.pipeline_mode<synchronous>, transform_indices = @transform_1, window_bounds = array<i64: 1, 128>}, {pipeline_mode = #tpu.pipeline_mode<synchronous>, transform_indices = @transform_2, window_bounds = array<i64: 1, 128>}, {transform_indices = @transform_3, window_bounds = array<i64: 1, 16, 128>}]} {
    %c0 = arith.constant 0 : index
    %c0_0 = arith.constant 0 : index
    %c0_1 = arith.constant 0 : index
    %0 = vector.load %arg1[%c0, %c0_0, %c0_1] : memref<1x16x128xbf16, #tpu.memory_space<vmem>>, vector<1x16x128xbf16>
    %1 = vector.shape_cast %0 : vector<1x16x128xbf16> to vector<16x128xbf16>
    %2 = arith.extf %1 : vector<16x128xbf16> to vector<16x128xf32>
    %c0_2 = arith.constant 0 : index
    %c0_3 = arith.constant 0 : index
    %3 = vector.load %arg2[%c0_2, %c0_3] : memref<1x128xf32, #tpu.memory_space<vmem>>, vector<1x128xf32>
    %4 = vector.broadcast %3 : vector<1x128xf32> to vector<16x128xf32>
    %5 = arith.mulf %2, %4 : vector<16x128xf32>
    %c0_4 = arith.constant 0 : index
    %c0_5 = arith.constant 0 : index
    %6 = vector.load %arg3[%c0_4, %c0_5] : memref<1x128xf32, #tpu.memory_space<vmem>>, vector<1x128xf32>
    %7 = vector.broadcast %6 : vector<1x128xf32> to vector<16x128xf32>
    %8 = arith.addf %5, %7 : vector<16x128xf32>
    %c0_6 = arith.constant 0 : index
    %c0_7 = arith.constant 0 : index
    %c0_8 = arith.constant 0 : index
    %9 = vector.load %arg4[%c0_6, %c0_7, %c0_8] : memref<1x16x128xf32, #tpu.memory_space<vmem>>, vector<1x16x128xf32>
    %10 = vector.shape_cast %9 : vector<1x16x128xf32> to vector<16x128xf32>
    %11 = vector.shape_cast %8 : vector<16x128xf32> to vector<1x16x128xf32>
    tpu.vector_store %arg4[%c0_6, %c0_7, %c0_8], %11 {strides = array<i32>} : memref<1x16x128xf32, #tpu.memory_space<vmem>>, vector<1x16x128xf32>,
    return
  }
  func.func @transform_0(%arg0: i32) -> (i32, i32, i32) {
    %c0_i32 = arith.constant 0 : i32
    %c0_i32_0 = arith.constant 0 : i32
    %c0_i32_1 = arith.constant 0 : i32
    return %arg0, %c0_i32, %c0_i32_0 : i32, i32, i32
  }
  func.func @transform_1(%arg0: i32) -> (i32, i32) {
    %c0_i32 = arith.constant 0 : i32
    %c0_i32_0 = arith.constant 0 : i32
    %c0_i32_1 = arith.constant 0 : i32
    return %c0_i32, %c0_i32_0 : i32, i32
  }
  func.func @transform_2(%arg0: i32) -> (i32, i32) {
    %c0_i32 = arith.constant 0 : i32
    %c0_i32_0 = arith.constant 0 : i32
    %c0_i32_1 = arith.constant 0 : i32
    return %c0_i32, %c0_i32_0 : i32, i32
  }
  func.func @transform_3(%arg0: i32) -> (i32, i32, i32) {
    %c0_i32 = arith.constant 0 : i32
    %c0_i32_0 = arith.constant 0 : i32
    %c0_i32_1 = arith.constant 0 : i32
    return %arg0, %c0_i32, %c0_i32_0 : i32, i32, i32
  }
}

</mosaic_0001>

<bundles_post_ra>
// kernel: stem_forward.10
= control target key start
LH: loop header
LB: loop body
LE: loop exit
PB: predicated region body
PF: predicated region fallthrough
CT: control target
= control target key end

     0   :  { %s562_s18 = smov 0   ;;  %s617_s0 = inlined_call_operand.vmem [shape: bf16[2,16,128], index: 0, kind: input, shape index: {}]   ;;  %s618_s1 = inlined_call_operand.vmem [shape: f32[1,128], index: 1, kind: input, shape index: {}]   ;;  %s619_s2 = inlined_call_operand.vmem [shape: f32[1,128], index: 2, kind: input, shape index: {}]   ;;  %s620_s3 = inlined_call_operand.vmem [shape: bf16[128,128], index: 3, kind: input, shape index: {}]   ;;  %s621_s4 = inlined_call_operand.vmem [shape: bf16[2,16,128], index: 4, kind: output, shape index: {0}]   ;;  %s622_s5 = inlined_call_operand.vmem [shape: f32[2,8,128], index: 5, kind: output, shape index: {1}]  }
   0x1 LB: > { %s451_s19 = sadd.s32 4294967295, %s530_s18   ;;  %p455_p0 = scmp.ge.s32.totalorder %s530_s18, 1  ;;  %s530_s18 = sphi %s562_s18, %s16_s18  }
   0x2   : > { %p190_p1 = scmp.lt.s32.totalorder %s530_s18, 3 }
   0x4   : > { %p191_p2 = pnand %p455_p0, %p190_p1 }
   0x5   : > { %p222_p3 = scmp.lt.s32.totalorder (!%p191_p2), %s451_s19, 1 }
   0x6   : > { %194 = sbr.rel (%p191_p2) target bundleno = 215 (0xd7), region = 36 }
   0xb   : > { %v504_v0 = vld [vmem:[%s620_s3 + $0x38] sm:$0xff]  ;;  %v503_v1 = vld [vmem:[%s620_s3 + $0x30] sm:$0xff]  ;;  %s624_s19 = smov (!%p222_p3, %s451_s19), 1  ;;  %v502_v2 = vld [vmem:[%s620_s3 + $0x28] sm:$0xff]  ;;  %v356_v37 = vlaneseq }
   0xc   : > { %319 = vmatpush.bf16.msra.mxu0 %v504_v0  ;;  %s576_s24 = sshll.u32 %s624_s19, 3  ;;  %v501_v3 = vld [vmem:[%s620_s3 + $0x20] sm:$0xff]  ;;  %v500_v8 = vld [vmem:[%s620_s3 + $0x18] sm:$0xff]  ;;  %v499_v12 = vld [vmem:[%s620_s3 + $0x10] sm:$0xff] }
   0xd   : > { %s226_s29 = scalar_lea.vmem %s617_s0, %s576_s24  ;;  %v522_v7 = vld [vmem:[%s618_s1] ss:$0 sm:$0xff]  ;;  %v498_v15 = vld [vmem:[%s620_s3 + $0x8] sm:$0xff]  ;;  %s231_s22 = scalar_lea.vmem %s621_s4, %s576_s24  ;;  %v357_v40 = vshrl.u32 %v356_v37, 7 }
   0xe   : > { %v506_v4 = vld [vmem:[%s226_s29] sm:$0xff]   ;;  %s235_s26 = scalar_lea.vmem %s622_s5, %s576_s24 }
   0xf   : > { %v507_v5 = vunpack.c.l.bf16 %v506_v4  ;;  %v508_v6 = vunpack.c.h.bf16 %v506_v4  ;;  %v523_v11 = vld [vmem:[%s619_s2] ss:$0 sm:$0xff]  ;;  %vm360_vm0 = vcmp.eq.s32.totalorder %v357_v40, 2  ;;  %vm359_vm1 = vcmp.eq.s32.totalorder %v357_v40, 1 }
  0x10   : > { %320 = vmatpush.bf16.msra.mxu0 %v503_v1  ;;  %v497_v18 = vld [vmem:[%s620_s3] sm:$0xff]  ;;  %vm358_vm2 = vcmp.eq.s32.totalorder %v357_v40, 0 }
  0x11   : > { %v244_v9 = vmul.f32 %v522_v7, %v507_v5  ;;  %v245_v10 = vmul.f32 %v522_v7, %v508_v6 }
  0x13   : > { %v250_v13 = vadd.f32 %v523_v11, %v244_v9  ;;  %v251_v14 = vadd.f32 %v523_v11, %v245_v10 }
  0x14   : > { %321 = vmatpush.bf16.msra.mxu0 %v502_v2 }
  0x15   : > { %v252_v16 = vmax.f32 %v250_v13, 0.0  ;;  %v253_v17 = vmax.f32 %v251_v14, 0.0 }
  0x17   : > { %v254_v19 = vpack.c.bf16 %v253_v17, %v252_v16 }
  0x18   : > { %322 = vmatpush.bf16.msra.mxu0 %v501_v3 }
  0x1c   : > { %323 = vmatpush.bf16.msra.mxu0 %v500_v8 }
  0x20   : > { %324 = vmatpush.bf16.msra.mxu0 %v499_v12 }
  0x24   : > { %325 = vmatpush.bf16.msra.mxu0 %v498_v15 }
  0x28   : > { %326 = vmatpush.bf16.msra.mxu0 %v497_v18 }
  0x2b   : > { %327 = vmatmul.bf16.vlgmr.msra.gmra.mxu0 %v254_v19 }
  0xa8   : > { %v328_v20 = vpop.f32.mrf.mxu0 }
  0xb0   : > { %v330_v21 = vpop.f32.mrf.mxu0 }
  0xb1   : > { %v512_v22 = vpack.c.bf16 %v330_v21, %v328_v20  ;;  %v337_v23 = vadd.f32 %v330_v21, %v328_v20 }
  0xb3   : > { %513 = vst [vmem:[%s231_s22] sm:$0xff] %v512_v22   ;;  %v338_v24 = vrot.slane %v337_v23, 4 }
  0xb5   : > { %v339_v25 = vadd.f32 %v338_v24, %v337_v23 }
  0xb7   : > { %v340_v26 = vrot.slane %v339_v25, 2 }
  0xb9   : > { %v341_v27 = vadd.f32 %v340_v26, %v339_v25 }
  0xbb   : > { %v342_v28 = vrot.slane %v341_v27, 1 }
  0xbd   : > { %v343_v29 = vadd.f32 %v342_v28, %v341_v27 }
  0xbf   : > { %v344_v30 = vmul.f32 0.0625, %v343_v29 }
  0xc1   : > { %v345_v31 = vsub.f32 %v328_v20, %v344_v30  ;;  %v346_v32 = vsub.f32 %v330_v21, %v344_v30 }
  0xc3   : > { %v347_v33 = vmul.f32 %v345_v31, %v345_v31  ;;  %v348_v34 = vmul.f32 %v346_v32, %v346_v32 }
  0xc5   : > { %v349_v35 = vadd.f32 %v348_v34, %v347_v33 }
  0xc7   : > { %v350_v36 = vrot.slane %v349_v35, 4 }
  0xc9   : > { %v351_v38 = vadd.f32 %v350_v36, %v349_v35 }
  0xcb   : > { %v352_v39 = vrot.slane %v351_v38, 2 }
  0xcd   : > { %v353_v41 = vadd.f32 %v352_v39, %v351_v38 }
  0xcf   : > { %v354_v42 = vrot.slane %v353_v41, 1 }
  0xd1   : > { %v355_v43 = vadd.f32 %v354_v42, %v353_v41 }
  0xd3   : > { %v361_v44 = vsel %vm360_vm0, %v355_v43, 0.0 }
  0xd4   : > { %v362_v45 = vsel %vm359_vm1, %v343_v29, %v361_v44 }
  0xd5   : > { %v363_v46 = vsel %vm358_vm2, 16.0, %v362_v45 }
  0xd6   : > { %364 = vst [vmem:[%s235_s26] sm:$0xff] %v363_v46 }
  0xd7 PF: > { %s16_s18 = sadd.s32 1, %s530_s18  }
  0xd8   : > { %p13_p4 = scmp.ge.s32.totalorder %s16_s18, 4  }
  0xda   :  { %15 = sbr.rel (!%p13_p4) target bundleno = 1 (0x1), region = 78 }

// kernel: stem_forward.6
= control target key start
LH: loop header
LB: loop body
LE: loop exit
PB: predicated region body
PF: predicated region fallthrough
CT: control target
= control target key end

     0   :  { %s1878_s12 = smov 0   ;;  %s2469_s0 = inlined_call_operand.vmem [shape: f32[2,8,2,8,8], index: 0, kind: input, shape index: {}]   ;;  %s2470_s1 = inlined_call_operand.vmem [shape: bf16[9,4,128], index: 1, kind: input, shape index: {}]   ;;  %s2471_s2 = inlined_call_operand.vmem [shape: bf16[2,64,128], index: 2, kind: output, shape index: {0}]   ;;  %s2472_s3 = inlined_call_operand.vmem [shape: f32[2,8,128], index: 3, kind: output, shape index: {1}]  }
   0x1 LB: > { %s1694_s13 = sadd.s32 4294967295, %s1854_s12   ;;  %p1698_p0 = scmp.ge.s32.totalorder %s1854_s12, 1  ;;  %s1854_s12 = sphi %s1878_s12, %s14_s12  }
   0x2   : > { %p140_p1 = scmp.lt.s32.totalorder %s1854_s12, 3 }
   0x4   : > { %p141_p2 = pnand %p1698_p0, %p140_p1 }
   0x5   : > { %p168_p3 = scmp.lt.s32.totalorder (!%p141_p2), %s1694_s13, 1  ;;  %s1857_s18 = smov (!%p141_p2), 124  }
   0x6   : > { %144 = sbr.rel (%p141_p2) target bundleno = 486 (0x1e6), region = 28 }
   0xb   : > { %vm215_vm0 = vcmask 60416   ;;  %s2480_s13 = smov (!%p168_p3, %s1694_s13), 1  ;;  %v1856_v0 = vmov 0   ;;  %vm419_vm1 = vsmask.f32 7938  ;;  %vm217_vm3 = vcmask 57344  }
   0xc   : > { %219 = vst.msk [vmem:[#allocation2 + $0x8] sm:$0xf] %vm215_vm0, %v1856_v0  ;;  %s1798_s14 = sshll.u32 %s2480_s13, 7  ;;  %vm1914_vm2 = vmand %vm215_vm0, %vm419_vm1  ;;  %vm425_vm4 = vsmask.f32 256  ;;  %vm680_vm9 = vcmask 1041408  }
   0xd   : > { %223 = vst.msk [vmem:[#allocation2 + $0x18] sm:$0xf] %vm215_vm0, %v1856_v0  ;;  %s1896_s17 = scalar_lea.vmem %s2469_s0, %s1798_s14  ;;  %vm538_vm5 = vsmask.f32 3328  ;;  %vm539_vm6 = vsmask.f32 7440  ;;  %vm1972_vm7 = vmand %vm217_vm3, %vm425_vm4 }
   0xe   : > { %v184_v1 = vld [vmem:[%s1896_s17 + $0x8] sm:$0xff]  ;;  %221 = vst.msk [vmem:[#allocation2 + $0x10] sm:$0xf] %vm215_vm0, %v1856_v0  ;;  %v183_v10 = vld [vmem:[%s1896_s17] sm:$0xff]  ;;  %v185_v11 = vld [vmem:[%s1896_s17 + $0x10] sm:$0xff]  ;;  %vm667_vm10 = vcmask 31744  }
   0xf   : > { %v200_v2 = vpack.c.bf16 %v184_v1, %v184_v1  ;;  %225 = vst.msk [vmem:[#allocation2 + $0x20] sm:$0xf] %vm215_vm0, %v1856_v0  ;;  %v199_v13 = vpack.c.bf16 %v183_v10, %v183_v10  ;;  %v186_v14 = vld [vmem:[%s1896_s17 + $0x18] sm:$0xff]  ;;  %v201_v16 = vpack.c.bf16 %v185_v11, %v185_v11  ;;  %v188_v19 = vld [vmem:[%s1896_s17 + $0x28] sm:$0xff]  ;;  %v187_v24 = vld [vmem:[%s1896_s17 + $0x20] sm:$0xff]  ;;  %s1799_s10 = sshll.u32 %s2480_s13, 5 }
  0x10   : > { %227 = vst.msk [vmem:[#allocation2 + $0x28] sm:$0xf] %vm215_vm0, %v1856_v0  ;;  %v1943_v20 = vpack.c.bf16 %v186_v14, %v186_v14  ;;  %v189_v25 = vld [vmem:[%s1896_s17 + $0x30] sm:$0xff]  ;;  %v1951_v28 = vpack.c.bf16 %v188_v19, %v188_v19  ;;  %v190_v29 = vld [vmem:[%s1896_s17 + $0x38] sm:$0xff]  ;;  %v1960_v35 = vpack.c.bf16 %v187_v24, %v187_v24  ;;  %v192_v37 = vld [vmem:[%s1896_s17 + $0x48] sm:$0xff]  ;;  %s2426_s15 = scalar_lea.vmem %s2471_s2, %s1799_s10  ;;  %s1703_s16 = sshll.u32 %s2480_s13, 3 }
  0x11   : > { %v266_v3 = vshrl.u32 %v200_v2, 16  ;;  %v269_v4 = vshll.u32 %v200_v2, 16  ;;  %229 = vst.msk [vmem:[#allocation2 + $0x30] sm:$0xf] %vm215_vm0, %v1856_v0  ;;  %v258_v22 = vshrl.u32 %v199_v13, 16  ;;  %v274_v27 = vshrl.u32 %v201_v16, 16  ;;  %vm2036_vm8 = vmor %vm538_vm5, %vm539_vm6  ;;  %s181_s19 = scalar_lea.vmem %s2472_s3, %s1703_s16 }
  0x12   : > { %231 = vst.msk [vmem:[#allocation2 + $0x38] sm:$0xf] %vm215_vm0, %v1856_v0  ;;  %v282_v32 = vshrl.u32 %v1943_v20, 16  ;;  %v261_v34 = vshll.u32 %v199_v13, 16  ;;  %v1962_v36 = vpack.c.bf16 %v189_v25, %v189_v25  ;;  %v1968_v41 = vpack.c.bf16 %v190_v29, %v190_v29  ;;  %v191_v19 = vld [vmem:[%s1896_s17 + $0x40] sm:$0xff] }
  0x13   : > { %v1909_v5 = vrot.slane %v266_v3, 7  ;;  %233 = vst.msk [vmem:[#allocation2 + $0x40] sm:$0xf] %vm215_vm0, %v1856_v0  ;;  %v521_v12 = vld [vmem:[#allocation2 + $0x8] sm:$0xf]  ;;  %v1958_v33 = vrot.slane %v258_v22, 7  ;;  %v1986_v50 = vpack.c.bf16 %v192_v37, %v192_v37 }
  0x14   : > { %v430_v7 = vld [vmem:[#allocation2 + $0x18] sm:$0xf]  ;;  %235 = vst.msk [vmem:[#allocation2 + $0x48] sm:$0xf] %vm215_vm0, %v1856_v0  ;;  %v1711_v15 = vld [vmem:[#allocation2 + $0x8] sm:$0xf] }
  0x15   : > { %v271_v8 = vor.u32 %v269_v4, %v1909_v5  ;;  %237 = vst.msk [vmem:[#allocation2 + $0x50] sm:$0xf] %vm215_vm0, %v1856_v0  ;;  %v542_v17 = vshrl.u32 %v521_v12, 16  ;;  %v545_v18 = vshll.u32 %v521_v12, 16  ;;  %v272_v38 = vrot.slane %v1909_v5, 4 }
  0x16   : > { %239 = vst.msk [vmem:[#allocation2 + $0x58] sm:$0xf] %vm215_vm0, %v1856_v0  ;;  %v1978_v43 = vrot.slane %v274_v27, 7  ;;  %v277_v44 = vshll.u32 %v201_v16, 16  ;;  %v298_v45 = vshrl.u32 %v1951_v28, 16  ;;  %v1983_v48 = vrot.slane %v282_v32, 7 }
  0x17   : > { %v431_v9 = vsel %vm1914_vm2, %v271_v8, %v430_v7  ;;  %241 = vst.msk [vmem:[#allocation2 + $0x60] sm:$0xf] %vm215_vm0, %v1856_v0  ;;  %v544_v30 = vrot.slane %v542_v17, 4  ;;  %v547_v31 = vrot.slane %v545_v18, 5  ;;  %v285_v49 = vshll.u32 %v1943_v20, 16  ;;  %v193_v20 = vld [vmem:[%s1896_s17 + $0x50] sm:$0xff] }
  0x18   : > { %432 = vst [vmem:[#allocation2 + $0x18] sm:$0xf] %v431_v9  ;;  %v1991_v52 = vor.u32 %v261_v34, %v1958_v33  ;;  %v290_v53 = vshrl.u32 %v1960_v35, 16  ;;  %v306_v54 = vshrl.u32 %v1962_v36, 16  ;;  %v314_v58 = vshrl.u32 %v1968_v41, 16 }
  0x19   : > { %243 = vst.msk [vmem:[#allocation2 + $0x68] sm:$0xf] %vm215_vm0, %v1856_v0  ;;  %v548_v47 = vor.u32 %v547_v31, %v544_v30  ;;  %v2001_v60 = vor.u32 %v277_v44, %v1978_v43  ;;  %v2003_v61 = vrot.slane %v298_v45, 7  ;;  %v301_v62 = vshll.u32 %v1951_v28, 16  ;;  %v421_v2 = vld [vmem:[#allocation2 + $0x10] sm:$0xf] }
  0x1a   : > { %245 = vst.msk [vmem:[#allocation2 + $0x70] sm:$0xf] %vm215_vm0, %v1856_v0  ;;  %v264_v1 = vrot.slane %v1958_v33, 4  ;;  %v288_v3 = vrot.slane %v1983_v48, 4  ;;  %v330_v4 = vshrl.u32 %v1986_v50, 16  ;;  %v2016_v8 = vrot.slane %v290_v53, 7 }
  0x1b   : > { %247 = vst.msk [vmem:[#allocation2 + $0x78] sm:$0xf] %vm215_vm0, %v1856_v0  ;;  %v2006_v63 = vrot.slane %v548_v47, 4  ;;  %v436_v5 = vld [vmem:[#allocation2 + $0x20] sm:$0xf]  ;;  %v304_v7 = vrot.slane %v2003_v61, 4  ;;  %v287_v16 = vor.u32 %v285_v49, %v1983_v48  ;;  %v303_v17 = vor.u32 %v301_v62, %v2003_v61 }
  0x1c   : > { %249 = vst.msk [vmem:[#allocation2 + $0x80] sm:$0xf] %vm215_vm0, %v1856_v0  ;;  %v293_v9 = vshll.u32 %v1960_v35, 16  ;;  %v2019_v10 = vrot.slane %v306_v54, 7  ;;  %v309_v12 = vshll.u32 %v1962_v36, 16  ;;  %v2024_v13 = vrot.slane %v314_v58, 7 }
  0x1d   : > { %251 = vst.msk [vmem:[#allocation2 + $0x88] sm:$0xf] %vm215_vm0, %v1856_v0  ;;  %v317_v14 = vshll.u32 %v1968_v41, 16  ;;  %v442_v18 = vld [vmem:[#allocation2 + $0x28] sm:$0xf]  ;;  %v2042_v24 = vrot.slane %v330_v4, 7  ;;  %v2047_v27 = vpack.c.bf16 %v193_v20, %v193_v20  ;;  %v422_v28 = vsel %vm1914_vm2, %v1991_v52, %v421_v2 }
  0x1e   : > { %220 = vst.msk [vmem:[#allocation2 + $0xc] sm:$0x1] %vm217_vm3, %v1856_v0  ;;  %v333_v25 = vshll.u32 %v1986_v50, 16  ;;  %v295_v30 = vor.u32 %v293_v9, %v2016_v8  ;;  %v448_v31 = vld [vmem:[#allocation2 + $0x30] sm:$0xf]  ;;  %v437_v35 = vsel %vm1914_vm2, %v2001_v60, %v436_v5  ;;  %v443_v44 = vsel %vm1914_vm2, %v287_v16, %v442_v18  ;;  %v195_v4 = vld [vmem:[%s1896_s17 + $0x60] sm:$0xff] }
  0x1f   : > { %v1800_v21 = vld [vmem:[#allocation2 + $0x14] sm:$0xf0]  ;;  %224 = vst.msk [vmem:[#allocation2 + $0x1c] sm:$0x1] %vm217_vm3, %v1856_v0  ;;  %v338_v41 = vshrl.u32 %v2047_v27, 16  ;;  %v311_v47 = vor.u32 %v309_v12, %v2019_v10  ;;  %v319_v49 = vor.u32 %v317_v14, %v2024_v13  ;;  %v197_v5 = vld [vmem:[%s1896_s17 + $0x70] sm:$0xff] }
  0x20   : > { %v1712_v23 = vor.u32 %v1800_v21, %v1711_v15  ;;  %v522_v26 = vld [vmem:[#allocation2 + $0x18] sm:$0xf]  ;;  %222 = vst.msk [vmem:[#allocation2 + $0x14] sm:$0x1] %vm217_vm3, %v1856_v0  ;;  %v460_v48 = vld [vmem:[#allocation2 + $0x40] sm:$0xf]  ;;  %v449_v53 = vsel %vm1914_vm2, %v295_v30, %v448_v31  ;;  %v335_v54 = vor.u32 %v333_v25, %v2042_v24  ;;  %v213_v12 = vpack.c.bf16 %v197_v5, %v197_v5 }
  0x21   : > { %v556_v39 = vshrl.u32 %v522_v26, 16  ;;  %v559_v40 = vshll.u32 %v522_v26, 16  ;;  %226 = vst.msk [vmem:[#allocation2 + $0x24] sm:$0x1] %vm217_vm3, %v1856_v0  ;;  %v194_v21 = vld [vmem:[%s1896_s17 + $0x58] sm:$0xff]  ;;  %v2045_v26 = vpack.c.bf16 %v191_v19, %v191_v19  ;;  %v2094_v2 = vrot.slane %v338_v41, 7 }
  0x22   : > { %733 = vrot.lane.b32.xlu1 %v1712_v23, %s1857_s18  ;;  %228 = vst.msk [vmem:[#allocation2 + $0x2c] sm:$0x1] %vm217_vm3, %v1856_v0  ;;  %v454_v23 = vld [vmem:[#allocation2 + $0x38] sm:$0xf]  ;;  %v2061_v37 = vpack.c.bf16 %v194_v21, %v194_v21  ;;  %v466_v50 = vld [vmem:[#allocation2 + $0x48] sm:$0xf]  ;;  %v461_v14 = vsel %vm1914_vm2, %v311_v47, %v460_v48 }
  0x23   : > { %230 = vst.msk [vmem:[#allocation2 + $0x34] sm:$0x1] %vm217_vm3, %v1856_v0  ;;  %v558_v56 = vrot.slane %v556_v39, 4  ;;  %v561_v57 = vrot.slane %v559_v40, 5  ;;  %v322_v36 = vshrl.u32 %v2045_v26, 16  ;;  %v320_v40 = vrot.slane %v2024_v13, 4 }
  0x24   : > { %232 = vst.msk [vmem:[#allocation2 + $0x3c] sm:$0x1] %vm217_vm3, %v1856_v0  ;;  %v455_v45 = vsel %vm1914_vm2, %v303_v17, %v454_v23  ;;  %v346_v60 = vshrl.u32 %v2061_v37, 16  ;;  %v336_v61 = vrot.slane %v2042_v24, 4  ;;  %v472_v19 = vld [vmem:[#allocation2 + $0x50] sm:$0xf] }
  0x25   : > { %v530_v46 = vld [vmem:[#allocation2 + $0xc] sm:$0x1]  ;;  %234 = vst.msk [vmem:[#allocation2 + $0x44] sm:$0x1] %vm217_vm3, %v1856_v0  ;;  %v562_v11 = vor.u32 %v561_v57, %v558_v56  ;;  %v2084_v58 = vrot.slane %v322_v36, 7  ;;  %v370_v21 = vshrl.u32 %v213_v12, 16 }
  0x26   : > { %v433_v51 = vld [vmem:[#allocation2 + $0x1c] sm:$0x1]  ;;  %v551_v59 = vshll.u32 %v530_v46, 16  ;;  %236 = vst.msk [vmem:[#allocation2 + $0x4c] sm:$0x1] %vm217_vm3, %v1856_v0  ;;  %v196_v56 = vld [vmem:[%s1896_s17 + $0x68] sm:$0xff] }
  0x27   : > { %v434_v55 = vsel %vm1972_vm7, %v272_v38, %v433_v51  ;;  %238 = vst.msk [vmem:[#allocation2 + $0x54] sm:$0x1] %vm217_vm3, %v1856_v0  ;;  %v563_v34 = vrot.slane %v562_v11, 4  ;;  %v478_v51 = vld [vmem:[#allocation2 + $0x58] sm:$0xf]  ;;  %v211_v11 = vpack.c.bf16 %v195_v4, %v195_v4  ;;  %v2099_v13 = vpack.c.bf16 %v196_v56, %v196_v56 }
  0x28   : > { %435 = vst [vmem:[#allocation2 + $0x1c] sm:$0x1] %v434_v55  ;;  %v553_v15 = vrot.slane %v551_v59, 5  ;;  %v325_v59 = vshll.u32 %v2045_v26, 16  ;;  %v484_v25 = vld [vmem:[#allocation2 + $0x60] sm:$0xf] }
  0x29   : > { %240 = vst.msk [vmem:[#allocation2 + $0x5c] sm:$0x1] %vm217_vm3, %v1856_v0  ;;  %v445_v29 = vld [vmem:[#allocation2 + $0x2c] sm:$0x1]  ;;  %v354_v20 = vshrl.u32 %v211_v11, 16  ;;  %v2114_v26 = vrot.slane %v346_v60, 7 }
  0x2a   : > { %242 = vst.msk [vmem:[#allocation2 + $0x64] sm:$0x1] %vm217_vm3, %v1856_v0  ;;  %v554_v38 = vsel %vm2036_vm8, %v2006_v63, %v553_v15  ;;  %v479_v15 = vsel %vm1914_vm2, %v335_v54, %v478_v51  ;;  %v327_v23 = vor.u32 %v325_v59, %v2084_v58  ;;  %v373_v30 = vshll.u32 %v213_v12, 16  ;;  %v508_v56 = vld [vmem:[#allocation2 + $0x80] sm:$0xf] }
  0x2b   : > { %244 = vst.msk [vmem:[#allocation2 + $0x6c] sm:$0x1] %vm217_vm3, %v1856_v0  ;;  %v457_v46 = vld [vmem:[#allocation2 + $0x3c] sm:$0x1]  ;;  %v655_v57 = vunpack.c.l.b16 %v554_v38  ;;  %v362_v31 = vshrl.u32 %v2099_v13, 16  ;;  %v2124_v38 = vrot.slane %v370_v21, 7 }
  0x2c   : > { %246 = vst.msk [vmem:[#allocation2 + $0x74] sm:$0x1] %vm217_vm3, %v1856_v0  ;;  %v458_v63 = vsel %vm1972_vm7, %v304_v7, %v457_v46  ;;  %v467_v7 = vsel %vm1914_vm2, %v319_v49, %v466_v50  ;;  %v496_v50 = vld [vmem:[#allocation2 + $0x70] sm:$0xf] }
  0x2d   : > { %248 = vst.msk [vmem:[#allocation2 + $0x7c] sm:$0x1] %vm217_vm3, %v1856_v0  ;;  %v469_v55 = vld [vmem:[#allocation2 + $0x4c] sm:$0x1]  ;;  %v2132_v51 = vrot.slane %v362_v31, 7 }
  0x2e   : > { %250 = vst.msk [vmem:[#allocation2 + $0x84] sm:$0x1] %vm217_vm3, %v1856_v0  ;;  %v470_v18 = vsel %vm1972_vm7, %v320_v40, %v469_v55 }
  0x2f   : > { %v531_v32 = vld [vmem:[#allocation2 + $0x1c] sm:$0x1]  ;;  %252 = vst.msk [vmem:[#allocation2 + $0x8c] sm:$0x1] %vm217_vm3, %v1856_v0  ;;  %v446_v0 = vsel %vm1972_vm7, %v288_v3, %v445_v29  ;;  %v341_v3 = vshll.u32 %v2047_v27, 16  ;;  %v349_v27 = vshll.u32 %v2061_v37, 16 }
  0x30   : > { %v565_v39 = vshll.u32 %v531_v32, 16  ;;  %423 = vst [vmem:[#allocation2 + $0x10] sm:$0xf] %v422_v28  ;;  %v481_v16 = vld [vmem:[#allocation2 + $0x5c] sm:$0x1]  ;;  %v2119_v28 = vrot.slane %v354_v20, 7 }
  0x31   : > { %438 = vst [vmem:[#allocation2 + $0x20] sm:$0xf] %v437_v35  ;;  %v343_v24 = vor.u32 %v341_v3, %v2094_v2  ;;  %v357_v29 = vshll.u32 %v211_v11, 16  ;;  %v482_v36 = vsel %vm1972_vm7, %v336_v61, %v481_v16  ;;  %v352_v37 = vrot.slane %v2114_v26, 4 }
  0x32   : > { %v567_v52 = vrot.slane %v565_v39, 5  ;;  %444 = vst [vmem:[#allocation2 + $0x28] sm:$0xf] %v443_v44  ;;  %v473_v44 = vsel %vm1914_vm2, %v327_v23, %v472_v19 }
  0x33   : > { %447 = vst [vmem:[#allocation2 + $0x2c] sm:$0x1] %v446_v0  ;;  %v359_v49 = vor.u32 %v357_v29, %v2119_v28  ;;  %v351_v29 = vor.u32 %v349_v27, %v2114_v26 }
  0x34   : > { %v568_v62 = vsel %vm2036_vm8, %v563_v34, %v567_v52  ;;  %456 = vst [vmem:[#allocation2 + $0x38] sm:$0xf] %v455_v45  ;;  %v485_v45 = vsel %vm1914_vm2, %v343_v24, %v484_v25 }
  0x35   : > { %v656_v9 = vunpack.c.l.b16 %v568_v62  ;;  %459 = vst [vmem:[#allocation2 + $0x3c] sm:$0x1] %v458_v63  ;;  %v375_v62 = vor.u32 %v373_v30, %v2124_v38  ;;  %v497_v61 = vsel %vm1914_vm2, %v359_v49, %v496_v50  ;;  %v368_v30 = vrot.slane %v2132_v51, 4 }
  0x36   : > { %450 = vst [vmem:[#allocation2 + $0x30] sm:$0xf] %v449_v53 }
  0x37   : > { %v2108_v17 = vpack.c.b16 %v656_v9, %v655_v57  ;;  %462 = vst [vmem:[#allocation2 + $0x40] sm:$0xf] %v461_v14  ;;  %v1737_v32 = vld [vmem:[#allocation2 + $0x10] sm:$0xf]  ;;  %v509_v25 = vsel %vm1914_vm2, %v375_v62, %v508_v56 }
  0x38   : > { %v1804_v34 = vld [vmem:[#allocation2 + $0x1c] sm:$0xf0]  ;;  %468 = vst [vmem:[#allocation2 + $0x48] sm:$0xf] %v467_v7  ;;  %v365_v7 = vshll.u32 %v2099_v13, 16 }
  0x39   : > { %787 = vrot.lane.b32.xlu0 %v2108_v17, %s1857_s18  ;;  %v523_v35 = vld [vmem:[#allocation2 + $0x28] sm:$0xf]  ;;  %471 = vst [vmem:[#allocation2 + $0x4c] sm:$0x1] %v470_v18  ;;  %v1738_v46 = vor.u32 %v1804_v34, %v1737_v32 }
  0x3a   : > { %v532_v39 = vld [vmem:[#allocation2 + $0x2c] sm:$0x1]  ;;  %v570_v40 = vshrl.u32 %v523_v35, 16  ;;  %v573_v41 = vshll.u32 %v523_v35, 16  ;;  %480 = vst [vmem:[#allocation2 + $0x58] sm:$0xf] %v479_v15  ;;  %v367_v27 = vor.u32 %v365_v7, %v2132_v51 }
  0x3b   : > { %v524_v47 = vld [vmem:[#allocation2 + $0x38] sm:$0xf]  ;;  %v579_v48 = vshll.u32 %v532_v39, 16  ;;  %483 = vst [vmem:[#allocation2 + $0x5c] sm:$0x1] %v482_v36 }
  0x3c   : > { %v533_v52 = vld [vmem:[#allocation2 + $0x3c] sm:$0x1]  ;;  %v572_v0 = vrot.slane %v570_v40, 4  ;;  %v575_v53 = vrot.slane %v573_v41, 5  ;;  %v584_v54 = vshrl.u32 %v524_v47, 16  ;;  %v587_v55 = vshll.u32 %v524_v47, 16 }
  0x3d   : > { %v581_v57 = vrot.slane %v579_v48, 5  ;;  %v593_v59 = vshll.u32 %v533_v52, 16  ;;  %v1741_v60 = vld [vmem:[#allocation2 + $0x30] sm:$0xf]  ;;  %474 = vst [vmem:[#allocation2 + $0x50] sm:$0xf] %v473_v44 }
  0x3e   : > { %v576_v63 = vor.u32 %v575_v53, %v572_v0  ;;  %v586_v3 = vrot.slane %v584_v54, 4  ;;  %v589_v4 = vrot.slane %v587_v55, 5  ;;  %v1805_v5 = vld [vmem:[#allocation2 + $0x3c] sm:$0xf0]  ;;  %v1715_v12 = vld [vmem:[#allocation2 + $0x28] sm:$0xf] }
  0x3f   : > { %v595_v9 = vrot.slane %v593_v59, 5  ;;  %v1742_v11 = vor.u32 %v1805_v5, %v1741_v60  ;;  %v525_v14 = vld [vmem:[#allocation2 + $0x48] sm:$0xf]  ;;  %486 = vst [vmem:[#allocation2 + $0x60] sm:$0xf] %v485_v45  ;;  %v280_v0 = vrot.slane %v1978_v43, 4 }
  0x40   : > { %v577_v15 = vrot.slane %v576_v63, 4  ;;  %v590_v16 = vor.u32 %v589_v4, %v586_v3  ;;  %v534_v18 = vld [vmem:[#allocation2 + $0x4c] sm:$0x1]  ;;  %v598_v19 = vshrl.u32 %v525_v14, 16  ;;  %v601_v20 = vshll.u32 %v525_v14, 16 }
  0x41   : > { %877 = vrot.lane.b32.xlu0 %v1738_v46, %s1857_s18  ;;  %879 = vrot.lane.b32.xlu2 %v1742_v11, %s1857_s18  ;;  %v1801_v21 = vld [vmem:[#allocation2 + $0x34] sm:$0xf0]  ;;  %v607_v24 = vshll.u32 %v534_v18, 16  ;;  %498 = vst [vmem:[#allocation2 + $0x70] sm:$0xf] %v497_v61 }
  0x42   : > { %v526_v23 = vld [vmem:[#allocation2 + $0x58] sm:$0xf]  ;;  %v582_v13 = vsel %vm2036_vm8, %v577_v15, %v581_v57  ;;  %v591_v31 = vrot.slane %v590_v16, 4  ;;  %v600_v32 = vrot.slane %v598_v19, 4  ;;  %v603_v34 = vrot.slane %v601_v20, 5 }
  0x43   : > { %v657_v35 = vunpack.c.l.b16 %v582_v13  ;;  %v609_v36 = vrot.slane %v607_v24, 5  ;;  %v612_v39 = vshrl.u32 %v526_v23, 16  ;;  %v615_v40 = vshll.u32 %v526_v23, 16  ;;  %v535_v45 = vld [vmem:[#allocation2 + $0x5c] sm:$0x1] }
  0x44   : > { %v596_v41 = vsel %vm2036_vm8, %v591_v31, %v595_v9  ;;  %v1716_v44 = vor.u32 %v1801_v21, %v1715_v12  ;;  %v604_v46 = vor.u32 %v603_v34, %v600_v32  ;;  %510 = vst [vmem:[#allocation2 + $0x80] sm:$0xf] %v509_v25  ;;  %v490_v47 = vld [vmem:[#allocation2 + $0x68] sm:$0xf]  ;;  %v621_v52 = vshll.u32 %v535_v45, 16 }
  0x45   : > { %v658_v48 = vunpack.c.l.b16 %v596_v41  ;;  %v614_v49 = vrot.slane %v612_v39, 4  ;;  %v617_v50 = vrot.slane %v615_v40, 5  ;;  %v491_v54 = vsel %vm1914_vm2, %v351_v29, %v490_v47  ;;  %v493_v55 = vld [vmem:[#allocation2 + $0x6c] sm:$0x1]  ;;  %v502_v51 = vld [vmem:[#allocation2 + $0x78] sm:$0xf] }
  0x46   : > { %v605_v53 = vrot.slane %v604_v46, 4  ;;  %v296_v57 = vrot.slane %v2016_v8, 4  ;;  %v623_v60 = vrot.slane %v621_v52, 5  ;;  %492 = vst [vmem:[#allocation2 + $0x68] sm:$0xf] %v491_v54  ;;  %v494_v43 = vsel %vm1972_vm7, %v352_v37, %v493_v55 }
  0x47   : > { %v2152_v56 = vpack.c.b16 %v658_v48, %v657_v35  ;;  %v618_v59 = vor.u32 %v617_v50, %v614_v49  ;;  %v1745_v63 = vld [vmem:[#allocation2 + $0x50] sm:$0xf]  ;;  %v1719_v3 = vld [vmem:[#allocation2 + $0x48] sm:$0xf]  ;;  %v1802_v4 = vld [vmem:[#allocation2 + $0x54] sm:$0xf0]  ;;  %v503_v5 = vsel %vm1914_vm2, %v367_v27, %v502_v51 }
  0x48   : > { %v610_v62 = vsel %vm2036_vm8, %v605_v53, %v609_v36  ;;  %v505_v9 = vld [vmem:[#allocation2 + $0x7c] sm:$0x1]  ;;  %v427_v8 = vld [vmem:[#allocation2 + $0x14] sm:$0x1]  ;;  %v439_v11 = vld [vmem:[#allocation2 + $0x24] sm:$0x1] }
  0x49   : > { %789 = vrot.lane.b32.xlu1 %v2152_v56, %s1857_s18  ;;  %v312_v12 = vrot.slane %v2019_v10, 4  ;;  %735 = vrot.lane.b32.xlu2 %v1716_v44, %s1857_s18  ;;  %v619_v14 = vrot.slane %v618_v59, 4  ;;  %495 = vst [vmem:[#allocation2 + $0x6c] sm:$0x1] %v494_v43  ;;  %v506_v26 = vsel %vm1972_vm7, %v368_v30, %v505_v9  ;;  %v428_v37 = vsel %vm1972_vm7, %v264_v1, %v427_v8  ;;  %v937_v61 = vld [vmem:[#allocation2 + $0x10] sm:$0xf] }
  0x4a   : > { %v659_v7 = vunpack.c.l.b16 %v610_v62  ;;  %v1806_v15 = vld [vmem:[#allocation2 + $0x5c] sm:$0xf0]  ;;  %504 = vst [vmem:[#allocation2 + $0x78] sm:$0xf] %v503_v5  ;;  %v440_v16 = vsel %vm1972_vm7, %v280_v0, %v439_v11  ;;  %v328_v20 = vrot.slane %v2084_v58, 4  ;;  %v954_v21 = vshrl.u32 %v937_v61, 16 }
  0x4b   : > { %v939_v18 = vld [vmem:[#allocation2 + $0x20] sm:$0xf]  ;;  %v624_v19 = vsel %vm2036_vm8, %v619_v14, %v623_v60  ;;  %507 = vst [vmem:[#allocation2 + $0x7c] sm:$0x1] %v506_v26  ;;  %v957_v23 = vshll.u32 %v937_v61, 16  ;;  %v1746_v29 = vor.u32 %v1806_v15, %v1745_v63  ;;  %v1720_v30 = vor.u32 %v1802_v4, %v1719_v3 }
  0x4c   : > { %v660_v33 = vunpack.c.l.b16 %v624_v19  ;;  %v2178_v24 = vld [vmem:[#allocation2 + $0x70] sm:$0xf]  ;;  %429 = vst [vmem:[#allocation2 + $0x14] sm:$0x1] %v428_v37  ;;  %v968_v1 = vshrl.u32 %v939_v18, 16  ;;  %v971_v25 = vshll.u32 %v939_v18, 16 }
  0x4d   : > { %v2180_v13 = vld [vmem:[#allocation2 + $0x7c] sm:$0xf0]  ;;  %441 = vst [vmem:[#allocation2 + $0x24] sm:$0x1] %v440_v16  ;;  %v956_v31 = vrot.slane %v954_v21, 4  ;;  %v959_v32 = vrot.slane %v957_v23, 5 }
  0x4e   : > { %v2182_v34 = vpack.c.b16 %v660_v33, %v659_v7  ;;  %v344_v35 = vrot.slane %v2094_v2, 4  ;;  %v527_v36 = vld [vmem:[#allocation2 + $0x68] sm:$0xf]  ;;  %v970_v39 = vrot.slane %v968_v1, 4  ;;  %v973_v40 = vrot.slane %v971_v25, 5 }
  0x4f   : > { %v626_v41 = vshrl.u32 %v527_v36, 16  ;;  %v629_v44 = vshll.u32 %v527_v36, 16  ;;  %v960_v45 = vor.u32 %v959_v32, %v956_v31  ;;  %v1723_v46 = vld [vmem:[#allocation2 + $0x68] sm:$0xf]  ;;  %v451_v27 = vld [vmem:[#allocation2 + $0x34] sm:$0x1]  ;;  %v1750_v47 = vor.u32 %v2180_v13, %v2178_v24 }
  0x50   : > { %791 = vrot.lane.b32.xlu0 %v2182_v34, %s1857_s18  ;;  %v536_v48 = vld [vmem:[#allocation2 + $0x6c] sm:$0x1]  ;;  %v974_v49 = vor.u32 %v973_v40, %v970_v39  ;;  %v452_v50 = vsel %vm1972_vm7, %v296_v57, %v451_v27  ;;  %v463_v52 = vld [vmem:[#allocation2 + $0x44] sm:$0x1]  ;;  %v941_v0 = vld [vmem:[#allocation2 + $0x30] sm:$0xf] }
  0x51   : > { %881 = vrot.lane.b32.xlu1 %v1746_v29, %s1857_s18  ;;  %737 = vrot.lane.b32.xlu2 %v1720_v30, %s1857_s18  ;;  %v528_v53 = vld [vmem:[#allocation2 + $0x78] sm:$0xf]  ;;  %v628_v54 = vrot.slane %v626_v41, 4  ;;  %v631_v55 = vrot.slane %v629_v44, 5  ;;  %v635_v59 = vshll.u32 %v536_v48, 16  ;;  %v961_v60 = vrot.slane %v960_v45, 4 }
  0x52   : > { %v943_v51 = vld [vmem:[#allocation2 + $0x40] sm:$0xf]  ;;  %v537_v62 = vld [vmem:[#allocation2 + $0x7c] sm:$0x1]  ;;  %v640_v63 = vshrl.u32 %v528_v53, 16  ;;  %v643_v3 = vshll.u32 %v528_v53, 16  ;;  %v464_v14 = vsel %vm1972_vm7, %v312_v12, %v463_v52 }
  0x53   : > { %v975_v4 = vrot.slane %v974_v49, 4  ;;  %v982_v43 = vshrl.u32 %v941_v0, 16  ;;  %v632_v5 = vor.u32 %v631_v55, %v628_v54  ;;  %v637_v9 = vrot.slane %v635_v59, 5  ;;  %v938_v8 = vld [vmem:[#allocation2 + $0x14] sm:$0x1] }
  0x54   : > { %v649_v57 = vshll.u32 %v537_v62, 16  ;;  %v1803_v11 = vld [vmem:[#allocation2 + $0x74] sm:$0xf0]  ;;  %v642_v26 = vrot.slane %v640_v63, 4  ;;  %v645_v37 = vrot.slane %v643_v3, 5  ;;  %v963_v7 = vshll.u32 %v938_v8, 16 }
  0x55   : > { %v940_v61 = vld [vmem:[#allocation2 + $0x24] sm:$0x1]  ;;  %v1724_v15 = vor.u32 %v1803_v11, %v1723_v46  ;;  %v633_v16 = vrot.slane %v632_v5, 4  ;;  %453 = vst [vmem:[#allocation2 + $0x34] sm:$0x1] %v452_v50  ;;  %v984_v21 = vrot.slane %v982_v43, 4 }
  0x56   : > { %v651_v18 = vrot.slane %v649_v57, 5  ;;  %v977_v19 = vshll.u32 %v940_v61, 16  ;;  %v646_v23 = vor.u32 %v645_v37, %v642_v26  ;;  %v965_v33 = vrot.slane %v963_v7, 5  ;;  %465 = vst [vmem:[#allocation2 + $0x44] sm:$0x1] %v464_v14 }
  0x57   : > { %v985_v24 = vshll.u32 %v941_v0, 16  ;;  %v996_v1 = vshrl.u32 %v943_v51, 16  ;;  %v360_v10 = vrot.slane %v2119_v28, 4  ;;  %v638_v12 = vsel %vm2036_vm8, %v633_v16, %v637_v9  ;;  %v2200_v29 = vld [vmem:[#allocation2 + $0x18] sm:$0xf] }
  0x58   : > { %v979_v25 = vrot.slane %v977_v19, 5  ;;  %v999_v30 = vshll.u32 %v943_v51, 16  ;;  %v647_v13 = vrot.slane %v646_v23, 4  ;;  %v661_v31 = vunpack.c.l.b16 %v638_v12  ;;  %v2204_v36 = vld [vmem:[#allocation2 + $0x24] sm:$0xf0] }
  0x59   : > { %v966_v32 = vsel %vm2036_vm8, %v961_v60, %v965_v33  ;;  %v987_v39 = vrot.slane %v985_v24, 5  ;;  %v475_v40 = vld [vmem:[#allocation2 + $0x54] sm:$0x1]  ;;  %883 = vrot.lane.b32.xlu1 %v1750_v47, %s1857_s18  ;;  %739 = vrot.lane.b32.xlu2 %v1724_v15, %s1857_s18  ;;  %v998_v45 = vrot.slane %v996_v1, 4  ;;  %v1704_v27 = vld [vmem:[%s2470_s1 + $0x2] sm:$0x3]  ;;  %v1769_v51 = vor.u32 %v2204_v36, %v2200_v29 }
  0x5a   : > { %v980_v41 = vsel %vm2036_vm8, %v975_v4, %v979_v25  ;;  %v1067_v44 = vunpack.c.l.b16 %v966_v32  ;;  %v1001_v46 = vrot.slane %v999_v30, 5  ;;  %v487_v48 = vld [vmem:[#allocation2 + $0x64] sm:$0x1]  ;;  %v376_v49 = vrot.slane %v2124_v38, 4  ;;  %v945_v0 = vld [vmem:[#allocation2 + $0x50] sm:$0xf] }
  0x5b   : > { %v652_v50 = vsel %vm2036_vm8, %v647_v13, %v651_v18  ;;  %v1068_v52 = vunpack.c.l.b16 %v980_v41  ;;  %v988_v47 = vor.u32 %v987_v39, %v984_v21  ;;  %v476_v55 = vsel %vm1972_vm7, %v328_v20, %v475_v40  ;;  %v947_v59 = vld [vmem:[#allocation2 + $0x60] sm:$0xf]  ;;  %v1284_v60 = vld [vmem:[#allocation2 + $0x18] sm:$0xf]  ;;  %v1286_v18 = vld [vmem:[#allocation2 + $0x28] sm:$0xf] }
  0x5c   : > { %v662_v53 = vunpack.c.l.b16 %v652_v50  ;;  %v1002_v54 = vor.u32 %v1001_v46, %v998_v45  ;;  %v942_v62 = vld [vmem:[#allocation2 + $0x34] sm:$0x1]  ;;  %v682_v3 = vsel %vm680_vm9, %v1704_v27, 0  ;;  %477 = vst [vmem:[#allocation2 + $0x54] sm:$0x1] %v476_v55  ;;  %v488_v4 = vsel %vm1972_vm7, %v344_v35, %v487_v48 }
  0x5d   : > { %v989_v63 = vrot.slane %v988_v47, 4  ;;  %v2227_v58 = vpack.c.b16 %v1068_v52, %v1067_v44  ;;  %v944_v5 = vld [vmem:[#allocation2 + $0x44] sm:$0x1]  ;;  %v991_v20 = vshll.u32 %v942_v62, 16  ;;  %1835 = vmatpush.bf16.msra.mxu1 %v682_v3  ;;  %489 = vst [vmem:[#allocation2 + $0x64] sm:$0x1] %v488_v4  ;;  %1836 = vmatpush.bf16.msra.mxu2 %v682_v3 }
  0x5e   : > { %v666_v43 = vpack.c.b16 %v662_v53, %v661_v31  ;;  %v1003_v9 = vrot.slane %v1002_v54, 4  ;;  %v1005_v57 = vshll.u32 %v944_v5, 16  ;;  %v1010_v8 = vshrl.u32 %v945_v0, 16  ;;  %1837 = vmatpush.bf16.msra.mxu3 %v682_v3  ;;  %691 = vmatpush.bf16.msra.mxu0 %v682_v3  ;;  %v1285_v35 = vld [vmem:[#allocation2 + $0x1c] sm:$0x1] }
  0x5f   : > { %v1013_v11 = vshll.u32 %v945_v0, 16  ;;  %v1024_v14 = vshrl.u32 %v947_v59, 16  ;;  %v993_v2 = vrot.slane %v991_v20, 5  ;;  %v1027_v26 = vshll.u32 %v947_v59, 16  ;;  %v1287_v12 = vld [vmem:[#allocation2 + $0x2c] sm:$0x1] }
  0x60   : > { %793 = vrot.lane.b32.xlu0 %v666_v43, %s1857_s18  ;;  %v1301_v37 = vshrl.u32 %v1284_v60, 16  ;;  %v1007_v61 = vrot.slane %v1005_v57, 5  ;;  %v1012_v7 = vrot.slane %v1010_v8, 4  ;;  %1706 = vmatmul.msk.bf16.vlgmr.msra.gmra.mxu1 %vm667_vm10, %v2152_v56  ;;  %v1304_v33 = vshll.u32 %v1284_v60, 16  ;;  %v529_v39 = vld [vmem:[%s2470_s1] sm:$0x3] }
  0x61   : > { %v1015_v15 = vrot.slane %v1013_v11, 5  ;;  %v1026_v16 = vrot.slane %v1024_v14, 4  ;;  %1707 = vmatmul.msk.bf16.vlgmr.msra.gmra.mxu2 %vm667_vm10, %v2182_v34  ;;  %1133 = vrot.lane.b32.xlu1 %v2227_v58, %s1857_s18  ;;  %v994_v19 = vsel %vm2036_vm8, %v989_v63, %v993_v2  ;;  %v1029_v21 = vrot.slane %v1027_v26, 5  ;;  %v1772_v48 = vld [vmem:[#allocation2 + $0x38] sm:$0xf] }
  0x62   : > { %v1303_v23 = vrot.slane %v1301_v37, 4  ;;  %1708 = vmatmul.msk.bf16.vlgmr.msra.gmra.mxu3 %vm667_vm10, %v666_v43  ;;  %v1008_v24 = vsel %vm2036_vm8, %v1003_v9, %v1007_v61  ;;  %v1069_v1 = vunpack.c.l.b16 %v994_v19  ;;  %v1310_v25 = vshll.u32 %v1285_v35, 16  ;;  %1705 = vmatmul.msk.bf16.vlgmr.msra.gmra.mxu0 %vm667_vm10, %v2108_v17  ;;  %v1809_v50 = vld [vmem:[#allocation2 + $0x44] sm:$0xf0]  ;;  %v499_v0 = vld [vmem:[#allocation2 + $0x74] sm:$0x1] }
  0x63   : > { %v1016_v56 = vor.u32 %v1015_v15, %v1012_v7  ;;  %v1070_v34 = vunpack.c.l.b16 %v1008_v24  ;;  %v946_v30 = vld [vmem:[#allocation2 + $0x54] sm:$0x1]  ;;  %v1030_v13 = vor.u32 %v1029_v21, %v1026_v16  ;;  %v1306_v31 = vrot.slane %v1304_v33, 5  ;;  %v511_v60 = vld [vmem:[#allocation2 + $0x84] sm:$0x1] }
  0x64   : > { %v1315_v32 = vshrl.u32 %v1286_v18, 16  ;;  %v948_v40 = vld [vmem:[#allocation2 + $0x64] sm:$0x1]  ;;  %v1019_v44 = vshll.u32 %v946_v30, 16  ;;  %v1312_v45 = vrot.slane %v1310_v25, 5  ;;  %v1318_v46 = vshll.u32 %v1286_v18, 16 }
  0x65   : > { %v1017_v41 = vrot.slane %v1016_v56, 4  ;;  %v2246_v27 = vpack.c.b16 %v1070_v34, %v1069_v1  ;;  %v1031_v52 = vrot.slane %v1030_v13, 4  ;;  %v1033_v17 = vshll.u32 %v948_v40, 16  ;;  %v949_v4 = vld [vmem:[#allocation2 + $0x70] sm:$0xf] }
  0x66   : > { %v1307_v47 = vor.u32 %v1306_v31, %v1303_v23  ;;  %v1021_v53 = vrot.slane %v1019_v44, 5  ;;  %v1317_v54 = vrot.slane %v1315_v32, 4  ;;  %v1320_v55 = vrot.slane %v1318_v46, 5  ;;  %v951_v57 = vld [vmem:[#allocation2 + $0x80] sm:$0xf]  ;;  %v198_v46 = vld [vmem:[%s1896_s17 + $0x78] sm:$0xff] }
  0x67   : > { %v1324_v59 = vshll.u32 %v1287_v12, 16  ;;  %v1035_v62 = vrot.slane %v1033_v17, 5  ;;  %v754_v3 = vsel %vm680_vm9, %v529_v39, 0  ;;  %v500_v9 = vsel %vm1972_vm7, %v360_v10, %v499_v0  ;;  %v1776_v33 = vld [vmem:[#allocation2 + $0x58] sm:$0xf] }
  0x68   : > { %1224 = vrot.lane.b32.xlu0 %v1769_v51, %s1857_s18  ;;  %v1308_v63 = vrot.slane %v1307_v47, 4  ;;  %v1022_v43 = vsel %vm2036_vm8, %v1017_v41, %v1021_v53  ;;  %v1321_v5 = vor.u32 %v1320_v55, %v1317_v54  ;;  %763 = vmatpush.bf16.msrb.mxu1 %v754_v3  ;;  %501 = vst [vmem:[#allocation2 + $0x74] sm:$0x1] %v500_v9  ;;  %v1038_v14 = vshrl.u32 %v949_v4, 16  ;;  %v1810_v24 = vld [vmem:[#allocation2 + $0x64] sm:$0xf0] }
  0x69   : > { %v1326_v20 = vrot.slane %v1324_v59, 5  ;;  %1135 = vrot.lane.b32.xlu1 %v2246_v27, %s1857_s18  ;;  %v1036_v29 = vsel %vm2036_vm8, %v1031_v52, %v1035_v62  ;;  %v1071_v36 = vunpack.c.l.b16 %v1022_v43  ;;  %v512_v28 = vsel %vm1972_vm7, %v376_v49, %v511_v60  ;;  %v1729_v13 = vld [vmem:[%s2470_s1 + $0x4] sm:$0x3]  ;;  %v1734_v31 = vld [vmem:[%s2470_s1 + $0x6] sm:$0x3] }
  0x6a   : > { %v1313_v51 = vsel %vm2036_vm8, %v1308_v63, %v1312_v45  ;;  %v1773_v8 = vor.u32 %v1809_v50, %v1772_v48  ;;  %v1072_v11 = vunpack.c.l.b16 %v1036_v29  ;;  %v1322_v10 = vrot.slane %v1321_v5, 4  ;;  %513 = vst [vmem:[#allocation2 + $0x84] sm:$0x1] %v512_v28  ;;  %v1288_v55 = vld [vmem:[#allocation2 + $0x38] sm:$0xf] }
  0x6b   : > { %v1414_v2 = vunpack.c.l.b16 %v1313_v51  ;;  %v1041_v26 = vshll.u32 %v949_v4, 16  ;;  %v1052_v35 = vshrl.u32 %v951_v57, 16  ;;  %v1055_v37 = vshll.u32 %v951_v57, 16  ;;  %v1289_v59 = vld [vmem:[#allocation2 + $0x3c] sm:$0x1] }
  0x6c   : > { %v2269_v61 = vpack.c.b16 %v1072_v11, %v1071_v36  ;;  %v1327_v7 = vsel %vm2036_vm8, %v1322_v10, %v1326_v20  ;;  %v1040_v15 = vrot.slane %v1038_v14, 4  ;;  %v1777_v32 = vor.u32 %v1810_v24, %v1776_v33  ;;  %v1290_v60 = vld [vmem:[#allocation2 + $0x48] sm:$0xf]  ;;  %v1291_v62 = vld [vmem:[#allocation2 + $0x4c] sm:$0x1] }
  0x6d   : > { %v1415_v16 = vunpack.c.l.b16 %v1327_v7  ;;  %v1043_v38 = vrot.slane %v1041_v26, 5  ;;  %v1054_v18 = vrot.slane %v1052_v35, 4  ;;  %v1057_v19 = vrot.slane %v1055_v37, 5  ;;  %v514_v57 = vld [vmem:[#allocation2 + $0x88] sm:$0xf] }
  0x6e   : > { %v808_v40 = vsel %vm680_vm9, %v1729_v13, 0  ;;  %v898_v41 = vsel %vm680_vm9, %v1734_v31, 0  ;;  %v214_v52 = vpack.c.bf16 %v198_v46, %v198_v46  ;;  %v1329_v63 = vshrl.u32 %v1288_v55, 16 }
  0x6f   : > { %v2274_v49 = vpack.c.b16 %v1415_v16, %v1414_v2  ;;  %v1044_v21 = vor.u32 %v1043_v38, %v1040_v15  ;;  %v1058_v23 = vor.u32 %v1057_v19, %v1054_v18  ;;  %v950_v1 = vld [vmem:[#allocation2 + $0x74] sm:$0x1]  ;;  %817 = vmatpush.bf16.msrb.mxu2 %v808_v40  ;;  %907 = vmatpush.bf16.msrb.mxu3 %v898_v41  ;;  %v1332_v3 = vshll.u32 %v1288_v55, 16  ;;  %v1780_v16 = vld [vmem:[#allocation2 + $0x78] sm:$0xf] }
  0x70   : > { %1226 = vrot.lane.b32.xlu0 %v1773_v8, %s1857_s18  ;;  %v1047_v25 = vshll.u32 %v950_v1, 16  ;;  %v378_v47 = vshrl.u32 %v214_v52, 16  ;;  %v381_v54 = vshll.u32 %v214_v52, 16  ;;  %v1338_v4 = vshll.u32 %v1289_v59, 16  ;;  %v1292_v1 = vld [vmem:[#allocation2 + $0x58] sm:$0xf] }
  0x71   : > { %1137 = vrot.lane.b32.xlu1 %v2269_v61, %s1857_s18  ;;  %1480 = vrot.lane.b32.xlu2 %v2274_v49, %s1857_s18  ;;  %v952_v56 = vld [vmem:[#allocation2 + $0x84] sm:$0x1]  ;;  %v1045_v12 = vrot.slane %v1044_v21, 4  ;;  %v1059_v34 = vrot.slane %v1058_v23, 4  ;;  %v1343_v43 = vshrl.u32 %v1290_v60, 16  ;;  %v1346_v5 = vshll.u32 %v1290_v60, 16 }
  0x72   : > { %v1061_v30 = vshll.u32 %v952_v56, 16  ;;  %v1049_v39 = vrot.slane %v1047_v25, 5  ;;  %v2296_v53 = vrot.slane %v378_v47, 7  ;;  %v1352_v20 = vshll.u32 %v1291_v62, 16  ;;  %v1755_v21 = vld [vmem:[%s2470_s1 + $0x8] sm:$0x3] }
  0x73   : > { %v1331_v29 = vrot.slane %v1329_v63, 4  ;;  %v1334_v36 = vrot.slane %v1332_v3, 5  ;;  %v1345_v51 = vrot.slane %v1343_v43, 4  ;;  %v1348_v28 = vrot.slane %v1346_v5, 5  ;;  %v1765_v23 = vld [vmem:[%s2470_s1 + $0xc] sm:$0x3] }
  0x74   : > { %v1063_v44 = vrot.slane %v1061_v30, 5  ;;  %v1050_v45 = vsel %vm2036_vm8, %v1045_v12, %v1049_v39  ;;  %v383_v9 = vor.u32 %v381_v54, %v2296_v53  ;;  %v1340_v10 = vrot.slane %v1338_v4, 5  ;;  %v1294_v56 = vld [vmem:[#allocation2 + $0x68] sm:$0xf]  ;;  %v1293_v40 = vld [vmem:[#allocation2 + $0x5c] sm:$0x1] }
  0x75   : > { %v1073_v50 = vunpack.c.l.b16 %v1050_v45  ;;  %v1335_v11 = vor.u32 %v1334_v36, %v1331_v29  ;;  %v1349_v14 = vor.u32 %v1348_v28, %v1345_v51  ;;  %v1354_v2 = vrot.slane %v1352_v20, 5  ;;  %v1295_v41 = vld [vmem:[#allocation2 + $0x6c] sm:$0x1]  ;;  %v1760_v47 = vld [vmem:[%s2470_s1 + $0xa] sm:$0x3] }
  0x76   : > { %v1064_v48 = vsel %vm2036_vm8, %v1059_v34, %v1063_v44  ;;  %v515_v8 = vsel %vm1914_vm2, %v383_v9, %v514_v57  ;;  %v1092_v33 = vsel %vm680_vm9, %v1755_v21, 0  ;;  %v1245_v24 = vsel %vm680_vm9, %v1765_v23, 0  ;;  %v517_v43 = vld [vmem:[#allocation2 + $0x8c] sm:$0x1]  ;;  %v1296_v57 = vld [vmem:[#allocation2 + $0x78] sm:$0xf] }
  0x77   : > { %v1074_v17 = vunpack.c.l.b16 %v1064_v48  ;;  %516 = vst [vmem:[#allocation2 + $0x88] sm:$0xf] %v515_v8  ;;  %v1336_v26 = vrot.slane %v1335_v11, 4  ;;  %v1350_v35 = vrot.slane %v1349_v14, 4  ;;  %1101 = vmatpush.bf16.msrb.mxu0 %v1092_v33  ;;  %1254 = vmatpush.bf16.msra.mxu2 %v1245_v24  ;;  %v1357_v12 = vshrl.u32 %v1292_v1, 16 }
  0x78   : > { %1228 = vrot.lane.b32.xlu0 %v1777_v32, %s1857_s18  ;;  %v1360_v25 = vshll.u32 %v1292_v1, 16  ;;  %v1371_v34 = vshrl.u32 %v1294_v56, 16  ;;  %v1374_v30 = vshll.u32 %v1294_v56, 16  ;;  %v1366_v45 = vshll.u32 %v1293_v40, 16  ;;  %v1791_v36 = vld [vmem:[%s2470_s1 + $0x10] sm:$0x3] }
  0x79   : > { %v2294_v0 = vpack.c.b16 %v1074_v17, %v1073_v50  ;;  %v1341_v37 = vsel %vm2036_vm8, %v1336_v26, %v1340_v10  ;;  %v1355_v7 = vsel %vm2036_vm8, %v1350_v35, %v1354_v2  ;;  %v1359_v13 = vrot.slane %v1357_v12, 4  ;;  %v1786_v17 = vld [vmem:[%s2470_s1 + $0xe] sm:$0x3]  ;;  %v1297_v35 = vld [vmem:[#allocation2 + $0x7c] sm:$0x1] }
  0x7a   : > { %v1416_v15 = vunpack.c.l.b16 %v1341_v37  ;;  %v1417_v38 = vunpack.c.l.b16 %v1355_v7  ;;  %v1362_v31 = vrot.slane %v1360_v25, 5  ;;  %v1373_v32 = vrot.slane %v1371_v34, 4  ;;  %1756 = vmatmul.msk.bf16.vlgmr.msrb.gmra.mxu0 %vm667_vm10, %v2227_v58 }
  0x7b   : > { %1139 = vrot.lane.b32.xlu1 %v2294_v0, %s1857_s18  ;;  %v1376_v39 = vrot.slane %v1374_v30, 5  ;;  %v1380_v48 = vshll.u32 %v1295_v41, 16  ;;  %v384_v52 = vrot.slane %v2296_v53, 4  ;;  %v1368_v54 = vrot.slane %v1366_v45, 5 }
  0x7c   : > { %v2307_v19 = vpack.c.b16 %v1417_v38, %v1416_v15  ;;  %v1363_v44 = vor.u32 %v1362_v31, %v1359_v13  ;;  %v1439_v55 = vsel %vm680_vm9, %v1786_v17, 0  ;;  %v1154_v59 = vsel %vm680_vm9, %v1760_v47, 0 }
  0x7d   : > { %v1377_v46 = vor.u32 %v1376_v39, %v1373_v32  ;;  %v1382_v62 = vrot.slane %v1380_v48, 5  ;;  %1448 = vmatpush.bf16.msra.mxu3 %v1439_v55  ;;  %1163 = vmatpush.bf16.msra.mxu1 %v1154_v59  ;;  %v518_v5 = vsel %vm1972_vm7, %v384_v52, %v517_v43  ;;  %v1385_v51 = vshrl.u32 %v1296_v57, 16 }
  0x7e   : > { %v1811_v18 = vld [vmem:[#allocation2 + $0x84] sm:$0xf0]  ;;  %1482 = vrot.lane.b32.xlu2 %v2307_v19, %s1857_s18  ;;  %v1364_v58 = vrot.slane %v1363_v44, 4  ;;  %519 = vst [vmem:[#allocation2 + $0x8c] sm:$0x1] %v518_v5  ;;  %v1388_v28 = vshll.u32 %v1296_v57, 16 }
  0x7f   : > { %v1781_v6 = vor.u32 %v1811_v18, %v1780_v16  ;;  %v1378_v60 = vrot.slane %v1377_v46, 4  ;;  %v1298_v29 = vld [vmem:[#allocation2 + $0x88] sm:$0xf]  ;;  %v1501_v42 = vsel %vm680_vm9, %v1791_v36, 0  ;;  %v1387_v10 = vrot.slane %v1385_v51, 4 }
  0x80   : > { %v1369_v53 = vsel %vm2036_vm8, %v1364_v58, %v1368_v54  ;;  %v1399_v8 = vshrl.u32 %v1298_v29, 16  ;;  %v1402_v11 = vshll.u32 %v1298_v29, 16  ;;  %1510 = vmatpush.bf16.msra.mxu0 %v1501_v42  ;;  %v1390_v14 = vrot.slane %v1388_v28, 5 }
  0x81   : > { %1230 = vrot.lane.b32.xlu0 %v1781_v6, %s1857_s18  ;;  %v1383_v63 = vsel %vm2036_vm8, %v1378_v60, %v1382_v62  ;;  %v1418_v3 = vunpack.c.l.b16 %v1369_v53  ;;  %v1394_v15 = vshll.u32 %v1297_v35, 16 }
  0x82   : > { %v1419_v4 = vunpack.c.l.b16 %v1383_v63  ;;  %v1401_v2 = vrot.slane %v1399_v8, 4  ;;  %v1404_v26 = vrot.slane %v1402_v11, 5  ;;  %v1391_v7 = vor.u32 %v1390_v14, %v1387_v10 }
  0x83   : > { %v1396_v6 = vrot.slane %v1394_v15, 5 }
  0x84   : > { %v2338_v20 = vpack.c.b16 %v1419_v4, %v1418_v3  ;;  %v1405_v16 = vor.u32 %v1404_v26, %v1401_v2  ;;  %v1392_v18 = vrot.slane %v1391_v7, 4 }
  0x85   : > { %v1299_v37 = vld [vmem:[#allocation2 + $0x8c] sm:$0x1] }
  0x86   : > { %1484 = vrot.lane.b32.xlu2 %v2338_v20, %s1857_s18  ;;  %v1408_v38 = vshll.u32 %v1299_v37, 16  ;;  %v1406_v21 = vrot.slane %v1405_v16, 4  ;;  %v1397_v24 = vsel %vm2036_vm8, %v1392_v18, %v1396_v6 }
  0x88   : > { %v1410_v23 = vrot.slane %v1408_v38, 5 }
  0x8a   : > { %1757 = vmatmul.msk.bf16.gmra.mxu0 %vm667_vm10, %v2246_v27  ;;  %v1411_v1 = vsel %vm2036_vm8, %v1406_v21, %v1410_v23  ;;  %v1420_v27 = vunpack.c.l.b16 %v1397_v24 }
  0x8b   : > { %v1421_v56 = vunpack.c.l.b16 %v1411_v1 }
  0x8d   : > { %v1425_v12 = vpack.c.b16 %v1421_v56, %v1420_v27 }
  0x8f   : > { %1486 = vrot.lane.b32.xlu2 %v1425_v12, %s1857_s18 }
  0x94   : > { %v734_v50 = vpop.permute.xlu1 %733 }
  0x95   : > { %1725 = vmatmul.msk.bf16.vlgmr.msrb.gmra.mxu1 %vm667_vm10, %v734_v50 }
  0x9a   : > { %1758 = vmatmul.msk.bf16.gmra.mxu0 %vm667_vm10, %v2269_v61 }
  0x9b   : > { %v880_v9 = vpop.permute.xlu2 %879 }
  0xa3   : > { %v736_v33 = vpop.permute.xlu2 %735 }
  0xa5   : > { %1726 = vmatmul.msk.bf16.gmra.mxu1 %vm667_vm10, %v736_v33 }
  0xaa   : > { %1759 = vmatmul.msk.bf16.gmra.mxu0 %vm667_vm10, %v2294_v0 }
  0xab   : > { %v788_v25 = vpop.permute.xlu0 %787  ;;  %v738_v30 = vpop.permute.xlu2 %737 }
  0xac   : > { %1730 = vmatmul.msk.bf16.vlgmr.msrb.gmra.mxu2 %vm667_vm10, %v788_v25 }
  0xb3   : > { %v878_v34 = vpop.permute.xlu0 %877  ;;  %v740_v22 = vpop.permute.xlu2 %739 }
  0xb4   : > { %1751 = vmatmul.msk.bf16.vlgmr.msrb.gmra.mxu3 %vm667_vm10, %v878_v34 }
  0xb5   : > { %1727 = vmatmul.msk.bf16.gmra.mxu1 %vm667_vm10, %v738_v30 }
  0xbb   : > { %v790_v13 = vpop.permute.xlu1 %789 }
  0xbc   : > { %1731 = vmatmul.msk.bf16.gmra.mxu2 %vm667_vm10, %v790_v13 }
  0xc2   : > { %v792_v32 = vpop.permute.xlu0 %791 }
  0xc3   : > { %v882_v31 = vpop.permute.xlu1 %881 }
  0xc4   : > { %1752 = vmatmul.msk.bf16.gmra.mxu3 %vm667_vm10, %v880_v9 }
  0xc5   : > { %1728 = vmatmul.msk.bf16.gmra.mxu1 %vm667_vm10, %v740_v22 }
  0xcb   : > { %v884_v61 = vpop.permute.xlu1 %883  ;;  %v1481_v39 = vpop.permute.xlu2 %1480 }
  0xcc   : > { %1732 = vmatmul.msk.bf16.gmra.mxu2 %vm667_vm10, %v792_v32  ;;  %1792 = vmatmul.msk.bf16.vlgmr.msra.gmra.mxu0 %vm667_vm10, %v1481_v39 }
  0xd2   : > { %v794_v41 = vpop.permute.xlu0 %793 }
  0xd3   : > { %v1134_v40 = vpop.permute.xlu1 %1133 }
  0xd4   : > { %1753 = vmatmul.msk.bf16.gmra.mxu3 %vm667_vm10, %v882_v31 }
  0xd5   : > { %1761 = vmatmul.msk.bf16.vlgmr.msra.gmra.mxu1 %vm667_vm10, %v1134_v40 }
  0xd8   : > { %v1483_v44 = vpop.permute.xlu2 %1482 }
  0xda   : > { %v1225_v45 = vpop.permute.xlu0 %1224 }
  0xdb   : > { %v1136_v0 = vpop.permute.xlu1 %1135 }
  0xdc   : > { %1733 = vmatmul.msk.bf16.gmra.mxu2 %vm667_vm10, %v794_v41  ;;  %1793 = vmatmul.msk.bf16.gmra.mxu0 %vm667_vm10, %v1483_v44 }
  0xdd   : > { %v698_v52 = vpop.f32.mrf.mxu1 }
  0xdf   : > { %v693_v54 = vpop.f32.mrf.mxu0 }
  0xe0   : > { %v1485_v48 = vpop.permute.xlu2 %1484 }
  0xe2   : > { %v1227_v50 = vpop.permute.xlu0 %1226 }
  0xe3   : > { %v1138_v46 = vpop.permute.xlu1 %1137 }
  0xe4   : > { %1754 = vmatmul.msk.bf16.gmra.mxu3 %vm667_vm10, %v884_v61  ;;  %v703_v63 = vpop.f32.mrf.mxu2 }
  0xe5   : > { %1762 = vmatmul.msk.bf16.gmra.mxu1 %vm667_vm10, %v1136_v0  ;;  %v2381_v58 = vpop.f32.mrf.mxu1  ;;  %v2388_v4 = vpop.f32.mrf.mxu3 }
  0xe7   : > { %v695_v59 = vpop.f32.mrf.mxu0 }
  0xe9   : > { %v1487_v47 = vpop.permute.xlu2 %1486 }
  0xec   : > { %1782 = vmatmul.msk.bf16.vlgmr.msra.gmra.mxu2 %vm667_vm10, %v1225_v45  ;;  %1794 = vmatmul.msk.bf16.gmra.mxu0 %vm667_vm10, %v1485_v48  ;;  %v2391_v9 = vpop.f32.mrf.mxu2 }
  0xed   : > { %v1140_v17 = vpop.permute.xlu1 %1139  ;;  %v2393_v29 = vpop.f32.mrf.mxu3 }
  0xf4   : > { %1787 = vmatmul.msk.bf16.vlgmr.msra.gmra.mxu3 %vm667_vm10, %v2274_v49  ;;  %v1229_v49 = vpop.permute.xlu0 %1228 }
  0xf5   : > { %1763 = vmatmul.msk.bf16.gmra.mxu1 %vm667_vm10, %v1138_v46 }
  0xfc   : > { %1783 = vmatmul.msk.bf16.gmra.mxu2 %vm667_vm10, %v1227_v50  ;;  %1795 = vmatmul.msk.bf16.gmra.mxu0 %vm667_vm10, %v1487_v47  ;;  %v1231_v53 = vpop.permute.xlu0 %1230 }
 0x104   : > { %1788 = vmatmul.msk.bf16.gmra.mxu3 %vm667_vm10, %v2307_v19  ;;  %v1103_v19 = vpop.f32.mrf.mxu0 }
 0x105   : > { %1764 = vmatmul.msk.bf16.gmra.mxu1 %vm667_vm10, %v1140_v17 }
 0x10c   : > { %1784 = vmatmul.msk.bf16.gmra.mxu2 %vm667_vm10, %v1229_v49  ;;  %v1105_v5 = vpop.f32.mrf.mxu0 }
 0x112   : > { %v765_v55 = vpop.f32.mrf.mxu1 }
 0x113   : > { %v766_v60 = vadd.f32 %v765_v55, %v693_v54 }
 0x114   : > { %1789 = vmatmul.msk.bf16.gmra.mxu3 %vm667_vm10, %v2338_v20  ;;  %v1108_v20 = vpop.f32.mrf.mxu0 }
 0x11a   : > { %v767_v62 = vpop.f32.mrf.mxu1 }
 0x11b   : > { %v768_v45 = vadd.f32 %v767_v62, %v695_v59 }
 0x11c   : > { %1785 = vmatmul.msk.bf16.gmra.mxu2 %vm667_vm10, %v1231_v53  ;;  %v2395_v14 = vpop.f32.mrf.mxu0 }
 0x122   : > { %v770_v3 = vpop.f32.mrf.mxu1 }
 0x123   : > { %v771_v43 = vadd.f32 %v770_v3, %v698_v52 }
 0x124   : > { %1790 = vmatmul.msk.bf16.gmra.mxu3 %vm667_vm10, %v1425_v12  ;;  %v1113_v7 = vpop.f32.mrf.mxu0 }
 0x12a   : > { %v772_v57 = vpop.f32.mrf.mxu1 }
 0x12b   : > { %v773_v59 = vadd.f32 %v772_v57, %v2381_v58 }
 0x12c   : > { %v2399_v21 = vpop.f32.mrf.mxu0 }
 0x12f   : > { %v819_v36 = vpop.f32.mrf.mxu2 }
 0x130   : > { %v839_v51 = vadd.f32 %v819_v36, %v766_v60 }
 0x132   : > { %v775_v28 = vpop.f32.mrf.mxu1 }
 0x133   : > { %v776_v8 = vadd.f32 %v775_v28, %v703_v63 }
 0x134   : > { %v2403_v56 = vpop.f32.mrf.mxu0 }
 0x137   : > { %v821_v11 = vpop.f32.mrf.mxu2  ;;  %v909_v42 = vpop.f32.mrf.mxu3 }
 0x138   : > { %v929_v10 = vadd.f32 %v909_v42, %v839_v51  ;;  %v840_v46 = vadd.f32 %v821_v11, %v768_v45 }
 0x13a   : > { %v1123_v2 = vadd.f32 %v1103_v19, %v929_v10  ;;  %v2397_v15 = vpop.f32.mrf.mxu1 }
 0x13c   : > { %v2409_v31 = vpop.f32.mrf.mxu0 }
 0x13f   : > { %v911_v26 = vpop.f32.mrf.mxu3  ;;  %v824_v35 = vpop.f32.mrf.mxu2 }
 0x140   : > { %v841_v37 = vadd.f32 %v824_v35, %v771_v43  ;;  %v930_v50 = vadd.f32 %v911_v26, %v840_v46 }
 0x142   : > { %v2401_v23 = vpop.f32.mrf.mxu1  ;;  %v1124_v49 = vadd.f32 %v1105_v5, %v930_v50 }
 0x147   : > { %v914_v16 = vpop.f32.mrf.mxu3  ;;  %v826_v18 = vpop.f32.mrf.mxu2 }
 0x148   : > { %v931_v38 = vadd.f32 %v914_v16, %v841_v37  ;;  %v842_v5 = vadd.f32 %v826_v18, %v773_v59 }
 0x149   : > { %v1512_v40 = vpop.f32.mrf.mxu0 }
 0x14a   : > { %v1125_v6 = vadd.f32 %v1108_v20, %v931_v38  ;;  %v2405_v25 = vpop.f32.mrf.mxu1 }
 0x14f   : > { %v916_v33 = vpop.f32.mrf.mxu3  ;;  %v829_v24 = vpop.f32.mrf.mxu2 }
 0x150   : > { %v843_v1 = vadd.f32 %v829_v24, %v776_v8  ;;  %v932_v42 = vadd.f32 %v916_v33, %v842_v5  ;;  %v778_v33 = vadd.f32 %v2397_v15, %v2391_v9  ;;  %v781_v9 = vadd.f32 %v2401_v23, %v2388_v4 }
 0x151   : > { %v1514_v48 = vpop.f32.mrf.mxu0 }
 0x152   : > { %v1165_v32 = vpop.f32.mrf.mxu1  ;;  %v1126_v35 = vadd.f32 %v2395_v14, %v932_v42 }
 0x153   : > { %v1185_v54 = vadd.f32 %v1165_v32, %v1123_v2 }
 0x157   : > { %v919_v27 = vpop.f32.mrf.mxu3  ;;  %v831_v34 = vpop.f32.mrf.mxu2 }
 0x158   : > { %v933_v12 = vadd.f32 %v919_v27, %v843_v1  ;;  %v844_v32 = vadd.f32 %v831_v34, %v778_v33 }
 0x159   : > { %v1517_v3 = vpop.f32.mrf.mxu0 }
 0x15a   : > { %v1127_v30 = vadd.f32 %v1113_v7, %v933_v12  ;;  %v1167_v41 = vpop.f32.mrf.mxu1 }
 0x15b   : > { %v1186_v55 = vadd.f32 %v1167_v41, %v1124_v49 }
 0x15f   : > { %v921_v13 = vpop.f32.mrf.mxu3  ;;  %v2407_v22 = vpop.f32.mrf.mxu2 }
 0x160   : > { %v934_v45 = vadd.f32 %v921_v13, %v844_v32  ;;  %v845_v34 = vadd.f32 %v2407_v22, %v781_v9 }
 0x161   : > { %v1519_v26 = vpop.f32.mrf.mxu0 }
 0x162   : > { %v1170_v52 = vpop.f32.mrf.mxu1  ;;  %v1128_v15 = vadd.f32 %v2399_v21, %v934_v45 }
 0x163   : > { %v1187_v28 = vadd.f32 %v1170_v52, %v1125_v6 }
 0x167   : > { %v2411_v61 = vpop.f32.mrf.mxu3  ;;  %v2413_v39 = vpop.f32.mrf.mxu2 }
 0x168   : > { %v935_v49 = vadd.f32 %v2411_v61, %v845_v34 }
 0x169   : > { %v1522_v12 = vpop.f32.mrf.mxu0 }
 0x16a   : > { %v1172_v36 = vpop.f32.mrf.mxu1  ;;  %v1129_v4 = vadd.f32 %v2403_v56, %v935_v49 }
 0x16b   : > { %v1188_v16 = vadd.f32 %v1172_v36, %v1126_v35 }
 0x16f   : > { %v2415_v0 = vpop.f32.mrf.mxu3  ;;  %v1256_v44 = vpop.f32.mrf.mxu2 }
 0x170   : > { %v1276_v60 = vadd.f32 %v1256_v44, %v1185_v54 }
 0x171   : > { %v1524_v54 = vpop.f32.mrf.mxu0 }
 0x172   : > { %v1175_v7 = vpop.f32.mrf.mxu1 }
 0x177   : > { %v1450_v17 = vpop.f32.mrf.mxu3  ;;  %v1258_v47 = vpop.f32.mrf.mxu2 }
 0x178   : > { %v1277_v53 = vadd.f32 %v1258_v47, %v1186_v55  ;;  %v1470_v19 = vadd.f32 %v1450_v17, %v1276_v60 }
 0x179   : > { %v1527_v61 = vpop.f32.mrf.mxu0 }
 0x17a   : > { %v2419_v62 = vadd.f32 %v1512_v40, %v1470_v19  ;;  %v1189_v40 = vadd.f32 %v1175_v7, %v1127_v30  ;;  %v1177_v44 = vpop.f32.mrf.mxu1 }
 0x17b   : > { %v1190_v30 = vadd.f32 %v1177_v44, %v1128_v15 }
 0x17f   : > { %v1452_v63 = vpop.f32.mrf.mxu3  ;;  %v1261_v20 = vpop.f32.mrf.mxu2 }
 0x180   : > { %v1471_v43 = vadd.f32 %v1452_v63, %v1277_v53  ;;  %v1278_v58 = vadd.f32 %v1261_v20, %v1187_v28  ;;  %v783_v63 = vadd.f32 %v2405_v25, %v2393_v29 }
 0x182   : > { %v2421_v51 = vadd.f32 %v1514_v48, %v1471_v43  ;;  %v1180_v55 = vpop.f32.mrf.mxu1  ;;  %v846_v23 = vadd.f32 %v2413_v39, %v783_v63 }
 0x183   : > { %v1191_v22 = vadd.f32 %v1180_v55, %v1129_v4 }
 0x184   : > { %v1815_v8 = vpack.c.bf16 %v2421_v51, %v2419_v62  ;;  %v1556_v11 = vadd.f32 %v2421_v51, %v2419_v62  ;;  %v936_v36 = vadd.f32 %v2415_v0, %v846_v23 }
 0x186   : > { %1816 = vst [vmem:[%s2426_s15] sm:$0xff] %v1815_v8   ;;  %v1130_v8 = vadd.f32 %v2409_v31, %v936_v36 }
 0x187   : > { %v1455_v57 = vpop.f32.mrf.mxu3  ;;  %v1263_v2 = vpop.f32.mrf.mxu2 }
 0x188   : > { %v1472_v10 = vadd.f32 %v1455_v57, %v1278_v58  ;;  %v1279_v18 = vadd.f32 %v1263_v2, %v1188_v16  ;;  %v1529_v57 = vpop.f32.mrf.mxu0 }
 0x18a   : > { %v2434_v37 = vadd.f32 %v1517_v3, %v1472_v10  ;;  %v1182_v28 = vpop.f32.mrf.mxu1 }
 0x18b   : > { %v1192_v56 = vadd.f32 %v1182_v28, %v1130_v8 }
 0x18c   : > { %v1557_v38 = vadd.f32 %v1556_v11, %v2434_v37 }
 0x18f   : > { %v1457_v6 = vpop.f32.mrf.mxu3  ;;  %v1266_v1 = vpop.f32.mrf.mxu2 }
 0x190   : > { %v1473_v24 = vadd.f32 %v1457_v6, %v1279_v18  ;;  %v1280_v46 = vadd.f32 %v1266_v1, %v1189_v40 }
 0x192   : > { %v2439_v27 = vadd.f32 %v1519_v26, %v1473_v24 }
 0x194   : > { %v1820_v14 = vpack.c.bf16 %v2439_v27, %v2434_v37  ;;  %v1558_v41 = vadd.f32 %v1557_v38, %v2439_v27 }
 0x196   : > { %1832 = vst [vmem:[%s2426_s15 + $0x8] sm:$0xff] %v1820_v14  }
 0x197   : > { %v1460_v48 = vpop.f32.mrf.mxu3  ;;  %v1268_v52 = vpop.f32.mrf.mxu2 }
 0x198   : > { %v1474_v50 = vadd.f32 %v1460_v48, %v1280_v46  ;;  %v1281_v13 = vadd.f32 %v1268_v52, %v1190_v30 }
 0x19a   : > { %v1536_v17 = vadd.f32 %v1522_v12, %v1474_v50 }
 0x19c   : > { %v1559_v47 = vadd.f32 %v1558_v41, %v1536_v17 }
 0x19f   : > { %v1462_v60 = vpop.f32.mrf.mxu3  ;;  %v1271_v19 = vpop.f32.mrf.mxu2 }
 0x1a0   : > { %v1475_v53 = vadd.f32 %v1462_v60, %v1281_v13  ;;  %v1282_v20 = vadd.f32 %v1271_v19, %v1191_v22 }
 0x1a2   : > { %v1537_v21 = vadd.f32 %v1524_v54, %v1475_v53 }
 0x1a4   : > { %v1825_v3 = vpack.c.bf16 %v1537_v21, %v1536_v17  ;;  %v1560_v43 = vadd.f32 %v1559_v47, %v1537_v21  ;;  %v1599_v47 = vlaneseq }
 0x1a6   : > { %1833 = vst [vmem:[%s2426_s15 + $0x10] sm:$0xff] %v1825_v3   ;;  %v1600_v13 = vshrl.u32 %v1599_v47, 7 }
 0x1a7   : > { %v1465_v59 = vpop.f32.mrf.mxu3  ;;  %v1273_v25 = vpop.f32.mrf.mxu2 }
 0x1a8   : > { %v1476_v5 = vadd.f32 %v1465_v59, %v1282_v20  ;;  %v1283_v42 = vadd.f32 %v1273_v25, %v1192_v56  ;;  %vm1603_vm11 = vcmp.eq.s32.totalorder %v1600_v13, 2  ;;  %vm1602_vm12 = vcmp.eq.s32.totalorder %v1600_v13, 1 }
 0x1a9   : > { %vm1601_vm13 = vcmp.eq.s32.totalorder %v1600_v13, 0 }
 0x1aa   : > { %v1538_v29 = vadd.f32 %v1527_v61, %v1476_v5 }
 0x1ac   : > { %v1561_v11 = vadd.f32 %v1560_v43, %v1538_v29 }
 0x1af   : > { %v1467_v39 = vpop.f32.mrf.mxu3 }
 0x1b0   : > { %v1477_v58 = vadd.f32 %v1467_v39, %v1283_v42 }
 0x1b2   : > { %v1539_v10 = vadd.f32 %v1529_v57, %v1477_v58 }
 0x1b4   : > { %v1830_v2 = vpack.c.bf16 %v1539_v10, %v1538_v29  ;;  %v1562_v0 = vadd.f32 %v1561_v11, %v1539_v10 }
 0x1b6   : > { %1834 = vst [vmem:[%s2426_s15 + $0x18] sm:$0xff] %v1830_v2   ;;  %v1563_v26 = vrot.slane %v1562_v0, 4 }
 0x1b8   : > { %v1564_v35 = vadd.f32 %v1563_v26, %v1562_v0 }
 0x1ba   : > { %v1565_v7 = vrot.slane %v1564_v35, 2 }
 0x1bc   : > { %v1566_v16 = vadd.f32 %v1565_v7, %v1564_v35 }
 0x1be   : > { %v1567_v38 = vrot.slane %v1566_v16, 1 }
 0x1c0   : > { %v1568_v18 = vadd.f32 %v1567_v38, %v1566_v16 }
 0x1c2   : > { %v1569_v6 = vmul.f32 0.015625, %v1568_v18 }
 0x1c4   : > { %v1570_v31 = vsub.f32 %v2419_v62, %v1569_v6  ;;  %v1571_v24 = vsub.f32 %v2421_v51, %v1569_v6  ;;  %v1572_v1 = vsub.f32 %v2434_v37, %v1569_v6  ;;  %v1573_v33 = vsub.f32 %v2439_v27, %v1569_v6 }
 0x1c5   : > { %v1574_v12 = vsub.f32 %v1536_v17, %v1569_v6  ;;  %v1575_v32 = vsub.f32 %v1537_v21, %v1569_v6  ;;  %v1576_v40 = vsub.f32 %v1538_v29, %v1569_v6  ;;  %v1577_v14 = vsub.f32 %v1539_v10, %v1569_v6 }
 0x1c6   : > { %v1578_v41 = vmul.f32 %v1570_v31, %v1570_v31  ;;  %v1579_v44 = vmul.f32 %v1571_v24, %v1571_v24  ;;  %v1580_v45 = vmul.f32 %v1572_v1, %v1572_v1  ;;  %v1581_v48 = vmul.f32 %v1573_v33, %v1573_v33 }
 0x1c7   : > { %v1582_v52 = vmul.f32 %v1574_v12, %v1574_v12  ;;  %v1583_v62 = vmul.f32 %v1575_v32, %v1575_v32  ;;  %v1584_v51 = vmul.f32 %v1576_v40, %v1576_v40  ;;  %v1585_v37 = vmul.f32 %v1577_v14, %v1577_v14 }
 0x1c8   : > { %v1586_v46 = vadd.f32 %v1579_v44, %v1578_v41 }
 0x1ca   : > { %v1587_v50 = vadd.f32 %v1586_v46, %v1580_v45 }
 0x1cc   : > { %v1588_v9 = vadd.f32 %v1587_v50, %v1581_v48 }
 0x1ce   : > { %v1589_v15 = vadd.f32 %v1588_v9, %v1582_v52 }
 0x1d0   : > { %v1590_v34 = vadd.f32 %v1589_v15, %v1583_v62 }
 0x1d2   : > { %v1591_v30 = vadd.f32 %v1590_v34, %v1584_v51 }
 0x1d4   : > { %v1592_v27 = vadd.f32 %v1591_v30, %v1585_v37 }
 0x1d6   : > { %v1593_v17 = vrot.slane %v1592_v27, 4 }
 0x1d8   : > { %v1594_v54 = vadd.f32 %v1593_v17, %v1592_v27 }
 0x1da   : > { %v1595_v49 = vrot.slane %v1594_v54, 2 }
 0x1dc   : > { %v1596_v55 = vadd.f32 %v1595_v49, %v1594_v54 }
 0x1de   : > { %v1597_v60 = vrot.slane %v1596_v55, 1 }
 0x1e0   : > { %v1598_v53 = vadd.f32 %v1597_v60, %v1596_v55 }
 0x1e2   : > { %v1604_v19 = vsel %vm1603_vm11, %v1598_v53, 0.0 }
 0x1e3   : > { %v1605_v63 = vsel %vm1602_vm12, %v1568_v18, %v1604_v19 }
 0x1e4   : > { %v1606_v4 = vsel %vm1601_vm13, 64.0, %v1605_v63 }
 0x1e5   : > { %1607 = vst [vmem:[%s181_s19] sm:$0xff] %v1606_v4 }
 0x1e6 PF: > { %s14_s12 = sadd.s32 1, %s1854_s12  }
 0x1e7   : > { %p11_p4 = scmp.ge.s32.totalorder %s14_s12, 4  }
 0x1e9   :  { %13 = sbr.rel (!%p11_p4) target bundleno = 1 (0x1), region = 81 }

// kernel: stem_forward.11
= control target key start
LH: loop header
LB: loop body
LE: loop exit
PB: predicated region body
PF: predicated region fallthrough
CT: control target
= control target key end

     0   :  { %8 = vsyncpa [#allocation3], 0  ;;  %s497_s0 = inlined_call_operand.vmem [shape: bf16[2,16,128], index: 0, kind: input, shape index: {}]   ;;  %s498_s1 = inlined_call_operand.vmem [shape: f32[1,128], index: 1, kind: input, shape index: {}]   ;;  %s499_s2 = inlined_call_operand.vmem [shape: f32[1,128], index: 2, kind: input, shape index: {}]   ;;  %s500_s3 = inlined_call_operand.hbm [shape: f32[2,16,128], index: 3, kind: output, shape index: {}]  }
   0x1   :  { %10 = vsyncpa [#allocation3 + $0x1], 0  ;;  %s412_s12 = smov 0   ;;  %s414_s13 = smov 0  }
   0x2   :  { %s416_s14 = smov 0   ;;  %s418_s15 = smov 0  }
   0x3 LB: > { %s264_s16 = sadd.s32 4294967295, %s388_s15   ;;  %s265_s17 = sadd.s32 4294967294, %s388_s15   ;;  %s388_s15 = sphi %s418_s15, %s506_s15   ;;  %s384_s14 = sphi %s416_s14, %s505_s14   ;;  %s380_s13 = sphi %s414_s13, %s504_s13   ;;  %s376_s12 = sphi %s412_s12, %s503_s12  }
   0x4   : > { %s435_s18 = sadd.s32 1, %s388_s15   ;;  %s91_s19 = sadd.s32 1, %s384_s14 }
   0x5   : > { %s88_s20 = ssub.s32 %s388_s15, %s435_s18  ;;  %p101_p0 = scmp.ne.s32.totalorder %s384_s14, %s380_s13 }
   0x6   : > { %p89_p1 = scmp.eq.s32.totalorder %s88_s20, 0  ;;  %p102_p2 = scmp.eq.s32.totalorder %s264_s16, 1 }
   0x7   : > { %p107_p3 = scmp.ne.s32.totalorder %s380_s13, %s376_s12  ;;  %p108_p4 = scmp.eq.s32.totalorder %s265_s17, 1 }
   0x8   : > { %s445_s21 = scalar_select %p89_p1, %s384_s14, %s91_s19  }
   0x9   : > { %p447_p5 = por %p102_p2, %p101_p0  ;;  %p451_p6 = por %p108_p4, %p107_p3 }
   0xa   : > { %p268_p7 = scmp.ge.s32.totalorder %s388_s15, 1  ;;  %p140_p8 = scmp.lt.s32.totalorder %s388_s15, 3 }
   0xc   : > { %p141_p9 = pnand %p268_p7, %p140_p8 }
   0xd   : > { %s161_s24 = sand.u32 (!%p141_p9), 1, %s380_s13   ;;  %p164_p10 = scmp.lt.s32.totalorder (!%p141_p9), %s264_s16, 1 }
   0xe   : > { %144 = sbr.rel (%p141_p9) target bundleno = 34 (0x22), region = 32  ;;  %s269_s25 = sshll.u32 (!%p141_p9), %s161_s24, 4 }
   0xf   : > { %s278_s26 = sshll.u32 (!%p141_p9), %s264_s16, 4  ;;  %s163_s11 = scalar_lea.vmem (!%p141_p9), [#allocation2], %s269_s25 }
  0x10   : > { %s199_s8 = scalar_lea.hbm (!%p141_p9), %s500_s3, %s278_s26  ;;  %s188_s19 = scalar_lea.sflag (!%p141_p9), [#allocation3], %s161_s24 }
  0x11   : > { %s202_s17 = sshll.u32 (!%p141_p9), %s199_s8, 4  ;;  %s346_s28 = scalar_lea.hbm (!%p141_p9), %s500_s3, 32  ;;  %s203_s17 = int_to_ptr.hbm [resolvable:$true] %s202_s17 }
  0x12   : > { %s340_s20 = sshra.s32 (!%p141_p9), %s203_s17, 4  ;;  %s341_s20 = int_to_ptr.hbm [resolvable:$true] %s340_s20 }
  0x13   : > { %s508_s16 = smov (!%p164_p10, %s264_s16), 1  ;;  %v324_v0 = vld [vmem:[%s498_s1] ss:$0 sm:$0xff]  ;;  %s342_s26 = scalar_lea.hbm %s341_s20, 16 }
  0x14   : > { %s277_s27 = sshll.u32 %s508_s16, 3  ;;  %v325_v3 = vld [vmem:[%s499_s2] ss:$0 sm:$0xff]  ;;  %s200_s16 = sshll.u32 %s163_s11, 4  ;;  %s201_s16 = int_to_ptr.vmem [resolvable:$true] %s200_s16 }
  0x15   : > { %s168_s30 = scalar_lea.vmem %s497_s0, %s277_s27  ;;  %p343_p11 = scmp.ne.s32.totalorder %s341_s20, %s342_s26 }
  0x16   : > { %v280_v1 = vld [vmem:[%s168_s30] sm:$0xff]   ;;  %p347_p0 = scmp.lt.s32.totalorder %s341_s20, %s500_s3  ;;  %p348_p1 = scmp.lt.s32.totalorder %s346_s28, %s342_s26 }
  0x17   : > { %v281_v2 = vunpack.c.l.bf16 %v280_v1  ;;  %v282_v4 = vunpack.c.h.bf16 %v280_v1  ;;  %p344_p12 = pnand %p343_p11, %p447_p5 }
  0x18   : > { %p349_p2 = por %p348_p1, %p347_p0 }
  0x19   : > { %v177_v5 = vmul.f32 %v324_v0, %v281_v2  ;;  %v178_v6 = vmul.f32 %v324_v0, %v282_v4  ;;  %p345_p13 = pneg %p344_p12 }
  0x1b   : > { %v183_v7 = vadd.f32 %v325_v3, %v177_v5  ;;  %v184_v8 = vadd.f32 %v325_v3, %v178_v6  ;;  %p350_p3 = pnand %p349_p2, %p345_p13 }
  0x1d   : > { %185 = vst [vmem:[%s163_s11] sm:$0xff] %v183_v7 }
  0x1e   : > { %186 = vst [vmem:[%s163_s11 + $0x8] sm:$0xff] %v184_v8 }
  0x1f   : > { %353 = shalt.err (!%p350_p3)
}
  0x20   : > { %s390_s24 = smov 128   ;;  %s391_s4 = smov 8  }
  0x21   : > { %283 = dma.vmem_to_hbm [thread:$0]  (%p447_p5), %s201_s16, 256, %s203_s17, %s188_s19, %s390_s24, %s390_s24, %s391_s4  }
  0x22 PF: > { %p289_p4 = scmp.ge.s32.totalorder %s388_s15, 2  ;;  %s217_s5 = sand.u32 1, %s376_s12  }
  0x23   : > { %s218_s6 = scalar_lea.sflag [#allocation3], %s217_s5 }
  0x24   : > { %p286_p7 = pnand %p289_p4, %p451_p6 }
  0x26   : > { %p287_p8 = pneg %p286_p7 }
  0x28   : > { %371 = dma.done.wait (%p287_p8), %s218_s6, 256  }
  0x29   : > { %373 = vsyncadd (%p287_p8), %s218_s6, 4294967040  ;;  %p13_p9 = scmp.ge.s32.totalorder %s435_s18, 4   ;;  %s503_s12 = smov %s380_s13 }
  0x2a   : > { %s504_s13 = smov %s384_s14  ;;  %s505_s14 = smov %s445_s21 }
  0x2b   : > { %s506_s15 = smov %s435_s18  ;;  %15 = sbr.rel (!%p13_p9) target bundleno = 3 (0x3), region = 67 }
  0x30   :  { %224 = vsyncpa [#allocation3], 1 }
  0x31   :  { %226 = vsyncpa [#allocation3 + $0x1], 1 }

// kernel: stem_forward.7
= control target key start
LH: loop header
LB: loop body
LE: loop exit
PB: predicated region body
PF: predicated region fallthrough
CT: control target
= control target key end

     0   :  { %s2940_s18 = smov 0   ;;  %s3580_s0 = inlined_call_operand.vmem [shape: bf16[2,8,8,128], index: 0, kind: input, shape index: {}]   ;;  %s3581_s1 = inlined_call_operand.vmem [shape: f32[1,128], index: 1, kind: input, shape index: {}]   ;;  %s3582_s2 = inlined_call_operand.vmem [shape: f32[1,128], index: 2, kind: input, shape index: {}]   ;;  %s3583_s3 = inlined_call_operand.vmem [shape: bf16[9,128,128], index: 3, kind: input, shape index: {}]   ;;  %s3584_s4 = inlined_call_operand.vmem [shape: bf16[2,64,128], index: 4, kind: output, shape index: {0}]   ;;  %s3585_s5 = inlined_call_operand.vmem [shape: f32[2,8,128], index: 5, kind: output, shape index: {1}]  }
   0x1 LB: > { %s2246_s19 = sadd.s32 4294967295, %s2907_s18   ;;  %p2250_p0 = scmp.ge.s32.totalorder %s2907_s18, 1  ;;  %s2907_s18 = sphi %s2940_s18, %s16_s18  }
   0x2   : > { %p190_p1 = scmp.lt.s32.totalorder %s2907_s18, 3 }
   0x4   : > { %p191_p2 = pnand %p2250_p0, %p190_p1 }
   0x5   : > { %p222_p3 = scmp.lt.s32.totalorder (!%p191_p2), %s2246_s19, 1 }
   0x6   : > { %194 = sbr.rel (%p191_p2) target bundleno = 391 (0x187), region = 36 }
   0xb   : > { %v2767_v0 = vld [vmem:[%s3583_s3 + $0x78] sm:$0xff]  ;;  %v2909_v2 = vmov 0   ;;  %v2766_v3 = vld [vmem:[%s3583_s3 + $0x70] sm:$0xff]  ;;  %s3595_s19 = smov (!%p222_p3, %s2246_s19), 1  ;;  %v2765_v6 = vld [vmem:[%s3583_s3 + $0x68] sm:$0xff]  ;;  %vm394_vm0 = vcmask 1043456  }
   0xc   : > { %v2775_v1 = vld [vmem:[%s3583_s3 + $0xb8] sm:$0xff]  ;;  %301 = vst [vmem:[#allocation2 + $0x20] sm:$0xf] %v2909_v2  ;;  %2874 = vmatpush.bf16.msra.mxu1 %v2767_v0  ;;  %676 = vmatpush.bf16.msra.mxu0 %v2767_v0  ;;  %v2774_v4 = vld [vmem:[%s3583_s3 + $0xb0] sm:$0xff]  ;;  %s2746_s30 = sshll.u32 %s3595_s19, 5  ;;  %v2773_v10 = vld [vmem:[%s3583_s3 + $0xa8] sm:$0xff] }
   0xd   : > { %302 = vst [vmem:[#allocation2 + $0x24] sm:$0x1] %v2909_v2  ;;  %946 = vmatpush.bf16.msra.mxu2 %v2775_v1  ;;  %v2787_v5 = vld [vmem:[%s3583_s3 + $0xf8] sm:$0xff]  ;;  %v2786_v7 = vld [vmem:[%s3583_s3 + $0xf0] sm:$0xff]  ;;  %s226_s12 = scalar_lea.vmem %s3580_s0, %s2746_s30  ;;  %v2987_v13 = vld [vmem:[%s3581_s1] ss:$0 sm:$0xff]  ;;  %s3548_s17 = scalar_lea.vmem %s3584_s4, %s2746_s30 }
   0xe   : > { %303 = vst [vmem:[#allocation2 + $0x28] sm:$0xf] %v2909_v2  ;;  %1080 = vmatpush.bf16.msra.mxu3 %v2787_v5  ;;  %v2868_v8 = vld [vmem:[%s226_s12 + $0x8] sm:$0xff]   ;;  %v2869_v9 = vld [vmem:[%s226_s12 + $0x10] sm:$0xff]   ;;  %v2992_v14 = vld [vmem:[%s3582_s2] ss:$0 sm:$0xff] }
   0xf   : > { %304 = vst [vmem:[#allocation2 + $0x2c] sm:$0x1] %v2909_v2  ;;  %v2839_v11 = vunpack.c.h.bf16 %v2868_v8  ;;  %v2842_v12 = vunpack.c.l.bf16 %v2869_v9  ;;  %v2843_v15 = vunpack.c.h.bf16 %v2869_v9  ;;  %v2838_v16 = vunpack.c.l.bf16 %v2868_v8  ;;  %v2785_v17 = vld [vmem:[%s3583_s3 + $0xe8] sm:$0xff]  ;;  %v3001_v20 = vld [vmem:[%s226_s12] sm:$0xff]   ;;  %v3008_v23 = vld [vmem:[%s226_s12 + $0x18] sm:$0xff]   ;;  %s2255_s30 = sshll.u32 %s3595_s19, 3 }
  0x10   : > { %2875 = vmatpush.bf16.msra.mxu1 %v2766_v3  ;;  %677 = vmatpush.bf16.msra.mxu0 %v2766_v3  ;;  %293 = vst [vmem:[#allocation2] sm:$0xf] %v2909_v2  ;;  %v2764_v21 = vld [vmem:[%s3583_s3 + $0x60] sm:$0xff]  ;;  %v2834_v22 = vunpack.c.l.bf16 %v3001_v20  ;;  %v2846_v29 = vunpack.c.l.bf16 %v3008_v23  ;;  %vm400_vm1 = vcmask 1040384   ;;  %vm395_vm2 = vsmask.f32 7938  ;;  %s235_s22 = scalar_lea.vmem %s3585_s5, %s2255_s30 }
  0x11   : > { %947 = vmatpush.bf16.msra.mxu2 %v2774_v4  ;;  %v261_v18 = vmul.f32 %v2987_v13, %v2839_v11  ;;  %v262_v19 = vmul.f32 %v2987_v13, %v2842_v12  ;;  %294 = vst [vmem:[#allocation2 + $0x4] sm:$0x1] %v2909_v2  ;;  %v263_v24 = vmul.f32 %v2987_v13, %v2843_v15  ;;  %v2772_v26 = vld [vmem:[%s3583_s3 + $0xa0] sm:$0xff]  ;;  %v2763_v33 = vld [vmem:[%s3583_s3 + $0x58] sm:$0xff]  ;;  %vm401_vm3 = vsmask.f32 256  ;;  %vm3055_vm7 = vmand %vm394_vm0, %vm395_vm2 }
  0x12   : > { %1081 = vmatpush.bf16.msra.mxu3 %v2786_v7  ;;  %295 = vst [vmem:[#allocation2 + $0x8] sm:$0xf] %v2909_v2  ;;  %v260_v25 = vmul.f32 %v2987_v13, %v2838_v16  ;;  %v258_v30 = vmul.f32 %v2987_v13, %v2834_v22  ;;  %v2771_v37 = vld [vmem:[%s3583_s3 + $0x98] sm:$0xff]  ;;  %v2784_v40 = vld [vmem:[%s3583_s3 + $0xe0] sm:$0xff]  ;;  %v264_v41 = vmul.f32 %v2987_v13, %v2846_v29  ;;  %v2835_v42 = vunpack.c.h.bf16 %v3001_v20  ;;  %v2762_v43 = vld [vmem:[%s3583_s3 + $0x50] sm:$0xff] }
  0x13   : > { %v272_v27 = vadd.f32 %v2992_v14, %v261_v18  ;;  %v273_v28 = vadd.f32 %v2992_v14, %v262_v19  ;;  %296 = vst [vmem:[#allocation2 + $0xc] sm:$0x1] %v2909_v2  ;;  %v3028_v35 = vadd.f32 %v2992_v14, %v263_v24  ;;  %v2770_v50 = vld [vmem:[%s3583_s3 + $0x90] sm:$0xff]  ;;  %v418_v51 = vld [vmem:[#allocation2 + $0x20] sm:$0xf]  ;;  %vm830_vm6 = vcmask 1042432   ;;  %vm3068_vm8 = vmand %vm400_vm1, %vm401_vm3 }
  0x14   : > { %2876 = vmatpush.bf16.msra.mxu1 %v2765_v6  ;;  %678 = vmatpush.bf16.msra.mxu0 %v2765_v6  ;;  %297 = vst [vmem:[#allocation2 + $0x10] sm:$0xf] %v2909_v2  ;;  %v269_v34 = vadd.f32 %v2992_v14, %v258_v30  ;;  %v3031_v36 = vadd.f32 %v2992_v14, %v260_v25  ;;  %v421_v52 = vld [vmem:[#allocation2 + $0x24] sm:$0x1]  ;;  %vm480_vm4 = vsmask.f32 3328 }
  0x15   : > { %948 = vmatpush.bf16.msra.mxu2 %v2773_v10  ;;  %v280_v31 = vmax.f32 %v272_v27, 0.0  ;;  %v281_v32 = vmax.f32 %v273_v28, 0.0  ;;  %298 = vst [vmem:[#allocation2 + $0x14] sm:$0x1] %v2909_v2  ;;  %v424_v53 = vld [vmem:[#allocation2 + $0x28] sm:$0xf]  ;;  %v3063_v62 = vadd.f32 %v2992_v14, %v264_v41  ;;  %v259_v63 = vmul.f32 %v2987_v13, %v2835_v42 }
  0x16   : > { %1082 = vmatpush.bf16.msra.mxu3 %v2785_v17  ;;  %299 = vst [vmem:[#allocation2 + $0x18] sm:$0xf] %v2909_v2  ;;  %v277_v44 = vmax.f32 %v269_v34, 0.0  ;;  %vm481_vm5 = vsmask.f32 7440  ;;  %v282_v55 = vmax.f32 %v3028_v35, 0.0 }
  0x17   : > { %v288_v38 = vpack.c.bf16 %v280_v31, %v280_v31  ;;  %v289_v39 = vpack.c.bf16 %v281_v32, %v281_v32  ;;  %300 = vst [vmem:[#allocation2 + $0x1c] sm:$0x1] %v2909_v2  ;;  %v448_v45 = vld [vmem:[#allocation2] sm:$0xf]  ;;  %v279_v56 = vmax.f32 %v3031_v36, 0.0  ;;  %v2761_v6 = vld [vmem:[%s3583_s3 + $0x48] sm:$0xff]  ;;  %v270_v34 = vadd.f32 %v2992_v14, %v259_v63  ;;  %vm3136_vm11 = vmor %vm480_vm4, %vm481_vm5 }
  0x18   : > { %2877 = vmatpush.bf16.msra.mxu1 %v2764_v21  ;;  %679 = vmatpush.bf16.msra.mxu0 %v2764_v21  ;;  %305 = vst [vmem:[#allocation2 + $0x30] sm:$0xf] %v2909_v2  ;;  %v285_v54 = vpack.c.bf16 %v277_v44, %v277_v44  ;;  %v427_v60 = vld [vmem:[#allocation2 + $0x2c] sm:$0x1]  ;;  %v3060_v61 = vld [vmem:[#allocation2 + $0x4] sm:$0x1]  ;;  %v290_v25 = vpack.c.bf16 %v282_v55, %v282_v55 }
  0x19   : > { %949 = vmatpush.bf16.msra.mxu2 %v2772_v26  ;;  %v338_v46 = vshrl.u32 %v288_v38, 16  ;;  %v341_v47 = vshll.u32 %v288_v38, 16  ;;  %v346_v48 = vshrl.u32 %v289_v39, 16  ;;  %v349_v49 = vshll.u32 %v289_v39, 16  ;;  %306 = vst [vmem:[#allocation2 + $0x34] sm:$0x1] %v2909_v2 }
  0x1a   : > { %1083 = vmatpush.bf16.msra.mxu3 %v2784_v40  ;;  %307 = vst [vmem:[#allocation2 + $0x38] sm:$0xf] %v2909_v2  ;;  %v314_v1 = vshrl.u32 %v285_v54, 16  ;;  %v317_v3 = vshll.u32 %v285_v54, 16  ;;  %v484_v4 = vshrl.u32 %v448_v45, 16  ;;  %v487_v5 = vshll.u32 %v448_v45, 16 }
  0x1b   : > { %v340_v57 = vrot.slane %v338_v46, 7  ;;  %v348_v58 = vrot.slane %v346_v48, 7  ;;  %308 = vst [vmem:[#allocation2 + $0x3c] sm:$0x1] %v2909_v2  ;;  %v2783_v11 = vld [vmem:[%s3583_s3 + $0xd8] sm:$0xff]  ;;  %v493_v17 = vshll.u32 %v3060_v61, 16 }
  0x1c   : > { %2878 = vmatpush.bf16.msra.mxu1 %v2763_v33  ;;  %680 = vmatpush.bf16.msra.mxu0 %v2763_v33  ;;  %309 = vst [vmem:[#allocation2 + $0x40] sm:$0xf] %v2909_v2  ;;  %v316_v12 = vrot.slane %v314_v1, 7  ;;  %v486_v15 = vrot.slane %v484_v4, 4  ;;  %v489_v16 = vrot.slane %v487_v5, 5  ;;  %v2769_v21 = vld [vmem:[%s3583_s3 + $0x88] sm:$0xff] }
  0x1d   : > { %950 = vmatpush.bf16.msra.mxu2 %v2771_v37  ;;  %v343_v7 = vor.u32 %v341_v47, %v340_v57  ;;  %v344_v8 = vrot.slane %v340_v57, 4  ;;  %v351_v9 = vor.u32 %v349_v49, %v348_v58  ;;  %v352_v10 = vrot.slane %v348_v58, 4  ;;  %310 = vst [vmem:[#allocation2 + $0x44] sm:$0x1] %v2909_v2  ;;  %v397_v22 = vld [vmem:[#allocation2 + $0x8] sm:$0xf] }
  0x1e   : > { %311 = vst [vmem:[#allocation2 + $0x48] sm:$0xf] %v2909_v2  ;;  %v806_v24 = vld [vmem:[#allocation2] sm:$0xe]  ;;  %v319_v27 = vor.u32 %v317_v3, %v316_v12  ;;  %v320_v28 = vrot.slane %v316_v12, 4  ;;  %v490_v30 = vor.u32 %v489_v16, %v486_v15  ;;  %1084 = vmatpush.bf16.msra.mxu3 %v2783_v11  ;;  %v2782_v31 = vld [vmem:[%s3583_s3 + $0xd0] sm:$0xff]  ;;  %v3125_v47 = vpack.c.bf16 %v279_v56, %v279_v56 }
  0x1f   : > { %v419_v18 = vsel %vm3055_vm7, %v343_v7, %v418_v51  ;;  %v422_v19 = vsel %vm3068_vm8, %v344_v8, %v421_v52  ;;  %v425_v20 = vsel %vm3055_vm7, %v351_v9, %v424_v53  ;;  %v428_v26 = vsel %vm3068_vm8, %v352_v10, %v427_v60  ;;  %v403_v29 = vld [vmem:[#allocation2 + $0xc] sm:$0x1]  ;;  %v2760_v35 = vld [vmem:[%s3583_s3 + $0x40] sm:$0xff]  ;;  %v2759_v41 = vld [vmem:[%s3583_s3 + $0x38] sm:$0xff]  ;;  %312 = vst [vmem:[#allocation2 + $0x4c] sm:$0x1] %v2909_v2 }
  0x20   : > { %2879 = vmatpush.bf16.msra.mxu1 %v2762_v43  ;;  %681 = vmatpush.bf16.msra.mxu0 %v2762_v43  ;;  %420 = vst [vmem:[#allocation2 + $0x20] sm:$0xf] %v419_v18  ;;  %v3096_v32 = vrot.slane %v493_v17, 5  ;;  %vm831_vm9 = vcmask 1046532   ;;  %v2352_v33 = vrot.slane %v806_v24, 9  ;;  %v398_v37 = vsel %vm3055_vm7, %v319_v27, %v397_v22  ;;  %v2768_v42 = vld [vmem:[%s3583_s3 + $0x80] sm:$0xff] }
  0x21   : > { %951 = vmatpush.bf16.msra.mxu2 %v2770_v50  ;;  %423 = vst [vmem:[#allocation2 + $0x24] sm:$0x1] %v422_v19  ;;  %v3104_v38 = vrot.slane %v490_v30, 4  ;;  %v835_v39 = vrot.slane %v3060_v61, 5  ;;  %v283_v40 = vmax.f32 %v3063_v62, 0.0  ;;  %v404_v43 = vsel %vm3068_vm8, %v320_v28, %v403_v29  ;;  %vm3118_vm10 = vmor %vm830_vm6, %vm831_vm9  ;;  %v2795_v48 = vld [vmem:[%s3583_s3 + $0x138] sm:$0xff] }
  0x22   : > { %426 = vst [vmem:[#allocation2 + $0x28] sm:$0xf] %v425_v20  ;;  %v354_v45 = vshrl.u32 %v290_v25, 16  ;;  %v357_v46 = vshll.u32 %v290_v25, 16  ;;  %1085 = vmatpush.bf16.msra.mxu3 %v2782_v31  ;;  %v2781_v49 = vld [vmem:[%s3583_s3 + $0xc8] sm:$0xff]  ;;  %v2758_v2 = vld [vmem:[%s3583_s3 + $0x30] sm:$0xff] }
  0x23   : > { %429 = vst [vmem:[#allocation2 + $0x2c] sm:$0x1] %v428_v26  ;;  %v291_v50 = vpack.c.bf16 %v283_v40, %v283_v40  ;;  %v430_v52 = vld [vmem:[#allocation2 + $0x30] sm:$0xf]  ;;  %v278_v53 = vmax.f32 %v270_v34, 0.0  ;;  %v496_v54 = vsel %vm3136_vm11, %v3104_v38, %v3096_v32  ;;  %v3149_v55 = vsel %vm3118_vm10, %v2352_v33, %v835_v39  ;;  %v2815_v1 = vld [vmem:[%s3583_s3 + $0x1b8] sm:$0xff] }
  0x24   : > { %2880 = vmatpush.bf16.msra.mxu1 %v2761_v6  ;;  %682 = vmatpush.bf16.msra.mxu0 %v2761_v6  ;;  %399 = vst [vmem:[#allocation2 + $0x8] sm:$0xf] %v398_v37  ;;  %v356_v36 = vrot.slane %v354_v45, 7  ;;  %v2794_v56 = vld [vmem:[%s3583_s3 + $0x130] sm:$0xff]  ;;  %v2780_v3 = vld [vmem:[%s3583_s3 + $0xc0] sm:$0xff]  ;;  %v330_v5 = vshrl.u32 %v3125_v47, 16  ;;  %v882_v40 = vunpack.c.l.b16 %v3149_v55 }
  0x25   : > { %952 = vmatpush.bf16.msra.mxu2 %v2769_v21  ;;  %405 = vst [vmem:[#allocation2 + $0xc] sm:$0x1] %v404_v43  ;;  %v362_v57 = vshrl.u32 %v291_v50, 16  ;;  %v365_v58 = vshll.u32 %v291_v50, 16  ;;  %v433_v60 = vld [vmem:[#allocation2 + $0x34] sm:$0x1]  ;;  %v3160_v4 = vpack.c.bf16 %v278_v53, %v278_v53 }
  0x26   : > { %v359_v62 = vor.u32 %v357_v46, %v356_v36  ;;  %v360_v63 = vrot.slane %v356_v36, 4  ;;  %1086 = vmatpush.bf16.msra.mxu3 %v2781_v49  ;;  %v333_v10 = vshll.u32 %v3125_v47, 16  ;;  %v2757_v15 = vld [vmem:[%s3583_s3 + $0x28] sm:$0xff]  ;;  %v436_v25 = vld [vmem:[#allocation2 + $0x38] sm:$0xf]  ;;  %v2756_v53 = vld [vmem:[%s3583_s3 + $0x20] sm:$0xff] }
  0x27   : > { %v452_v61 = vld [vmem:[#allocation2 + $0x20] sm:$0xf]  ;;  %v364_v9 = vrot.slane %v362_v57, 7  ;;  %v322_v18 = vshrl.u32 %v3160_v4, 16  ;;  %v439_v26 = vld [vmem:[#allocation2 + $0x3c] sm:$0x1] }
  0x28   : > { %2881 = vmatpush.bf16.msra.mxu1 %v2760_v35  ;;  %683 = vmatpush.bf16.msra.mxu0 %v2760_v35  ;;  %v3163_v6 = vld [vmem:[#allocation2 + $0x24] sm:$0x1]  ;;  %v540_v7 = vshrl.u32 %v452_v61, 16  ;;  %v543_v8 = vshll.u32 %v452_v61, 16  ;;  %v431_v16 = vsel %vm3055_vm7, %v359_v62, %v430_v52  ;;  %v434_v17 = vsel %vm3068_vm8, %v360_v63, %v433_v60  ;;  %v2793_v29 = vld [vmem:[%s3583_s3 + $0x128] sm:$0xff]  ;;  %v2814_v32 = vld [vmem:[%s3583_s3 + $0x1b0] sm:$0xff] }
  0x29   : > { %953 = vmatpush.bf16.msra.mxu2 %v2768_v42  ;;  %v453_v11 = vld [vmem:[#allocation2 + $0x28] sm:$0xf]  ;;  %v549_v12 = vshll.u32 %v3163_v6, 16  ;;  %v367_v30 = vor.u32 %v365_v58, %v364_v9  ;;  %v368_v31 = vrot.slane %v364_v9, 4  ;;  %432 = vst [vmem:[#allocation2 + $0x30] sm:$0xf] %v431_v16 }
  0x2a   : > { %v3175_v19 = vld [vmem:[#allocation2 + $0x2c] sm:$0x1]  ;;  %v542_v20 = vrot.slane %v540_v7, 4  ;;  %v545_v21 = vrot.slane %v543_v8, 5  ;;  %v554_v22 = vshrl.u32 %v453_v11, 16  ;;  %v557_v24 = vshll.u32 %v453_v11, 16  ;;  %1087 = vmatpush.bf16.msra.mxu3 %v2780_v3 }
  0x2b   : > { %v551_v27 = vrot.slane %v549_v12, 5  ;;  %v563_v28 = vshll.u32 %v3175_v19, 16  ;;  %v449_v37 = vld [vmem:[#allocation2 + $0x8] sm:$0xf]  ;;  %435 = vst [vmem:[#allocation2 + $0x34] sm:$0x1] %v434_v17  ;;  %v437_v55 = vsel %vm3055_vm7, %v367_v30, %v436_v25  ;;  %v612_v11 = vunpack.c.l.b16 %v496_v54 }
  0x2c   : > { %777 = vmatpush.bf16.msrb.mxu1 %v2759_v41  ;;  %1326 = vmatpush.bf16.msrb.mxu0 %v2795_v48  ;;  %v546_v33 = vor.u32 %v545_v21, %v542_v20  ;;  %v556_v34 = vrot.slane %v554_v22, 4  ;;  %v559_v35 = vrot.slane %v557_v24, 5  ;;  %v807_v39 = vld [vmem:[#allocation2 + $0x8] sm:$0xe]  ;;  %v473_v42 = vld [vmem:[#allocation2 + $0xc] sm:$0x1] }
  0x2d   : > { %1635 = vmatpush.bf16.msrb.mxu2 %v2815_v1  ;;  %v565_v41 = vrot.slane %v563_v28, 5  ;;  %v498_v43 = vshrl.u32 %v449_v37, 16  ;;  %v501_v45 = vshll.u32 %v449_v37, 16  ;;  %v2353_v46 = vrot.slane %v807_v39, 9  ;;  %438 = vst [vmem:[#allocation2 + $0x38] sm:$0xf] %v437_v55 }
  0x2e   : > { %v547_v48 = vrot.slane %v546_v33, 4  ;;  %v560_v49 = vor.u32 %v559_v35, %v556_v34  ;;  %v507_v50 = vshll.u32 %v473_v42, 16  ;;  %v2792_v62 = vld [vmem:[%s3583_s3 + $0x120] sm:$0xff]  ;;  %v324_v7 = vrot.slane %v322_v18, 7  ;;  %v406_v8 = vld [vmem:[#allocation2 + $0x10] sm:$0xf] }
  0x2f   : > { %v500_v36 = vrot.slane %v498_v43, 4  ;;  %v503_v52 = vrot.slane %v501_v45, 5  ;;  %v332_v16 = vrot.slane %v330_v5, 7  ;;  %v409_v17 = vld [vmem:[#allocation2 + $0x14] sm:$0x1]  ;;  %v2755_v24 = vld [vmem:[%s3583_s3 + $0x18] sm:$0xff] }
  0x30   : > { %778 = vmatpush.bf16.msrb.mxu1 %v2758_v2  ;;  %1327 = vmatpush.bf16.msrb.mxu0 %v2794_v56  ;;  %v839_v2 = vrot.slane %v473_v42, 5  ;;  %v440_v56 = vsel %vm3068_vm8, %v368_v31, %v439_v26  ;;  %v552_v57 = vsel %vm3136_vm11, %v547_v48, %v551_v27  ;;  %v561_v58 = vrot.slane %v560_v49, 4  ;;  %v454_v12 = vld [vmem:[#allocation2 + $0x30] sm:$0xf]  ;;  %v412_v25 = vld [vmem:[#allocation2 + $0x18] sm:$0xf] }
  0x31   : > { %v509_v60 = vrot.slane %v507_v50, 5  ;;  %v616_v63 = vunpack.c.l.b16 %v552_v57  ;;  %v504_v1 = vor.u32 %v503_v52, %v500_v36  ;;  %441 = vst [vmem:[#allocation2 + $0x3c] sm:$0x1] %v440_v56  ;;  %v568_v22 = vshrl.u32 %v454_v12, 16  ;;  %v415_v26 = vld [vmem:[#allocation2 + $0x1c] sm:$0x1]  ;;  %1636 = vmatpush.bf16.msrb.mxu2 %v2814_v32 }
  0x32   : > { %v840_v61 = vsel %vm3118_vm10, %v2353_v46, %v839_v2  ;;  %v566_v9 = vsel %vm3136_vm11, %v561_v58, %v565_v41  ;;  %v571_v38 = vshll.u32 %v454_v12, 16  ;;  %v335_v5 = vor.u32 %v333_v10, %v332_v16  ;;  %v2791_v27 = vld [vmem:[%s3583_s3 + $0x118] sm:$0xff]  ;;  %v3222_v31 = vld [vmem:[#allocation2 + $0x34] sm:$0x1]  ;;  %v2813_v45 = vld [vmem:[%s3583_s3 + $0x1a8] sm:$0xff] }
  0x33   : > { %v883_v3 = vunpack.c.l.b16 %v840_v61  ;;  %v617_v20 = vunpack.c.l.b16 %v566_v9  ;;  %v505_v21 = vrot.slane %v504_v1, 4  ;;  %v2823_v28 = vld [vmem:[%s3583_s3 + $0x1f8] sm:$0xff]  ;;  %v570_v33 = vrot.slane %v568_v22, 4  ;;  %v3239_v46 = vld [vmem:[#allocation2 + $0x8] sm:$0xf]  ;;  %v2790_v36 = vld [vmem:[%s3583_s3 + $0x110] sm:$0xff] }
  0x34   : > { %779 = vmatpush.bf16.msrb.mxu1 %v2757_v15  ;;  %1328 = vmatpush.bf16.msrb.mxu0 %v2793_v29  ;;  %v325_v15 = vshll.u32 %v3160_v4, 16  ;;  %v328_v4 = vrot.slane %v324_v7, 4  ;;  %v336_v34 = vrot.slane %v332_v16, 4  ;;  %v573_v10 = vrot.slane %v571_v38, 5  ;;  %v455_v39 = vld [vmem:[#allocation2 + $0x38] sm:$0xf] }
  0x35   : > { %v890_v18 = vpack.c.b16 %v883_v3, %v882_v40  ;;  %v622_v29 = vpack.c.b16 %v617_v20, %v616_v63  ;;  %v510_v30 = vsel %vm3136_vm11, %v505_v21, %v509_v60  ;;  %v577_v35 = vshll.u32 %v3222_v31, 16  ;;  %1881 = vmatpush.bf16.msrb.mxu3 %v2823_v28  ;;  %v2754_v40 = vld [vmem:[%s3583_s3 + $0x10] sm:$0xff]  ;;  %1637 = vmatpush.bf16.msrb.mxu2 %v2813_v45  ;;  %v2426_v60 = vld [vmem:[#allocation2 + $0x8] sm:$0xf]  ;;  %v2788_v16 = vld [vmem:[%s3583_s3 + $0x100] sm:$0xff] }
  0x36   : > { %v327_v54 = vor.u32 %v325_v15, %v324_v7  ;;  %v613_v47 = vunpack.c.l.b16 %v510_v30  ;;  %v410_v41 = vsel %vm3068_vm8, %v328_v4, %v409_v17  ;;  %v413_v42 = vsel %vm3055_vm7, %v335_v5, %v412_v25  ;;  %v2753_v61 = vld [vmem:[%s3583_s3 + $0x8] sm:$0xff]  ;;  %v2752_v15 = vld [vmem:[%s3583_s3] sm:$0xff]  ;;  %v2803_v30 = vld [vmem:[%s3583_s3 + $0x178] sm:$0xff] }
  0x37   : > { %954 = vmatmul.bf16.vlgmr.msra.gmra.mxu2 %v890_v18  ;;  %694 = vmatmul.bf16.vlgmr.msra.gmra.mxu1 %v622_v29  ;;  %v416_v43 = vsel %vm3068_vm8, %v336_v34, %v415_v26  ;;  %v574_v50 = vor.u32 %v573_v10, %v570_v33  ;;  %v582_v2 = vshrl.u32 %v455_v39, 16  ;;  %411 = vst [vmem:[#allocation2 + $0x14] sm:$0x1] %v410_v41  ;;  %v579_v52 = vrot.slane %v577_v35, 5  ;;  %v2812_v35 = vld [vmem:[%s3583_s3 + $0x1a0] sm:$0xff] }
  0x38   : > { %780 = vmatpush.bf16.msrb.mxu1 %v2756_v53  ;;  %1329 = vmatpush.bf16.msrb.mxu0 %v2792_v62  ;;  %v407_v37 = vsel %vm3055_vm7, %v327_v54, %v406_v8  ;;  %v620_v48 = vpack.c.b16 %v613_v47, %v612_v11  ;;  %v3241_v49 = vld [vmem:[#allocation2 + $0x3c] sm:$0x1]  ;;  %v585_v53 = vshll.u32 %v455_v39, 16  ;;  %414 = vst [vmem:[#allocation2 + $0x18] sm:$0xf] %v413_v42  ;;  %v2789_v62 = vld [vmem:[%s3583_s3 + $0x108] sm:$0xff] }
  0x39   : > { %408 = vst [vmem:[#allocation2 + $0x10] sm:$0xf] %v407_v37  ;;  %v591_v55 = vshll.u32 %v3241_v49, 16  ;;  %v575_v56 = vrot.slane %v574_v50, 4  ;;  %v584_v57 = vrot.slane %v582_v2, 4  ;;  %v1134_v63 = vshrl.u32 %v3239_v46, 16  ;;  %1638 = vmatpush.bf16.msrb.mxu2 %v2812_v35 }
  0x3a   : > { %684 = vmatmul.bf16.vlgmr.msra.gmra.mxu0 %v620_v48  ;;  %417 = vst [vmem:[#allocation2 + $0x1c] sm:$0x1] %v416_v43  ;;  %v587_v58 = vrot.slane %v585_v53, 5  ;;  %v1137_v8 = vshll.u32 %v3239_v46, 16  ;;  %v2821_v42 = vld [vmem:[%s3583_s3 + $0x1e8] sm:$0xff]  ;;  %v2802_v53 = vld [vmem:[%s3583_s3 + $0x170] sm:$0xff] }
  0x3b   : > { %v580_v1 = vsel %vm3136_vm11, %v575_v56, %v579_v52  ;;  %v593_v7 = vrot.slane %v591_v55, 5  ;;  %v2800_v35 = vld [vmem:[%s3583_s3 + $0x160] sm:$0xff]  ;;  %v3391_v59 = vld [vmem:[#allocation2 + $0x34] sm:$0x1] }
  0x3c   : > { %781 = vmatpush.bf16.msrb.mxu1 %v2755_v24  ;;  %1330 = vmatpush.bf16.msrb.mxu0 %v2791_v27  ;;  %v588_v3 = vor.u32 %v587_v58, %v584_v57  ;;  %v2822_v24 = vld [vmem:[%s3583_s3 + $0x1f0] sm:$0xff]  ;;  %v618_v25 = vunpack.c.l.b16 %v580_v1  ;;  %v1139_v52 = vrot.slane %v1137_v8, 5 }
  0x3d   : > { %1882 = vmatpush.bf16.msrb.mxu3 %v2822_v24  ;;  %v2777_v24 = vld [vmem:[#allocation2 + $0x1c] sm:$0xf0] }
  0x3e   : > { %v589_v17 = vrot.slane %v588_v3, 4  ;;  %v474_v20 = vld [vmem:[#allocation2 + $0x14] sm:$0x1]  ;;  %v2811_v3 = vld [vmem:[%s3583_s3 + $0x198] sm:$0xff] }
  0x3f   : > { %v451_v32 = vld [vmem:[#allocation2 + $0x18] sm:$0xf]  ;;  %v521_v38 = vshll.u32 %v474_v20, 16  ;;  %1639 = vmatpush.bf16.msrb.mxu2 %v2811_v3  ;;  %v812_v3 = vld [vmem:[#allocation2 + $0x30] sm:$0xe] }
  0x40   : > { %782 = vmatpush.bf16.msrb.mxu1 %v2754_v40  ;;  %1331 = vmatpush.bf16.msrb.mxu0 %v2790_v36  ;;  %v450_v9 = vld [vmem:[#allocation2 + $0x10] sm:$0xf]  ;;  %v809_v54 = vld [vmem:[#allocation2 + $0x18] sm:$0xe]  ;;  %v594_v5 = vsel %vm3136_vm11, %v589_v17, %v593_v7  ;;  %v526_v29 = vshrl.u32 %v451_v32, 16  ;;  %v529_v47 = vshll.u32 %v451_v32, 16 }
  0x41   : > { %v2776_v11 = vld [vmem:[#allocation2 + $0xc] sm:$0xf0]  ;;  %v512_v21 = vshrl.u32 %v450_v9, 16  ;;  %v515_v18 = vshll.u32 %v450_v9, 16  ;;  %v475_v26 = vld [vmem:[#allocation2 + $0x1c] sm:$0x1]  ;;  %v619_v33 = vunpack.c.l.b16 %v594_v5  ;;  %1883 = vmatpush.bf16.msrb.mxu3 %v2821_v42 }
  0x42   : > { %v808_v12 = vld [vmem:[#allocation2 + $0x10] sm:$0xe]  ;;  %v2427_v22 = vor.u32 %v2776_v11, %v2426_v60  ;;  %v523_v34 = vrot.slane %v521_v38, 5  ;;  %v535_v10 = vshll.u32 %v475_v26, 16  ;;  %v528_v39 = vrot.slane %v526_v29, 4  ;;  %v3294_v7 = vld [vmem:[%s3583_s3 + $0x238] sm:$0xff] }
  0x43   : > { %v2354_v4 = vrot.slane %v808_v12, 9  ;;  %v514_v27 = vrot.slane %v512_v21, 4  ;;  %v517_v28 = vrot.slane %v515_v18, 5  ;;  %v843_v40 = vrot.slane %v474_v20, 5  ;;  %v1119_v48 = vld [vmem:[#allocation2 + $0x10] sm:$0xf] }
  0x44   : > { %783 = vmatpush.bf16.msrb.mxu1 %v2753_v61  ;;  %1332 = vmatpush.bf16.msrb.mxu0 %v2789_v62  ;;  %v2355_v41 = vrot.slane %v809_v54, 9  ;;  %v623_v43 = vpack.c.b16 %v619_v33, %v618_v25  ;;  %v531_v45 = vrot.slane %v529_v47, 5  ;;  %v847_v46 = vrot.slane %v475_v26, 5  ;;  %v3286_v62 = vld [vmem:[#allocation2 + $0xc] sm:$0x1] }
  0x45   : > { %1088 = vmatmul.bf16.vlgmr.msra.gmra.mxu3 %v2427_v22  ;;  %v518_v37 = vor.u32 %v517_v28, %v514_v27  ;;  %v844_v2 = vsel %vm3118_vm10, %v2354_v4, %v843_v40  ;;  %v1136_v36 = vrot.slane %v1134_v63, 4  ;;  %v537_v56 = vrot.slane %v535_v10, 5  ;;  %v810_v9 = vld [vmem:[#allocation2 + $0x20] sm:$0xe]  ;;  %v811_v11 = vld [vmem:[#allocation2 + $0x28] sm:$0xe] }
  0x46   : > { %v532_v55 = vor.u32 %v531_v45, %v528_v39  ;;  %v848_v57 = vsel %vm3118_vm10, %v2355_v41, %v847_v46  ;;  %v884_v58 = vunpack.c.l.b16 %v844_v2  ;;  %v1148_v63 = vshrl.u32 %v1119_v48, 16  ;;  %v2801_v21 = vld [vmem:[%s3583_s3 + $0x168] sm:$0xff]  ;;  %v2430_v22 = vld [vmem:[#allocation2 + $0x18] sm:$0xf]  ;;  %v2306_v33 = vld [vmem:[#allocation2] sm:$0xf] }
  0x47   : > { %v519_v50 = vrot.slane %v518_v37, 4  ;;  %699 = vmatmul.bf16.gmra.mxu1 %v623_v43  ;;  %v885_v61 = vunpack.c.l.b16 %v848_v57  ;;  %v1151_v1 = vshll.u32 %v1119_v48, 16  ;;  %v1143_v25 = vshll.u32 %v3286_v62, 16  ;;  %v2748_v37 = vld [vmem:[#allocation2 + $0x4] sm:$0xf0]  ;;  %v3324_v43 = vld [vmem:[%s3583_s3 + $0x230] sm:$0xff] }
  0x48   : > { %784 = vmatpush.bf16.msrb.mxu1 %v2752_v15  ;;  %1333 = vmatpush.bf16.msrb.mxu0 %v2788_v16  ;;  %v533_v8 = vrot.slane %v532_v55, 4  ;;  %v3296_v16 = vld [vmem:[#allocation2 + $0x14] sm:$0x1]  ;;  %v1150_v17 = vrot.slane %v1148_v63, 4  ;;  %v1140_v38 = vor.u32 %v1139_v52, %v1136_v36  ;;  %v2356_v54 = vrot.slane %v810_v9, 9 }
  0x49   : > { %v524_v60 = vsel %vm3136_vm11, %v519_v50, %v523_v34  ;;  %v891_v15 = vpack.c.b16 %v885_v61, %v884_v58  ;;  %v1153_v20 = vrot.slane %v1151_v1, 5  ;;  %v851_v4 = vrot.slane %v3163_v6, 5  ;;  %v1121_v34 = vld [vmem:[#allocation2 + $0x18] sm:$0xf]  ;;  %v2820_v6 = vld [vmem:[%s3583_s3 + $0x1e0] sm:$0xff] }
  0x4a   : > { %v614_v12 = vunpack.c.l.b16 %v524_v60  ;;  %v538_v18 = vsel %vm3136_vm11, %v533_v8, %v537_v56  ;;  %v1157_v26 = vshll.u32 %v3296_v16, 16  ;;  %v2357_v27 = vrot.slane %v811_v11, 9  ;;  %v1123_v45 = vld [vmem:[#allocation2 + $0x20] sm:$0xf]  ;;  %1884 = vmatpush.bf16.msrb.mxu3 %v2820_v6  ;;  %v2819_v50 = vld [vmem:[%s3583_s3 + $0x1d8] sm:$0xff] }
  0x4b   : > { %v615_v32 = vunpack.c.l.b16 %v538_v18  ;;  %959 = vmatmul.bf16.gmra.mxu2 %v891_v15  ;;  %v1154_v5 = vor.u32 %v1153_v20, %v1150_v17  ;;  %v855_v28 = vrot.slane %v3175_v19, 5  ;;  %v1141_v47 = vrot.slane %v1140_v38, 4  ;;  %v2810_v19 = vld [vmem:[%s3583_s3 + $0x190] sm:$0xff]  ;;  %v3336_v61 = vld [vmem:[#allocation2 + $0x1c] sm:$0x1] }
  0x4c   : > { %1500 = vmatpush.bf16.msra.mxu1 %v2803_v30  ;;  %2055 = vmatpush.bf16.msra.mxu0 %v3294_v7  ;;  %v2431_v30 = vor.u32 %v2777_v24, %v2430_v22  ;;  %v852_v10 = vsel %vm3118_vm10, %v2356_v54, %v851_v4  ;;  %v1145_v39 = vrot.slane %v1143_v25, 5  ;;  %v1159_v41 = vrot.slane %v1157_v26, 5  ;;  %v2799_v11 = vld [vmem:[%s3583_s3 + $0x158] sm:$0xff]  ;;  %v2434_v18 = vld [vmem:[#allocation2 + $0x28] sm:$0xf]  ;;  %v2808_v24 = vld [vmem:[%s3583_s3 + $0x180] sm:$0xff] }
  0x4d   : > { %v621_v29 = vpack.c.b16 %v615_v32, %v614_v12  ;;  %v1155_v40 = vrot.slane %v1154_v5, 4  ;;  %v856_v42 = vsel %vm3118_vm10, %v2357_v27, %v855_v28  ;;  %v1162_v46 = vshrl.u32 %v1121_v34, 16  ;;  %1640 = vmatpush.bf16.msrb.mxu2 %v2810_v19  ;;  %v2809_v12 = vld [vmem:[%s3583_s3 + $0x188] sm:$0xff]  ;;  %v3350_v22 = vld [vmem:[#allocation2 + $0x24] sm:$0x1] }
  0x4e   : > { %v1165_v48 = vshll.u32 %v1121_v34, 16  ;;  %v2307_v2 = vor.u32 %v2748_v37, %v2306_v33  ;;  %v886_v36 = vunpack.c.l.b16 %v852_v10  ;;  %v887_v52 = vunpack.c.l.b16 %v856_v42  ;;  %1885 = vmatpush.bf16.msrb.mxu3 %v2819_v50  ;;  %v2778_v32 = vld [vmem:[#allocation2 + $0x2c] sm:$0xf0]  ;;  %v2749_v34 = vld [vmem:[#allocation2 + $0x14] sm:$0xf0] }
  0x4f   : > { %689 = vmatmul.bf16.gmra.mxu0 %v621_v29  ;;  %v1146_v55 = vsel %vm3136_vm11, %v1141_v47, %v1145_v39  ;;  %v1160_v56 = vsel %vm3136_vm11, %v1155_v40, %v1159_v41  ;;  %v1176_v57 = vshrl.u32 %v1123_v45, 16  ;;  %v1179_v58 = vshll.u32 %v1123_v45, 16  ;;  %v2310_v33 = vld [vmem:[#allocation2 + $0x10] sm:$0xf]  ;;  %v445_v50 = vld [vmem:[#allocation2 + $0x44] sm:$0x1] }
  0x50   : > { %1501 = vmatpush.bf16.msra.mxu1 %v2802_v53  ;;  %2056 = vmatpush.bf16.msra.mxu0 %v3324_v43  ;;  %v2847_v53 = vunpack.c.h.bf16 %v3008_v23  ;;  %v1164_v63 = vrot.slane %v1162_v46, 4  ;;  %v1167_v1 = vrot.slane %v1165_v48, 5  ;;  %v1262_v8 = vunpack.c.l.b16 %v1146_v55  ;;  %v1127_v37 = vld [vmem:[#allocation2 + $0x30] sm:$0xf]  ;;  %v442_v48 = vld [vmem:[#allocation2 + $0x40] sm:$0xf] }
  0x51   : > { %v1263_v9 = vunpack.c.l.b16 %v1160_v56  ;;  %v892_v23 = vpack.c.b16 %v887_v52, %v886_v36  ;;  %v1178_v17 = vrot.slane %v1176_v57, 4  ;;  %v1181_v20 = vrot.slane %v1179_v58, 5  ;;  %1641 = vmatpush.bf16.msrb.mxu2 %v2809_v12  ;;  %v2818_v41 = vld [vmem:[%s3583_s3 + $0x1d0] sm:$0xff] }
  0x52   : > { %v265_v60 = vmul.f32 %v2987_v13, %v2847_v53  ;;  %v3347_v13 = vld [vmem:[%s3583_s3 + $0x228] sm:$0xff]  ;;  %v1168_v38 = vor.u32 %v1167_v1, %v1164_v63  ;;  %v1171_v54 = vshll.u32 %v3336_v61, 16  ;;  %v2358_v4 = vrot.slane %v812_v3, 9  ;;  %v2798_v42 = vld [vmem:[%s3583_s3 + $0x150] sm:$0xff]  ;;  %1886 = vmatpush.bf16.msrb.mxu3 %v2818_v41 }
  0x53   : > { %v1270_v5 = vpack.c.b16 %v1263_v9, %v1262_v8  ;;  %v863_v27 = vrot.slane %v3241_v49, 5  ;;  %v1182_v29 = vor.u32 %v1181_v20, %v1178_v17  ;;  %v2435_v47 = vor.u32 %v2778_v32, %v2434_v18  ;;  %v1672_v9 = vld [vmem:[#allocation2 + $0x10] sm:$0xf] }
  0x54   : > { %1502 = vmatpush.bf16.msra.mxu1 %v2801_v21  ;;  %v276_v15 = vadd.f32 %v2992_v14, %v265_v60  ;;  %v813_v21 = vld [vmem:[#allocation2 + $0x38] sm:$0xe]  ;;  %v859_v14 = vrot.slane %v3222_v31, 5  ;;  %2057 = vmatpush.bf16.msra.mxu0 %v3347_v13  ;;  %v1173_v19 = vrot.slane %v1171_v54, 5  ;;  %v1125_v31 = vld [vmem:[#allocation2 + $0x28] sm:$0xf]  ;;  %v2311_v55 = vor.u32 %v2749_v34, %v2310_v33 }
  0x55   : > { %1093 = vmatmul.bf16.gmra.mxu3 %v2431_v30  ;;  %v2359_v26 = vrot.slane %v813_v21, 9  ;;  %v1185_v30 = vshll.u32 %v3350_v22, 16  ;;  %1642 = vmatpush.bf16.msrb.mxu2 %v2808_v24  ;;  %v1183_v45 = vrot.slane %v1182_v29, 4  ;;  %v1190_v52 = vshrl.u32 %v1125_v31, 16  ;;  %v2817_v60 = vld [vmem:[%s3583_s3 + $0x1c8] sm:$0xff] }
  0x56   : > { %v284_v25 = vmax.f32 %v276_v15, 0.0  ;;  %v860_v49 = vsel %vm3118_vm10, %v2358_v4, %v859_v14  ;;  %v1193_v53 = vshll.u32 %v1125_v31, 16  ;;  %v1204_v1 = vshrl.u32 %v1127_v37, 16  ;;  %v3389_v15 = vld [vmem:[#allocation2 + $0x2c] sm:$0x1]  ;;  %1887 = vmatpush.bf16.msrb.mxu3 %v2817_v60  ;;  %v2827_v4 = vld [vmem:[%s3583_s3 + $0x218] sm:$0xff] }
  0x57   : > { %785 = vmatmul.bf16.vlgmr.msrb.gmra.mxu1 %v2307_v2  ;;  %v864_v39 = vsel %vm3118_vm10, %v2359_v26, %v863_v27  ;;  %v1187_v46 = vrot.slane %v1185_v30, 5  ;;  %v888_v57 = vunpack.c.l.b16 %v860_v49  ;;  %v1207_v3 = vshll.u32 %v1127_v37, 16  ;;  %v2797_v54 = vld [vmem:[%s3583_s3 + $0x148] sm:$0xff]  ;;  %v2816_v14 = vld [vmem:[%s3583_s3 + $0x1c0] sm:$0xff] }
  0x58   : > { %1503 = vmatpush.bf16.msra.mxu1 %v2800_v35  ;;  %v292_v28 = vpack.c.bf16 %v284_v25, %v284_v25  ;;  %v1169_v35 = vrot.slane %v1168_v38, 4  ;;  %v889_v58 = vunpack.c.l.b16 %v864_v39  ;;  %v1192_v17 = vrot.slane %v1190_v52, 4  ;;  %v2750_v39 = vld [vmem:[#allocation2 + $0x24] sm:$0xf0] }
  0x59   : > { %2882 = vmatpush.bf16.msra.mxu2 %v3294_v7  ;;  %v3374_v7 = vld [vmem:[%s3583_s3 + $0x220] sm:$0xff]  ;;  %v1195_v20 = vrot.slane %v1193_v53, 5  ;;  %v1689_v21 = vshrl.u32 %v1672_v9, 16  ;;  %v1692_v0 = vshll.u32 %v1672_v9, 16  ;;  %v1206_v32 = vrot.slane %v1204_v1, 4 }
  0x5a   : > { %v370_v10 = vshrl.u32 %v292_v28, 16  ;;  %v373_v6 = vshll.u32 %v292_v28, 16  ;;  %v1174_v56 = vsel %vm3136_vm11, %v1169_v35, %v1173_v19  ;;  %2058 = vmatpush.bf16.msra.mxu0 %v3374_v7  ;;  %v1209_v38 = vrot.slane %v1207_v3, 5  ;;  %v2438_v28 = vld [vmem:[#allocation2 + $0x38] sm:$0xf]  ;;  %1888 = vmatpush.bf16.msrb.mxu3 %v2816_v14  ;;  %v2825_v3 = vld [vmem:[%s3583_s3 + $0x208] sm:$0xff] }
  0x5b   : > { %964 = vmatmul.bf16.gmra.mxu2 %v892_v23  ;;  %v1674_v23 = vld [vmem:[#allocation2 + $0x18] sm:$0xf]  ;;  %v1264_v12 = vunpack.c.l.b16 %v1174_v56  ;;  %v1199_v26 = vshll.u32 %v3389_v15, 16  ;;  %v1213_v27 = vshll.u32 %v3391_v59, 16  ;;  %v1691_v29 = vrot.slane %v1689_v21, 4 }
  0x5c   : > { %1504 = vmatpush.bf16.msra.mxu1 %v2799_v11  ;;  %v372_v40 = vrot.slane %v370_v10, 7  ;;  %v1188_v11 = vsel %vm3136_vm11, %v1183_v45, %v1187_v46  ;;  %v1703_v18 = vshrl.u32 %v1674_v23, 16  ;;  %v1706_v24 = vshll.u32 %v1674_v23, 16  ;;  %v3405_v35 = vld [vmem:[#allocation2 + $0x14] sm:$0x1] }
  0x5d   : > { %2883 = vmatpush.bf16.msra.mxu2 %v3324_v43  ;;  %v1265_v25 = vunpack.c.l.b16 %v1188_v11  ;;  %v893_v43 = vpack.c.b16 %v889_v58, %v888_v57  ;;  %v1694_v30 = vrot.slane %v1692_v0, 5  ;;  %v2314_v19 = vld [vmem:[#allocation2 + $0x20] sm:$0xf]  ;;  %v1201_v49 = vrot.slane %v1199_v26, 5  ;;  %v1678_v57 = vld [vmem:[#allocation2 + $0x28] sm:$0xf] }
  0x5e   : > { %v375_v2 = vor.u32 %v373_v6, %v372_v40  ;;  %v376_v36 = vrot.slane %v372_v40, 4  ;;  %2059 = vmatpush.bf16.msra.mxu0 %v2827_v4  ;;  %v1705_v33 = vrot.slane %v1703_v18, 4  ;;  %v1708_v34 = vrot.slane %v1706_v24, 5  ;;  %v1129_v40 = vld [vmem:[#allocation2 + $0x38] sm:$0xf] }
  0x5f   : > { %1334 = vmatmul.bf16.vlgmr.msrb.gmra.mxu0 %v1270_v5  ;;  %v1196_v5 = vor.u32 %v1195_v20, %v1192_v17  ;;  %v1210_v6 = vor.u32 %v1209_v38, %v1206_v32  ;;  %v1695_v41 = vor.u32 %v1694_v30, %v1691_v29  ;;  %v2315_v52 = vor.u32 %v2750_v39, %v2314_v19  ;;  %v1676_v56 = vld [vmem:[#allocation2 + $0x20] sm:$0xf]  ;;  %v2594_v9 = vld [vmem:[#allocation2 + $0x10] sm:$0xf]  ;;  %v2804_v17 = vld [vmem:[#allocation2 + $0x14] sm:$0xf0] }
  0x60   : > { %1505 = vmatpush.bf16.msra.mxu1 %v2798_v42  ;;  %v443_v63 = vsel %vm3055_vm7, %v375_v2, %v442_v48  ;;  %v446_v8 = vsel %vm3068_vm8, %v376_v36, %v445_v50  ;;  %v1698_v42 = vshll.u32 %v3405_v35, 16  ;;  %v1709_v45 = vor.u32 %v1708_v34, %v1705_v33  ;;  %v2796_v2 = vld [vmem:[%s3583_s3 + $0x140] sm:$0xff]  ;;  %v3438_v19 = vld [vmem:[#allocation2 + $0x2c] sm:$0x1] }
  0x61   : > { %444 = vst [vmem:[#allocation2 + $0x40] sm:$0xf] %v443_v63  ;;  %2884 = vmatpush.bf16.msra.mxu2 %v3347_v13  ;;  %v3407_v13 = vld [vmem:[#allocation2 + $0x1c] sm:$0x1]  ;;  %v1197_v37 = vrot.slane %v1196_v5, 4  ;;  %v1211_v48 = vrot.slane %v1210_v6, 4 }
  0x62   : > { %447 = vst [vmem:[#allocation2 + $0x44] sm:$0x1] %v446_v8  ;;  %v1712_v46 = vshll.u32 %v3407_v13, 16  ;;  %v1215_v50 = vrot.slane %v1213_v27, 5  ;;  %v1696_v58 = vrot.slane %v1695_v41, 4  ;;  %v1700_v60 = vrot.slane %v1698_v42, 5 }
  0x63   : > { %v1202_v53 = vsel %vm3136_vm11, %v1197_v37, %v1201_v49  ;;  %v1710_v63 = vrot.slane %v1709_v45, 4  ;;  %v1221_v23 = vshll.u32 %v1129_v40, 16  ;;  %v1717_v20 = vshrl.u32 %v1676_v56, 16  ;;  %v2824_v27 = vld [vmem:[%s3583_s3 + $0x200] sm:$0xff] }
  0x64   : > { %1506 = vmatpush.bf16.msra.mxu1 %v2797_v54  ;;  %v1714_v1 = vrot.slane %v1712_v46, 5  ;;  %v1216_v8 = vsel %vm3136_vm11, %v1211_v48, %v1215_v50  ;;  %v1720_v21 = vshll.u32 %v1676_v56, 16  ;;  %v1731_v0 = vshrl.u32 %v1678_v57, 16  ;;  %v3436_v6 = vld [vmem:[#allocation2 + $0x24] sm:$0x1] }
  0x65   : > { %1098 = vmatmul.bf16.gmra.mxu3 %v2435_v47  ;;  %v1271_v47 = vpack.c.b16 %v1265_v25, %v1264_v12  ;;  %2885 = vmatpush.bf16.msra.mxu2 %v3374_v7  ;;  %v2826_v7 = vld [vmem:[%s3583_s3 + $0x210] sm:$0xff]  ;;  %v1734_v18 = vshll.u32 %v1678_v57, 16  ;;  %v1266_v24 = vunpack.c.l.b16 %v1202_v53  ;;  %v1267_v25 = vunpack.c.l.b16 %v1216_v8  ;;  %v2751_v53 = vld [vmem:[#allocation2 + $0x34] sm:$0xf0] }
  0x66   : > { %2060 = vmatpush.bf16.msra.mxu0 %v2826_v7  ;;  %v1701_v32 = vsel %vm3136_vm11, %v1696_v58, %v1700_v60  ;;  %v1715_v38 = vsel %vm3136_vm11, %v1710_v63, %v1714_v1  ;;  %v2595_v54 = vor.u32 %v2804_v17, %v2594_v9  ;;  %v1223_v14 = vrot.slane %v1221_v23, 5  ;;  %v2318_v50 = vld [vmem:[#allocation2 + $0x30] sm:$0xf]  ;;  %v1682_v63 = vld [vmem:[#allocation2 + $0x38] sm:$0xf] }
  0x67   : > { %790 = vmatmul.bf16.gmra.mxu1 %v2311_v55  ;;  %v1218_v55 = vshrl.u32 %v1129_v40, 16  ;;  %v1719_v29 = vrot.slane %v1717_v20, 4  ;;  %v1722_v30 = vrot.slane %v1720_v21, 5  ;;  %v1733_v33 = vrot.slane %v1731_v0, 4  ;;  %v1680_v60 = vld [vmem:[#allocation2 + $0x30] sm:$0xf] }
  0x68   : > { %v2779_v10 = vld [vmem:[#allocation2 + $0x3c] sm:$0xf0]  ;;  %1507 = vmatpush.bf16.msra.mxu1 %v2796_v2  ;;  %v1736_v34 = vrot.slane %v1734_v18, 5  ;;  %v1726_v42 = vshll.u32 %v3436_v6, 16  ;;  %v1740_v46 = vshll.u32 %v3438_v19, 16  ;;  %v2319_v1 = vor.u32 %v2751_v53, %v2318_v50 }
  0x69   : > { %v2439_v31 = vor.u32 %v2779_v10, %v2438_v28  ;;  %v1131_v36 = vld [vmem:[#allocation2 + $0x40] sm:$0xf]  ;;  %2886 = vmatpush.bf16.msra.mxu2 %v2827_v4  ;;  %v3429_v4 = vld [vmem:[#allocation2 + $0x3c] sm:$0x1]  ;;  %v3434_v28 = vld [vmem:[#allocation2 + $0x44] sm:$0x1]  ;;  %v1818_v10 = vunpack.c.l.b16 %v1715_v38  ;;  %v1723_v41 = vor.u32 %v1722_v30, %v1719_v29 }
  0x6a   : > { %v1232_v11 = vshrl.u32 %v1131_v36, 16  ;;  %v1235_v12 = vshll.u32 %v1131_v36, 16  ;;  %2061 = vmatpush.bf16.msra.mxu0 %v2825_v3  ;;  %v1227_v49 = vshll.u32 %v3429_v4, 16  ;;  %v1241_v40 = vshll.u32 %v3434_v28, 16  ;;  %v2598_v9 = vld [vmem:[#allocation2 + $0x20] sm:$0xf] }
  0x6b   : > { %969 = vmatmul.bf16.gmra.mxu2 %v893_v43  ;;  %v1220_v43 = vrot.slane %v1218_v55, 4  ;;  %v1737_v45 = vor.u32 %v1736_v34, %v1733_v33  ;;  %v1724_v55 = vrot.slane %v1723_v41, 4  ;;  %v1728_v56 = vrot.slane %v1726_v42, 5  ;;  %v2805_v23 = vld [vmem:[#allocation2 + $0x24] sm:$0xf0] }
  0x6c   : > { %v1234_v5 = vrot.slane %v1232_v11, 4  ;;  %v1237_v26 = vrot.slane %v1235_v12, 5  ;;  %v1742_v58 = vrot.slane %v1740_v46, 5  ;;  %v1363_v11 = vld [vmem:[#allocation2 + $0x8] sm:$0xe]  ;;  %v1745_v21 = vshrl.u32 %v1680_v60, 16 }
  0x6d   : > { %2887 = vmatpush.bf16.msra.mxu2 %v2826_v7  ;;  %v1224_v37 = vor.u32 %v1223_v14, %v1220_v43  ;;  %v1229_v7 = vrot.slane %v1227_v49, 5  ;;  %v1738_v57 = vrot.slane %v1737_v45, 4  ;;  %v1729_v12 = vsel %vm3136_vm11, %v1724_v55, %v1728_v56  ;;  %v1364_v20 = vld [vmem:[#allocation2 + $0x10] sm:$0xe] }
  0x6e   : > { %2062 = vmatpush.bf16.msra.mxu0 %v2824_v27  ;;  %v1238_v39 = vor.u32 %v1237_v26, %v1234_v5  ;;  %v1748_v0 = vshll.u32 %v1680_v60, 16  ;;  %v1759_v18 = vshrl.u32 %v1682_v63, 16  ;;  %v1393_v43 = vrot.slane %v3296_v16, 5  ;;  %v1918_v49 = vld [vmem:[#allocation2 + $0x10] sm:$0xe] }
  0x6f   : > { %1339 = vmatmul.bf16.gmra.mxu0 %v1271_v47  ;;  %v1817_v47 = vunpack.c.l.b16 %v1701_v32  ;;  %v1225_v2 = vrot.slane %v1224_v37, 4  ;;  %v1743_v17 = vsel %vm3136_vm11, %v1738_v57, %v1742_v58  ;;  %v2520_v14 = vrot.slane %v1363_v11, 9  ;;  %v1684_v58 = vld [vmem:[#allocation2 + $0x40] sm:$0xf]  ;;  %v1686_v60 = vld [vmem:[#allocation2 + $0x48] sm:$0xf] }
  0x70   : > { %v1239_v36 = vrot.slane %v1238_v39, 4  ;;  %v2521_v5 = vrot.slane %v1364_v20, 9  ;;  %v1819_v26 = vunpack.c.l.b16 %v1729_v12  ;;  %v1747_v29 = vrot.slane %v1745_v21, 4  ;;  %v1919_v39 = vld [vmem:[#allocation2 + $0x18] sm:$0xe] }
  0x71   : > { %2888 = vmatpush.bf16.msra.mxu2 %v2825_v3  ;;  %v1825_v48 = vpack.c.b16 %v1818_v10, %v1817_v47  ;;  %v1230_v3 = vsel %vm3136_vm11, %v1225_v2, %v1229_v7  ;;  %v1750_v30 = vrot.slane %v1748_v0, 5  ;;  %v1761_v33 = vrot.slane %v1759_v18, 4  ;;  %v3454_v47 = vld [vmem:[#allocation2 + $0x34] sm:$0x1]  ;;  %v3456_v10 = vld [vmem:[#allocation2 + $0x3c] sm:$0x1] }
  0x72   : > { %v1268_v32 = vunpack.c.l.b16 %v1230_v3  ;;  %v1394_v16 = vsel %vm3118_vm10, %v2521_v5, %v1393_v43  ;;  %v1754_v41 = vshll.u32 %v3454_v47, 16  ;;  %v1768_v45 = vshll.u32 %v3456_v10, 16  ;;  %v2602_v3 = vld [vmem:[#allocation2 + $0x30] sm:$0xf] }
  0x73   : > { %v1944_v50 = vrot.slane %v3405_v35, 5  ;;  %v1948_v2 = vrot.slane %v3407_v13, 5  ;;  %v2688_v7 = vrot.slane %v1918_v49, 9  ;;  %v2806_v35 = vld [vmem:[#allocation2 + $0x34] sm:$0xf0]  ;;  %v1773_v11 = vshrl.u32 %v1684_v58, 16 }
  0x74   : > { %v1756_v53 = vrot.slane %v1754_v41, 5  ;;  %v1770_v56 = vrot.slane %v1768_v45, 5  ;;  %v1366_v13 = vld [vmem:[#allocation2 + $0x20] sm:$0xe]  ;;  %v1776_v12 = vshll.u32 %v1684_v58, 16  ;;  %v1790_v20 = vshll.u32 %v1686_v60, 16 }
  0x75   : > { %1103 = vmatmul.bf16.gmra.mxu3 %v2439_v31  ;;  %v1272_v31 = vpack.c.b16 %v1267_v25, %v1266_v24  ;;  %2889 = vmatpush.bf16.msra.mxu2 %v2824_v27  ;;  %v1762_v24 = vshll.u32 %v1682_v63, 16  ;;  %v1389_v25 = vrot.slane %v3286_v62, 5  ;;  %v1820_v27 = vunpack.c.l.b16 %v1743_v17  ;;  %v1368_v58 = vld [vmem:[#allocation2 + $0x30] sm:$0xe] }
  0x76   : > { %v1945_v63 = vsel %vm3118_vm10, %v2688_v7, %v1944_v50  ;;  %v1787_v17 = vshrl.u32 %v1686_v60, 16  ;;  %v2603_v18 = vor.u32 %v2806_v35, %v2602_v3  ;;  %v2523_v43 = vrot.slane %v1366_v13, 9 }
  0x77   : > { %795 = vmatmul.bf16.gmra.mxu1 %v2315_v52  ;;  %v1243_v52 = vrot.slane %v1241_v40, 5  ;;  %v1764_v34 = vrot.slane %v1762_v24, 5  ;;  %v1390_v62 = vsel %vm3118_vm10, %v2520_v14, %v1389_v25  ;;  %v1826_v37 = vpack.c.b16 %v1820_v27, %v1819_v26  ;;  %v1920_v14 = vld [vmem:[#allocation2 + $0x20] sm:$0xe] }
  0x78   : > { %v1751_v40 = vor.u32 %v1750_v30, %v1747_v29  ;;  %v1436_v46 = vunpack.c.l.b16 %v1390_v62  ;;  %v1991_v21 = vunpack.c.l.b16 %v1945_v63  ;;  %v1397_v25 = vrot.slane %v3336_v61, 5 }
  0x79   : > { %v1244_v8 = vsel %vm3136_vm11, %v1239_v36, %v1243_v52  ;;  %v1765_v42 = vor.u32 %v1764_v34, %v1761_v33  ;;  %v2689_v36 = vrot.slane %v1919_v39, 9  ;;  %v1775_v5 = vrot.slane %v1773_v11, 4  ;;  %v3476_v33 = vld [vmem:[#allocation2 + $0x44] sm:$0x1]  ;;  %v3478_v34 = vld [vmem:[#allocation2 + $0x4c] sm:$0x1] }
  0x7a   : > { %v1269_v38 = vunpack.c.l.b16 %v1244_v8  ;;  %v1752_v52 = vrot.slane %v1751_v40, 4  ;;  %v1365_v8 = vld [vmem:[#allocation2 + $0x18] sm:$0xe]  ;;  %v1778_v26 = vrot.slane %v1776_v12, 5  ;;  %v1789_v27 = vrot.slane %v1787_v17, 4 }
  0x7b   : > { %1643 = vmatmul.bf16.vlgmr.msrb.gmra.mxu2 %v2595_v54  ;;  %v2599_v54 = vor.u32 %v2805_v23, %v2598_v9  ;;  %v1766_v55 = vrot.slane %v1765_v42, 4  ;;  %v2522_v24 = vrot.slane %v1365_v8, 9  ;;  %v1792_v29 = vrot.slane %v1790_v20, 5  ;;  %v1924_v12 = vld [vmem:[#allocation2 + $0x40] sm:$0xe] }
  0x7c   : > { %v1757_v9 = vsel %vm3136_vm11, %v1752_v52, %v1756_v53  ;;  %v1779_v49 = vor.u32 %v1778_v26, %v1775_v5  ;;  %v1782_v39 = vshll.u32 %v3476_v33, 16  ;;  %v1796_v41 = vshll.u32 %v3478_v34, 16  ;;  %v1925_v17 = vld [vmem:[#allocation2 + $0x48] sm:$0xe] }
  0x7d   : > { %v1771_v23 = vsel %vm3136_vm11, %v1766_v55, %v1770_v56  ;;  %v1793_v40 = vor.u32 %v1792_v29, %v1789_v27  ;;  %v2606_v55 = vld [vmem:[#allocation2 + $0x40] sm:$0xf]  ;;  %v2807_v56 = vld [vmem:[#allocation2 + $0x44] sm:$0xf0]  ;;  %v1405_v8 = vrot.slane %v3389_v15, 5  ;;  %v2525_v13 = vrot.slane %v1368_v58, 9 }
  0x7e   : > { %v1784_v7 = vrot.slane %v1782_v39, 5  ;;  %v1922_v15 = vld [vmem:[#allocation2 + $0x30] sm:$0xe]  ;;  %v1964_v26 = vrot.slane %v3456_v10, 5  ;;  %v1370_v10 = vld [vmem:[#allocation2 + $0x40] sm:$0xe] }
  0x7f   : > { %1344 = vmatmul.bf16.gmra.mxu0 %v1272_v31  ;;  %v1273_v31 = vpack.c.b16 %v1269_v38, %v1268_v32  ;;  %v1401_v32 = vrot.slane %v3350_v22, 5  ;;  %v1821_v38 = vunpack.c.l.b16 %v1757_v9  ;;  %v1921_v22 = vld [vmem:[#allocation2 + $0x28] sm:$0xe]  ;;  %v1409_v9 = vrot.slane %v3391_v59, 5 }
  0x81   : > { %v1402_v61 = vsel %vm3118_vm10, %v2523_v43, %v1401_v32  ;;  %v1410_v51 = vsel %vm3118_vm10, %v2525_v13, %v1409_v9  ;;  %v1923_v43 = vld [vmem:[#allocation2 + $0x38] sm:$0xe] }
  0x82   : > { %v1439_v45 = vunpack.c.l.b16 %v1402_v61  ;;  %v2693_v5 = vrot.slane %v1923_v43, 9 }
  0x85   : > { %1889 = vmatmul.bf16.vlgmr.msrb.gmra.mxu3 %v1825_v48  ;;  %v1437_v48 = vunpack.c.l.b16 %v1394_v16  ;;  %v2690_v16 = vrot.slane %v1920_v14, 9  ;;  %v1960_v14 = vrot.slane %v3454_v47, 5  ;;  %v1965_v47 = vsel %vm3118_vm10, %v2693_v5, %v1964_v26 }
  0x87   : > { %800 = vmatmul.bf16.gmra.mxu1 %v2319_v1  ;;  %v1444_v57 = vpack.c.b16 %v1437_v48, %v1436_v46  ;;  %v1949_v1 = vsel %vm3118_vm10, %v2689_v36, %v1948_v2  ;;  %v2691_v46 = vrot.slane %v1921_v22, 9  ;;  %v1956_v48 = vrot.slane %v3438_v19, 5  ;;  %v1369_v22 = vld [vmem:[#allocation2 + $0x38] sm:$0xe] }
  0x88   : > { %v1992_v0 = vunpack.c.l.b16 %v1949_v1  ;;  %v1780_v2 = vrot.slane %v1779_v49, 4  ;;  %v1794_v36 = vrot.slane %v1793_v40, 4  ;;  %v2607_v1 = vor.u32 %v2807_v56, %v2606_v55 }
  0x89   : > { %v1957_v53 = vsel %vm3118_vm10, %v2691_v46, %v1956_v48  ;;  %v2526_v39 = vrot.slane %v1369_v22, 9  ;;  %v1413_v40 = vrot.slane %v3429_v4, 5 }
  0x8a   : > { %v1999_v30 = vpack.c.b16 %v1992_v0, %v1991_v21  ;;  %v1994_v63 = vunpack.c.l.b16 %v1957_v53  ;;  %v1785_v19 = vsel %vm3136_vm11, %v1780_v2, %v1784_v7  ;;  %v1968_v0 = vrot.slane %v3476_v33, 5 }
  0x8b   : > { %1648 = vmatmul.bf16.gmra.mxu2 %v2599_v54  ;;  %v1822_v54 = vunpack.c.l.b16 %v1771_v23  ;;  %v1823_v23 = vunpack.c.l.b16 %v1785_v19 }
  0x8d   : > { %v1827_v62 = vpack.c.b16 %v1822_v54, %v1821_v38  ;;  %v1441_v38 = vunpack.c.l.b16 %v1410_v51  ;;  %v2692_v54 = vrot.slane %v1922_v15, 9 }
  0x8f   : > { %1349 = vmatmul.bf16.gmra.mxu0 %v1273_v31  ;;  %v1398_v31 = vsel %vm3118_vm10, %v2522_v24, %v1397_v25  ;;  %v2694_v24 = vrot.slane %v1924_v12, 9  ;;  %v2695_v25 = vrot.slane %v1925_v17, 9  ;;  %v1961_v61 = vsel %vm3118_vm10, %v2692_v54, %v1960_v14 }
  0x90   : > { %v1438_v42 = vunpack.c.l.b16 %v1398_v31 }
  0x91   : > { %v1969_v27 = vsel %vm3118_vm10, %v2694_v24, %v1968_v0 }
  0x92   : > { %v1445_v52 = vpack.c.b16 %v1439_v45, %v1438_v42  ;;  %v1997_v33 = vunpack.c.l.b16 %v1969_v27  ;;  %v1417_v42 = vrot.slane %v3434_v28, 5 }
  0x95   : > { %1894 = vmatmul.bf16.gmra.mxu3 %v1826_v37  ;;  %v1952_v37 = vrot.slane %v3436_v6, 5  ;;  %v1798_v6 = vrot.slane %v1796_v41, 5  ;;  %v2527_v41 = vrot.slane %v1370_v10, 9 }
  0x97   : > { %1508 = vmatmul.bf16.vlgmr.msra.gmra.mxu1 %v1444_v57  ;;  %v1953_v50 = vsel %vm3118_vm10, %v2690_v16, %v1952_v37  ;;  %v1367_v57 = vld [vmem:[#allocation2 + $0x28] sm:$0xe]  ;;  %v1799_v3 = vsel %vm3136_vm11, %v1794_v36, %v1798_v6  ;;  %v1996_v16 = vunpack.c.l.b16 %v1965_v47  ;;  %v1418_v2 = vsel %vm3118_vm10, %v2527_v41, %v1417_v42 }
  0x98   : > { %v1993_v60 = vunpack.c.l.b16 %v1953_v50  ;;  %v2524_v35 = vrot.slane %v1367_v57, 9  ;;  %v1824_v11 = vunpack.c.l.b16 %v1799_v3  ;;  %v1414_v50 = vsel %vm3118_vm10, %v2526_v39, %v1413_v40 }
  0x99   : > { %v1442_v7 = vunpack.c.l.b16 %v1414_v50  ;;  %v1443_v36 = vunpack.c.l.b16 %v1418_v2 }
  0x9a   : > { %v2000_v20 = vpack.c.b16 %v1994_v63, %v1993_v60  ;;  %v1406_v21 = vsel %vm3118_vm10, %v2524_v35, %v1405_v8  ;;  %v1828_v59 = vpack.c.b16 %v1824_v11, %v1823_v23 }
  0x9b   : > { %1653 = vmatmul.bf16.gmra.mxu2 %v2603_v18  ;;  %v1972_v18 = vrot.slane %v3478_v34, 5  ;;  %v1440_v32 = vunpack.c.l.b16 %v1406_v21 }
  0x9d   : > { %v1973_v29 = vsel %vm3118_vm10, %v2695_v25, %v1972_v18 }
  0x9e   : > { %v1998_v34 = vunpack.c.l.b16 %v1973_v29 }
  0x9f   : > { %2063 = vmatmul.bf16.vlgmr.msra.gmra.mxu0 %v1999_v30  ;;  %v1446_v30 = vpack.c.b16 %v1441_v38, %v1440_v32 }
  0xa0   : > { %v2002_v37 = vpack.c.b16 %v1998_v34, %v1997_v33 }
  0xa5   : > { %1899 = vmatmul.bf16.gmra.mxu3 %v1827_v62  ;;  %v1995_v62 = vunpack.c.l.b16 %v1961_v61 }
  0xa7   : > { %1513 = vmatmul.bf16.gmra.mxu1 %v1445_v52  ;;  %v2001_v46 = vpack.c.b16 %v1996_v16, %v1995_v62  ;;  %v1447_v52 = vpack.c.b16 %v1443_v36, %v1442_v7 }
  0xab   : > { %1658 = vmatmul.bf16.gmra.mxu2 %v2607_v1 }
  0xaf   : > { %2068 = vmatmul.bf16.gmra.mxu0 %v2000_v20 }
  0xb4   : > { %v3510_v31 = vpop.f32.mrf.mxu1 }
  0xb5   : > { %1904 = vmatmul.bf16.gmra.mxu3 %v1828_v59 }
  0xb7   : > { %1518 = vmatmul.bf16.gmra.mxu1 %v1446_v30  ;;  %v685_v49 = vpop.f32.mrf.mxu0 }
  0xba   : > { %v955_v45 = vpop.f32.mrf.mxu2 }
  0xbb   : > { %2078 = vmatmul.bf16.vlgmr.msra.gmra.mxu2 %v2002_v37 }
  0xbc   : > { %v697_v48 = vpop.f32.mrf.mxu1 }
  0xbf   : > { %2073 = vmatmul.bf16.gmra.mxu0 %v2001_v46  ;;  %v687_v6 = vpop.f32.mrf.mxu0 }
  0xc2   : > { %v957_v53 = vpop.f32.mrf.mxu2 }
  0xc4   : > { %v700_v4 = vpop.f32.mrf.mxu1 }
  0xc7   : > { %1523 = vmatmul.bf16.gmra.mxu1 %v1447_v52 }
  0xc8   : > { %v1089_v55 = vpop.f32.mrf.mxu3 }
  0xcc   : > { %v690_v28 = vpop.f32.mrf.mxu0  ;;  %v702_v56 = vpop.f32.mrf.mxu1 }
  0xce   : > { %v960_v58 = vpop.f32.mrf.mxu2 }
  0xd0   : > { %v1091_v57 = vpop.f32.mrf.mxu3 }
  0xd4   : > { %v692_v60 = vpop.f32.mrf.mxu0  ;;  %v786_v63 = vpop.f32.mrf.mxu1 }
  0xd5   : > { %v787_v1 = vadd.f32 %v786_v63, %v685_v49 }
  0xd6   : > { %v962_v3 = vpop.f32.mrf.mxu2 }
  0xd7   : > { %v975_v44 = vadd.f32 %v955_v45, %v787_v1 }
  0xd8   : > { %v1094_v19 = vpop.f32.mrf.mxu3 }
  0xd9   : > { %v1109_v35 = vadd.f32 %v1089_v55, %v975_v44 }
  0xdc   : > { %v1335_v8 = vpop.f32.mrf.mxu0  ;;  %v788_v13 = vpop.f32.mrf.mxu1 }
  0xdd   : > { %v1355_v9 = vadd.f32 %v1335_v8, %v1109_v35  ;;  %v789_v23 = vadd.f32 %v788_v13, %v687_v6 }
  0xde   : > { %v965_v12 = vpop.f32.mrf.mxu2 }
  0xdf   : > { %v976_v17 = vadd.f32 %v957_v53, %v789_v23 }
  0xe0   : > { %v3522_v11 = vpop.f32.mrf.mxu3 }
  0xe1   : > { %v1110_v53 = vadd.f32 %v1091_v57, %v976_v17 }
  0xe4   : > { %v1337_v20 = vpop.f32.mrf.mxu0  ;;  %v791_v21 = vpop.f32.mrf.mxu1 }
  0xe5   : > { %v792_v51 = vadd.f32 %v791_v21, %v690_v28 }
  0xe6   : > { %v967_v18 = vpop.f32.mrf.mxu2 }
  0xe7   : > { %v977_v15 = vadd.f32 %v960_v58, %v792_v51 }
  0xe8   : > { %v1099_v0 = vpop.f32.mrf.mxu3 }
  0xe9   : > { %v1111_v24 = vadd.f32 %v1094_v19, %v977_v15 }
  0xec   : > { %v1340_v25 = vpop.f32.mrf.mxu0  ;;  %v793_v59 = vpop.f32.mrf.mxu1 }
  0xed   : > { %v1357_v43 = vadd.f32 %v1340_v25, %v1111_v24  ;;  %v794_v32 = vadd.f32 %v793_v59, %v692_v60 }
  0xee   : > { %v970_v54 = vpop.f32.mrf.mxu2 }
  0xef   : > { %v978_v14 = vadd.f32 %v962_v3, %v794_v32 }
  0xf0   : > { %v3524_v38 = vpop.f32.mrf.mxu3 }
  0xf1   : > { %v1112_v57 = vadd.f32 %v3522_v11, %v978_v14 }
  0xf4   : > { %v1342_v5 = vpop.f32.mrf.mxu0  ;;  %v796_v26 = vpop.f32.mrf.mxu1 }
  0xf5   : > { %v797_v27 = vadd.f32 %v796_v26, %v3510_v31 }
  0xf6   : > { %v972_v30 = vpop.f32.mrf.mxu2 }
  0xf7   : > { %v979_v33 = vadd.f32 %v965_v12, %v797_v27 }
  0xf8   : > { %v3527_v29 = vpop.f32.mrf.mxu3 }
  0xf9   : > { %v1113_v34 = vadd.f32 %v1099_v0, %v979_v33 }
  0xfc   : > { %v1345_v61 = vpop.f32.mrf.mxu0  ;;  %v798_v47 = vpop.f32.mrf.mxu1 }
  0xfd   : > { %v1359_v22 = vadd.f32 %v1345_v61, %v1113_v34  ;;  %v799_v10 = vadd.f32 %v798_v47, %v697_v48 }
  0xfe   : > { %v1644_v62 = vpop.f32.mrf.mxu2 }
  0xff   : > { %v980_v16 = vadd.f32 %v967_v18, %v799_v10  ;;  %v1358_v18 = vadd.f32 %v1342_v5, %v1112_v57 }
 0x100   : > { %v3529_v37 = vpop.f32.mrf.mxu3 }
 0x101   : > { %v1114_v34 = vadd.f32 %v3524_v38, %v980_v16 }
 0x104   : > { %v1347_v49 = vpop.f32.mrf.mxu0  ;;  %v801_v39 = vpop.f32.mrf.mxu1 }
 0x105   : > { %v802_v40 = vadd.f32 %v801_v39, %v700_v4  ;;  %v1356_v4 = vadd.f32 %v1337_v20, %v1110_v53 }
 0x106   : > { %v1646_v41 = vpop.f32.mrf.mxu2 }
 0x107   : > { %v3531_v42 = vadd.f32 %v970_v54, %v802_v40 }
 0x108   : > { %v1890_v31 = vpop.f32.mrf.mxu3 }
 0x10c   : > { %v3533_v45 = vpop.f32.mrf.mxu0  ;;  %v803_v46 = vpop.f32.mrf.mxu1 }
 0x10d   : > { %v804_v50 = vadd.f32 %v803_v46, %v702_v56 }
 0x10e   : > { %v1649_v2 = vpop.f32.mrf.mxu2 }
 0x10f   : > { %v3535_v7 = vadd.f32 %v972_v30, %v804_v50 }
 0x110   : > { %v1892_v36 = vpop.f32.mrf.mxu3 }
 0x114   : > { %v3537_v48 = vpop.f32.mrf.mxu0  ;;  %v1509_v6 = vpop.f32.mrf.mxu1 }
 0x115   : > { %v1529_v55 = vadd.f32 %v1509_v6, %v1355_v9 }
 0x116   : > { %v1651_v52 = vpop.f32.mrf.mxu2 }
 0x117   : > { %v1664_v60 = vadd.f32 %v1644_v62, %v1529_v55  ;;  %v1360_v62 = vadd.f32 %v1347_v49, %v1114_v34 }
 0x118   : > { %v1895_v1 = vpop.f32.mrf.mxu3 }
 0x119   : > { %v1910_v56 = vadd.f32 %v1890_v31, %v1664_v60 }
 0x11c   : > { %v2064_v28 = vpop.f32.mrf.mxu0  ;;  %v1511_v58 = vpop.f32.mrf.mxu1 }
 0x11d   : > { %v1530_v63 = vadd.f32 %v1511_v58, %v1356_v4  ;;  %v3539_v13 = vadd.f32 %v2064_v28, %v1910_v56  ;;  %v1116_v4 = vadd.f32 %v3529_v37, %v3535_v7 }
 0x11e   : > { %v1654_v3 = vpop.f32.mrf.mxu2 }
 0x11f   : > { %v1665_v19 = vadd.f32 %v1646_v41, %v1530_v63 }
 0x120   : > { %v1897_v21 = vpop.f32.mrf.mxu3 }
 0x121   : > { %v1911_v44 = vadd.f32 %v1892_v36, %v1665_v19 }
 0x124   : > { %v2066_v35 = vpop.f32.mrf.mxu0  ;;  %v1514_v8 = vpop.f32.mrf.mxu1 }
 0x125   : > { %v3541_v23 = vadd.f32 %v2066_v35, %v1911_v44  ;;  %v1531_v12 = vadd.f32 %v1514_v8, %v1357_v43 }
 0x126   : > { %v1656_v51 = vpop.f32.mrf.mxu2 }
 0x127   : > { %v2851_v9 = vpack.c.bf16 %v3541_v23, %v3539_v13  ;;  %v2108_v17 = vadd.f32 %v3541_v23, %v3539_v13  ;;  %v1666_v20 = vadd.f32 %v1649_v2, %v1531_v12  ;;  %v1115_v2 = vadd.f32 %v3527_v29, %v3531_v42 }
 0x128   : > { %v1900_v32 = vpop.f32.mrf.mxu3  ;;  %v1362_v42 = vadd.f32 %v3537_v48, %v1116_v4 }
 0x129   : > { %2852 = vst [vmem:[%s3548_s17] sm:$0xff] %v2851_v9   ;;  %v1912_v0 = vadd.f32 %v1895_v1, %v1666_v20  ;;  %v1361_v16 = vadd.f32 %v3533_v45, %v1115_v2 }
 0x12c   : > { %v2069_v15 = vpop.f32.mrf.mxu0  ;;  %v1516_v24 = vpop.f32.mrf.mxu1 }
 0x12d   : > { %v3556_v25 = vadd.f32 %v2069_v15, %v1912_v0  ;;  %v1532_v59 = vadd.f32 %v1516_v24, %v1358_v18 }
 0x12e   : > { %v1659_v14 = vpop.f32.mrf.mxu2 }
 0x12f   : > { %v2109_v11 = vadd.f32 %v2108_v17, %v3556_v25  ;;  %v1667_v43 = vadd.f32 %v1651_v52, %v1532_v59 }
 0x130   : > { %v1902_v39 = vpop.f32.mrf.mxu3 }
 0x131   : > { %v1913_v54 = vadd.f32 %v1897_v21, %v1667_v43 }
 0x134   : > { %v2071_v26 = vpop.f32.mrf.mxu0  ;;  %v1519_v27 = vpop.f32.mrf.mxu1 }
 0x135   : > { %v2087_v30 = vadd.f32 %v2071_v26, %v1913_v54  ;;  %v1533_v33 = vadd.f32 %v1519_v27, %v1359_v22 }
 0x136   : > { %v1661_v50 = vpop.f32.mrf.mxu2 }
 0x137   : > { %v2856_v5 = vpack.c.bf16 %v2087_v30, %v3556_v25  ;;  %v2110_v61 = vadd.f32 %v2109_v11, %v2087_v30  ;;  %v1668_v47 = vadd.f32 %v1654_v3, %v1533_v33 }
 0x138   : > { %v1905_v49 = vpop.f32.mrf.mxu3 }
 0x139   : > { %2871 = vst [vmem:[%s3548_s17 + $0x8] sm:$0xff] %v2856_v5   ;;  %v1914_v10 = vadd.f32 %v1900_v32, %v1668_v47 }
 0x13c   : > { %v2074_v40 = vpop.f32.mrf.mxu0  ;;  %v1521_v41 = vpop.f32.mrf.mxu1 }
 0x13d   : > { %v2088_v31 = vadd.f32 %v2074_v40, %v1914_v10  ;;  %v1534_v46 = vadd.f32 %v1521_v41, %v1360_v62  ;;  %v2151_v40 = vlaneseq }
 0x13e   : > { %v2079_v63 = vpop.f32.mrf.mxu2 }
 0x13f   : > { %v2111_v22 = vadd.f32 %v2110_v61, %v2088_v31  ;;  %v1669_v36 = vadd.f32 %v1656_v51, %v1534_v46  ;;  %v2152_v46 = vshrl.u32 %v2151_v40, 7 }
 0x140   : > { %v1907_v44 = vpop.f32.mrf.mxu3 }
 0x141   : > { %v1915_v38 = vadd.f32 %v1902_v39, %v1669_v36  ;;  %vm2155_vm12 = vcmp.eq.s32.totalorder %v2152_v46, 2  ;;  %vm2154_vm13 = vcmp.eq.s32.totalorder %v2152_v46, 1  ;;  %vm2153_vm14 = vcmp.eq.s32.totalorder %v2152_v46, 0 }
 0x144   : > { %v2076_v6 = vpop.f32.mrf.mxu0  ;;  %v1524_v52 = vpop.f32.mrf.mxu1 }
 0x145   : > { %v2089_v53 = vadd.f32 %v2076_v6, %v1915_v38  ;;  %v1535_v55 = vadd.f32 %v1524_v52, %v1361_v16 }
 0x146   : > { %v2081_v8 = vpop.f32.mrf.mxu2 }
 0x147   : > { %v2861_v28 = vpack.c.bf16 %v2089_v53, %v2088_v31  ;;  %v2112_v58 = vadd.f32 %v2111_v22, %v2089_v53  ;;  %v1670_v60 = vadd.f32 %v1659_v14, %v1535_v55 }
 0x149   : > { %2872 = vst [vmem:[%s3548_s17 + $0x10] sm:$0xff] %v2861_v28   ;;  %v1916_v29 = vadd.f32 %v1905_v49, %v1670_v60 }
 0x14b   : > { %v2090_v1 = vadd.f32 %v2079_v63, %v1916_v29 }
 0x14c   : > { %v1526_v19 = vpop.f32.mrf.mxu1 }
 0x14d   : > { %v2113_v45 = vadd.f32 %v2112_v58, %v2090_v1  ;;  %v1536_v3 = vadd.f32 %v1526_v19, %v1362_v42 }
 0x14f   : > { %v1671_v56 = vadd.f32 %v1661_v50, %v1536_v3 }
 0x151   : > { %v1917_v35 = vadd.f32 %v1907_v44, %v1671_v56 }
 0x153   : > { %v2091_v12 = vadd.f32 %v2081_v8, %v1917_v35 }
 0x155   : > { %v2866_v57 = vpack.c.bf16 %v2091_v12, %v2090_v1  ;;  %v2114_v37 = vadd.f32 %v2113_v45, %v2091_v12 }
 0x157   : > { %2873 = vst [vmem:[%s3548_s17 + $0x18] sm:$0xff] %v2866_v57   ;;  %v2115_v7 = vrot.slane %v2114_v37, 4 }
 0x159   : > { %v2116_v9 = vadd.f32 %v2115_v7, %v2114_v37 }
 0x15b   : > { %v2117_v17 = vrot.slane %v2116_v9, 2 }
 0x15d   : > { %v2118_v20 = vadd.f32 %v2117_v17, %v2116_v9 }
 0x15f   : > { %v2119_v21 = vrot.slane %v2118_v20, 1 }
 0x161   : > { %v2120_v51 = vadd.f32 %v2119_v21, %v2118_v20 }
 0x163   : > { %v2121_v0 = vmul.f32 0.015625, %v2120_v51 }
 0x165   : > { %v2122_v48 = vsub.f32 %v3539_v13, %v2121_v0  ;;  %v2123_v18 = vsub.f32 %v3541_v23, %v2121_v0  ;;  %v2124_v15 = vsub.f32 %v3556_v25, %v2121_v0  ;;  %v2125_v24 = vsub.f32 %v2087_v30, %v2121_v0 }
 0x166   : > { %v2126_v59 = vsub.f32 %v2088_v31, %v2121_v0  ;;  %v2127_v11 = vsub.f32 %v2089_v53, %v2121_v0  ;;  %v2128_v43 = vsub.f32 %v2090_v1, %v2121_v0  ;;  %v2129_v32 = vsub.f32 %v2091_v12, %v2121_v0 }
 0x167   : > { %v2130_v54 = vmul.f32 %v2122_v48, %v2122_v48  ;;  %v2131_v14 = vmul.f32 %v2123_v18, %v2123_v18  ;;  %v2132_v26 = vmul.f32 %v2124_v15, %v2124_v15  ;;  %v2133_v33 = vmul.f32 %v2125_v24, %v2125_v24 }
 0x168   : > { %v2134_v5 = vmul.f32 %v2126_v59, %v2126_v59  ;;  %v2135_v47 = vmul.f32 %v2127_v11, %v2127_v11  ;;  %v2136_v10 = vmul.f32 %v2128_v43, %v2128_v43  ;;  %v2137_v62 = vmul.f32 %v2129_v32, %v2129_v32 }
 0x169   : > { %v2138_v27 = vadd.f32 %v2131_v14, %v2130_v54 }
 0x16b   : > { %v2139_v34 = vadd.f32 %v2138_v27, %v2132_v26 }
 0x16d   : > { %v2140_v61 = vadd.f32 %v2139_v34, %v2133_v33 }
 0x16f   : > { %v2141_v13 = vadd.f32 %v2140_v61, %v2134_v5 }
 0x171   : > { %v2142_v23 = vadd.f32 %v2141_v13, %v2135_v47 }
 0x173   : > { %v2143_v25 = vadd.f32 %v2142_v23, %v2136_v10 }
 0x175   : > { %v2144_v30 = vadd.f32 %v2143_v25, %v2137_v62 }
 0x177   : > { %v2145_v39 = vrot.slane %v2144_v30, 4 }
 0x179   : > { %v2146_v41 = vadd.f32 %v2145_v39, %v2144_v30 }
 0x17b   : > { %v2147_v31 = vrot.slane %v2146_v41, 2 }
 0x17d   : > { %v2148_v50 = vadd.f32 %v2147_v31, %v2146_v41 }
 0x17f   : > { %v2149_v2 = vrot.slane %v2148_v50, 1 }
 0x181   : > { %v2150_v22 = vadd.f32 %v2149_v2, %v2148_v50 }
 0x183   : > { %v2156_v36 = vsel %vm2155_vm12, %v2150_v22, 0.0 }
 0x184   : > { %v2157_v38 = vsel %vm2154_vm13, %v2120_v51, %v2156_v36 }
 0x185   : > { %v2158_v16 = vsel %vm2153_vm14, 64.0, %v2157_v38 }
 0x186   : > { %2159 = vst [vmem:[%s235_s22] sm:$0xff] %v2158_v16 }
 0x187 PF: > { %s16_s18 = sadd.s32 1, %s2907_s18  }
 0x188   : > { %p13_p4 = scmp.ge.s32.totalorder %s16_s18, 4  }
 0x18a   :  { %15 = sbr.rel (!%p13_p4) target bundleno = 1 (0x1), region = 88 }

// kernel: stem_forward.9
= control target key start
LH: loop header
LB: loop body
LE: loop exit
PB: predicated region body
PF: predicated region fallthrough
CT: control target
= control target key end

     0   :  { %14 = vsyncpa [#allocation4], 0  ;;  %s2532_s27 = smov 0   ;;  %s2798_s0 = inlined_call_operand.vmem [shape: bf16[2,4,2,4,256], index: 0, kind: input, shape index: {}]   ;;  %s2799_s1 = inlined_call_operand.vmem [shape: f32[1,256], index: 1, kind: input, shape index: {}]   ;;  %s2800_s2 = inlined_call_operand.vmem [shape: f32[1,256], index: 2, kind: input, shape index: {}]   ;;  %s2801_s3 = inlined_call_operand.vmem [shape: bf16[2,4,2,4,256], index: 3, kind: input, shape index: {}]   ;;  %s2802_s4 = inlined_call_operand.vmem [shape: f32[1,256], index: 4, kind: input, shape index: {}]   ;;  %s2803_s5 = inlined_call_operand.vmem [shape: f32[1,256], index: 5, kind: input, shape index: {}]   ;;  %s2804_s6 = inlined_call_operand.hbm [shape: bf16[9,128,128], index: 6, kind: input, shape index: {}]   ;;  %s2805_s7 = inlined_call_operand.vmem [shape: bf16[2,16,128], index: 7, kind: output, shape index: {0}]   ;;  %s2806_s8 = inlined_call_operand.vmem [shape: f32[2,8,128], index: 8, kind: output, shape index: {1}]  }
   0x1 LB: > { %s257_s30 = sshll.u32 %s2804_s6, 4  ;;  %s1997_s9 = sadd.s32 4294967295, %s2481_s27   ;;  %s2481_s27 = sphi %s2532_s27, %s20_s27   ;;  %s258_s30 = int_to_ptr.hbm [resolvable:$true] %s257_s30 }
   0x2   : > { %p1999_p0 = scmp.ge.s32.totalorder %s2481_s27, 1  ;;  %p234_p1 = scmp.lt.s32.totalorder %s2481_s27, 3 }
   0x3   : > { %p2427_p2 = scmp.eq.s32.totalorder %s1997_s9, 0  ;;  %s2483_s10 = smov [#allocation3]  }
   0x4   : > { %p235_p3 = pnand %p1999_p0, %p234_p1  ;;  %s259_s11 = sshll.u32 %s2483_s10, 4  ;;  %s260_s11 = int_to_ptr.vmem [resolvable:$true] %s259_s11 }
   0x5   : > { %s2484_s12 = smov 64   ;;  %s2485_s13 = smov 4  }
   0x6   : > { %p2423_p4 = pneg %p235_p3  ;;  %291 = sbr.rel (%p235_p3) target bundleno = 355 (0x163), region = 48 }
   0x8   : > { %p2424_p5 = pnand %p2427_p2, %p2423_p4 }
   0xa   : > { %2426 = dma.hbm_to_vmem [thread:$0]  (!%p2424_p5), %s258_s30, 9216, %s260_s11, [#allocation4], %s2484_s12, %s2484_s12, %s2485_s13  }
   0xb   : > { %2476 = dma.done.wait (%p2427_p2), [#allocation4], 9216  }
   0xc   : > { %2478 = vsyncadd (%p2427_p2), [#allocation4], 4294958080  ;;  %v2319_v0 = vld [vmem:[#allocation3 + $0x78] sm:$0xff]  ;;  %p335_p6 = scmp.lt.s32.totalorder %s1997_s9, 1  ;;  %v2318_v2 = vld [vmem:[#allocation3 + $0x70] sm:$0xff]  ;;  %vm379_vm0 = vcmask 1043456  }
   0xd   : > { %v2311_v1 = vld [vmem:[#allocation3 + $0x38] sm:$0xff]  ;;  %855 = vmatpush.bf16.msra.mxu0 %v2319_v0  ;;  %v2310_v4 = vld [vmem:[#allocation3 + $0x30] sm:$0xff]  ;;  %v2317_v7 = vld [vmem:[#allocation3 + $0x68] sm:$0xff]  ;;  %vm600_vm1 = vcmask 1042432   ;;  %vm601_vm2 = vsmask.f32 2306 }
   0xe   : > { %v2327_v3 = vld [vmem:[#allocation3 + $0xb8] sm:$0xff]  ;;  %930 = vmatpush.bf16.msra.mxu1 %v2311_v1  ;;  %v2326_v5 = vld [vmem:[#allocation3 + $0xb0] sm:$0xff]  ;;  %s2818_s9 = smov (!%p335_p6, %s1997_s9), 1  ;;  %v2309_v9 = vld [vmem:[#allocation3 + $0x28] sm:$0xff]  ;;  %vm696_vm3 = vcmask 1043458   ;;  %vm603_vm5 = vcmask 1046532  }
   0xf   : > { %1026 = vmatpush.bf16.msra.mxu2 %v2327_v3  ;;  %v2335_v6 = vld [vmem:[#allocation3 + $0xf8] sm:$0xff]  ;;  %v2334_v8 = vld [vmem:[#allocation3 + $0xf0] sm:$0xff]  ;;  %v2325_v10 = vld [vmem:[#allocation3 + $0xa8] sm:$0xff]  ;;  %s2301_s14 = sshll.u32 %s2818_s9, 5  ;;  %vm604_vm4 = vsmask.f32 6418 }
  0x10   : > { %1152 = vmatpush.bf16.msra.mxu3 %v2335_v6  ;;  %v2316_v11 = vld [vmem:[#allocation3 + $0x60] sm:$0xff]  ;;  %v2333_v12 = vld [vmem:[#allocation3 + $0xe8] sm:$0xff]  ;;  %s2549_s17 = scalar_lea.vmem %s2798_s0, %s2301_s14  ;;  %v355_v14 = vld [vmem:[%s2799_s1] sm:$0x3]  ;;  %s2557_s22 = scalar_lea.vmem %s2801_s3, %s2301_s14  ;;  %vm644_vm6 = vcmask 1041408  }
  0x11   : > { %856 = vmatpush.bf16.msra.mxu0 %v2318_v2  ;;  %v2308_v13 = vld [vmem:[#allocation3 + $0x20] sm:$0xff]  ;;  %v356_v16 = vld [vmem:[%s2800_s2] sm:$0x3]  ;;  %v376_v19 = vperm.slane %v355_v14, 0  ;;  %v377_v20 = vperm.slane %v355_v14, 1  ;;  %v2314_v39 = vld [vmem:[#allocation3 + $0x50] sm:$0xff] }
  0x12   : > { %931 = vmatpush.bf16.msra.mxu1 %v2310_v4  ;;  %v2324_v15 = vld [vmem:[#allocation3 + $0xa0] sm:$0xff]  ;;  %v2377_v17 = vld [vmem:[%s2549_s17] sm:$0xff]   ;;  %v392_v27 = vperm.slane %v356_v16, 1  ;;  %v391_v33 = vperm.slane %v356_v16, 0  ;;  %v2417_v44 = vld [vmem:[%s2557_s22 + $0x10] sm:$0xff]   ;;  %s2303_s30 = sshll.u32 %s2818_s9, 3 }
  0x13   : > { %1027 = vmatpush.bf16.msra.mxu2 %v2326_v5  ;;  %v2564_v18 = vld [vmem:[%s2549_s17 + $0x8] sm:$0xff]   ;;  %v2315_v21 = vld [vmem:[#allocation3 + $0x58] sm:$0xff]  ;;  %v2378_v25 = vunpack.c.l.bf16 %v2377_v17  ;;  %v378_v26 = vrot.slane %v377_v20, 4  ;;  %v2379_v31 = vunpack.c.h.bf16 %v2377_v17  ;;  %v2306_v45 = vld [vmem:[#allocation3 + $0x10] sm:$0xff]  ;;  %v2402_v47 = vunpack.c.l.bf16 %v2417_v44  ;;  %s349_s12 = scalar_lea.vmem %s2805_s7, %s2303_s30  ;;  %s353_s15 = scalar_lea.vmem %s2806_s8, %s2303_s30 }
  0x14   : > { %1153 = vmatpush.bf16.msra.mxu3 %v2334_v8  ;;  %v2332_v22 = vld [vmem:[#allocation3 + $0xe0] sm:$0xff]  ;;  %v357_v23 = vld [vmem:[%s2802_s4] sm:$0x3]  ;;  %v2383_v32 = vunpack.c.h.bf16 %v2564_v18  ;;  %v393_v36 = vrot.slane %v392_v27, 4  ;;  %v2322_v49 = vld [vmem:[#allocation3 + $0x90] sm:$0xff]  ;;  %v2403_v56 = vunpack.c.h.bf16 %v2417_v44  ;;  %v2486_v8 = vmov 0  }
  0x15   : > { %857 = vmatpush.bf16.msra.mxu0 %v2317_v7  ;;  %v2307_v24 = vld [vmem:[#allocation3 + $0x18] sm:$0xff]  ;;  %v2571_v29 = vld [vmem:[%s2557_s22 + $0x8] sm:$0xff]   ;;  %v2578_v35 = vsel %vm379_vm0, %v376_v19, %v378_v26  ;;  %v421_v37 = vperm.slane %v357_v23, 0  ;;  %v422_v38 = vperm.slane %v357_v23, 1  ;;  %v2414_v54 = vld [vmem:[%s2549_s17 + $0x10] sm:$0xff]  }
  0x16   : > { %932 = vmatpush.bf16.msra.mxu1 %v2309_v9  ;;  %v2393_v28 = vld [vmem:[%s2557_s22] sm:$0xff]   ;;  %v2399_v43 = vunpack.c.h.bf16 %v2571_v29  ;;  %v382_v46 = vmul.f32 %v2378_v25, %v2578_v35  ;;  %v383_v50 = vmul.f32 %v2379_v31, %v2578_v35  ;;  %v385_v51 = vmul.f32 %v2383_v32, %v2578_v35  ;;  %v2313_v58 = vld [vmem:[#allocation3 + $0x48] sm:$0xff]  ;;  %v2330_v59 = vld [vmem:[#allocation3 + $0xd0] sm:$0xff]  ;;  %524 = vst [vmem:[#allocation2] sm:$0x77] %v2486_v8 }
  0x17   : > { %1028 = vmatpush.bf16.msra.mxu2 %v2325_v10  ;;  %v2323_v30 = vld [vmem:[#allocation3 + $0x98] sm:$0xff]  ;;  %v2394_v41 = vunpack.c.l.bf16 %v2393_v28  ;;  %v2395_v42 = vunpack.c.h.bf16 %v2393_v28  ;;  %v423_v48 = vrot.slane %v422_v38, 4  ;;  %v2587_v55 = vsel %vm379_vm0, %v391_v33, %v393_v36  ;;  %v2305_v0 = vld [vmem:[#allocation3 + $0x8] sm:$0xff]  ;;  %526 = vst [vmem:[#allocation2 + $0x18] sm:$0x77] %v2486_v8  ;;  %v2304_v16 = vld [vmem:[#allocation3] sm:$0xff] }
  0x18   : > { %1154 = vmatpush.bf16.msra.mxu3 %v2333_v12  ;;  %v358_v34 = vld [vmem:[%s2803_s5] sm:$0x3]  ;;  %v2386_v1 = vunpack.c.l.bf16 %v2414_v54  ;;  %v396_v2 = vadd.f32 %v2587_v55, %v382_v46  ;;  %v2321_v3 = vld [vmem:[#allocation3 + $0x88] sm:$0xff]  ;;  %v2387_v4 = vunpack.c.h.bf16 %v2414_v54  ;;  %v397_v5 = vadd.f32 %v2587_v55, %v383_v50  ;;  %528 = vst [vmem:[#allocation2 + $0x20] sm:$0x77] %v2486_v8  ;;  %v2342_v31 = vld [vmem:[#allocation3 + $0x130] sm:$0xff] }
  0x19   : > { %858 = vmatpush.bf16.msra.mxu0 %v2316_v11  ;;  %v2331_v40 = vld [vmem:[#allocation3 + $0xd8] sm:$0xff]  ;;  %v435_v52 = vperm.slane %v358_v34, 0  ;;  %v436_v53 = vperm.slane %v358_v34, 1  ;;  %v2590_v57 = vsel %vm379_vm0, %v421_v37, %v423_v48  ;;  %v399_v6 = vadd.f32 %v2587_v55, %v385_v51  ;;  %530 = vst [vmem:[#allocation2 + $0x38] sm:$0x77] %v2486_v8  ;;  %v2350_v33 = vld [vmem:[#allocation3 + $0x170] sm:$0xff]  ;;  %vm2640_vm7 = vmand %vm600_vm1, %vm601_vm2 }
  0x1a   : > { %933 = vmatpush.bf16.msra.mxu1 %v2308_v13  ;;  %v426_v60 = vmul.f32 %v2394_v41, %v2590_v57  ;;  %v427_v61 = vmul.f32 %v2395_v42, %v2590_v57  ;;  %v429_v62 = vmul.f32 %v2399_v43, %v2590_v57  ;;  %v430_v9 = vmul.f32 %v2402_v47, %v2590_v57  ;;  %v2312_v13 = vld [vmem:[#allocation3 + $0x40] sm:$0xff]  ;;  %v2343_v14 = vld [vmem:[#allocation3 + $0x138] sm:$0xff]  ;;  %vm2646_vm10 = vmand %vm603_vm5, %vm604_vm4 }
  0x1b   : > { %1029 = vmatpush.bf16.msra.mxu2 %v2324_v15  ;;  %v437_v63 = vrot.slane %v436_v53, 4  ;;  %v431_v15 = vmul.f32 %v2403_v56, %v2590_v57  ;;  %v387_v23 = vmul.f32 %v2387_v4, %v2578_v35  ;;  %525 = vst [vmem:[#allocation2 + $0x58] sm:$0x77] %v2486_v8  ;;  %v2382_v34 = vunpack.c.l.bf16 %v2564_v18  ;;  %v2340_v46 = vld [vmem:[#allocation3 + $0x120] sm:$0xff]  ;;  %vm2663_vm13 = vmor %vm2646_vm10, %vm2640_vm7 }
  0x1c   : > { %1155 = vmatpush.bf16.msra.mxu3 %v2332_v22  ;;  %v386_v22 = vmul.f32 %v2386_v1, %v2578_v35  ;;  %527 = vst [vmem:[#allocation2 + $0x50] sm:$0x77] %v2486_v8  ;;  %vm718_vm8 = vsmask.f32 1280  ;;  %vm719_vm9 = vsmask.f32 3336 }
  0x1d   : > { %859 = vmatpush.bf16.msra.mxu0 %v2315_v21  ;;  %v2599_v7 = vsel %vm379_vm0, %v435_v52, %v437_v63  ;;  %v2351_v21 = vld [vmem:[#allocation3 + $0x178] sm:$0xff]  ;;  %v681_v32 = vld [vmem:[#allocation2] sm:$0x77]  ;;  %v401_v38 = vadd.f32 %v2587_v55, %v387_v23  ;;  %v384_v42 = vmul.f32 %v2382_v34, %v2578_v35  ;;  %529 = vst [vmem:[#allocation2 + $0x8] sm:$0x77] %v2486_v8  ;;  %vm2651_vm11 = vmor %vm718_vm8, %vm719_vm9 }
  0x1e   : > { %934 = vmatpush.bf16.msra.mxu1 %v2307_v24  ;;  %v440_v10 = vadd.f32 %v2599_v7, %v426_v60  ;;  %v441_v11 = vadd.f32 %v2599_v7, %v427_v61  ;;  %v443_v12 = vadd.f32 %v2599_v7, %v429_v62  ;;  %v444_v24 = vadd.f32 %v2599_v7, %v430_v9 }
  0x1f   : > { %1030 = vmatpush.bf16.msra.mxu2 %v2323_v30  ;;  %v445_v28 = vadd.f32 %v2599_v7, %v431_v15  ;;  %v2398_v30 = vunpack.c.l.bf16 %v2571_v29  ;;  %v400_v37 = vadd.f32 %v2587_v55, %v386_v22  ;;  %v689_v41 = vrot.slane %v681_v32, 2  ;;  %531 = vst [vmem:[#allocation2 + $0x28] sm:$0x77] %v2486_v8  ;;  %v616_v22 = vld [vmem:[#allocation2 + $0x20] sm:$0x77] }
  0x20   : > { %1156 = vmatpush.bf16.msra.mxu3 %v2331_v40  ;;  %v448_v17 = vmax.f32 %v440_v10, 0.0  ;;  %v449_v19 = vmax.f32 %v441_v11, 0.0  ;;  %v451_v20 = vmax.f32 %v443_v12, 0.0  ;;  %v2341_v40 = vld [vmem:[#allocation3 + $0x128] sm:$0xff]  ;;  %v398_v44 = vadd.f32 %v2587_v55, %v384_v42  ;;  %532 = vst [vmem:[#allocation2 + $0x48] sm:$0x77] %v2486_v8 }
  0x21   : > { %860 = vmatpush.bf16.msra.mxu0 %v2314_v39  ;;  %v428_v36 = vmul.f32 %v2398_v30, %v2590_v57  ;;  %v452_v39 = vmax.f32 %v444_v24, 0.0  ;;  %v453_v29 = vmax.f32 %v445_v28, 0.0  ;;  %v697_v18 = vsel %vm696_vm3, %v681_v32, %v689_v41  ;;  %v2656_v11 = vld [vmem:[%s2549_s17 + $0x18] sm:$0xff]  }
  0x22   : > { %935 = vmatpush.bf16.msra.mxu1 %v2306_v45  ;;  %v456_v25 = vadd.f32 %v448_v17, %v396_v2  ;;  %v457_v26 = vadd.f32 %v449_v19, %v397_v5  ;;  %v459_v27 = vadd.f32 %v451_v20, %v399_v6  ;;  %v699_v48 = vrot.slane %v697_v18, 2  ;;  %v610_v19 = vld [vmem:[#allocation2 + $0x18] sm:$0x77] }
  0x23   : > { %1031 = vmatpush.bf16.msra.mxu2 %v2322_v49  ;;  %v442_v43 = vadd.f32 %v2599_v7, %v428_v36  ;;  %v460_v47 = vadd.f32 %v452_v39, %v400_v37  ;;  %v2629_v49 = vld [vmem:[%s2557_s22 + $0x18] sm:$0xff]   ;;  %v461_v50 = vadd.f32 %v453_v29, %v401_v38  ;;  %v695_v61 = vsel %vm644_vm6, %v681_v32, %v689_v41 }
  0x24   : > { %1157 = vmatpush.bf16.msra.mxu3 %v2330_v59  ;;  %472 = vst [vmem:[#allocation1] ss:$2 sm:$0xff] %v456_v25  ;;  %v2406_v53 = vunpack.c.l.bf16 %v2629_v49  ;;  %vm721_vm12 = vsmask.f32 5392  ;;  %v725_v10 = vshrl.u32 %v695_v61, 16  ;;  %v2390_v15 = vunpack.c.l.bf16 %v2656_v11 }
  0x25   : > { %861 = vmatpush.bf16.msra.mxu0 %v2313_v58  ;;  %476 = vst [vmem:[#allocation1 + $0x10] ss:$2 sm:$0xff] %v457_v26  ;;  %v450_v45 = vmax.f32 %v442_v43, 0.0  ;;  %vm723_vm14 = vsmask.f32 7448  ;;  %vm722_vm15 = vmor %vm2651_vm11, %vm721_vm12 }
  0x26   : > { %936 = vmatpush.bf16.msra.mxu1 %v2305_v0  ;;  %484 = vst [vmem:[#allocation1 + $0x30] ss:$2 sm:$0xff] %v459_v27  ;;  %v432_v62 = vmul.f32 %v2406_v53, %v2590_v57  ;;  %v727_v20 = vrot.slane %v725_v10, 6  ;;  %v388_v24 = vmul.f32 %v2390_v15, %v2578_v35  ;;  %vm2677_vm0 = vmor %vm722_vm15, %vm723_vm14  ;;  %v2339_v53 = vld [vmem:[#allocation3 + $0x118] sm:$0xff] }
  0x27   : > { %1032 = vmatpush.bf16.msra.mxu2 %v2321_v3  ;;  %v458_v63 = vadd.f32 %v450_v45, %v398_v44 }
  0x28   : > { %v446_v5 = vadd.f32 %v2599_v7, %v432_v62  ;;  %v402_v32 = vadd.f32 %v2587_v55, %v388_v24 }
  0x29   : > { %862 = vmatpush.bf16.msra.mxu0 %v2312_v13  ;;  %v728_v13 = vshll.u32 %v695_v61, 16  ;;  %480 = vst [vmem:[#allocation1 + $0x20] ss:$2 sm:$0xff] %v458_v63 }
  0x2a   : > { %937 = vmatpush.bf16.msra.mxu1 %v2304_v16  ;;  %v454_v25 = vmax.f32 %v446_v5, 0.0 }
  0x2b   : > { %v2631_v51 = vld.sshfl [vmem:[#allocation1] sm:$0xff pattern:$0x75316420]  ;;  %v2633_v52 = vld.sshfl [vmem:[#allocation1 + $0x8] sm:$0xff pattern:$0x75316420] }
  0x2c   : > { %v477_v54 = vld.sshfl [vmem:[#allocation1 + $0x10] sm:$0xff pattern:$0x75316420]  ;;  %v478_v56 = vld.sshfl [vmem:[#allocation1 + $0x18] sm:$0xff pattern:$0x75316420]  ;;  %v462_v29 = vadd.f32 %v454_v25, %v402_v32 }
  0x2d   : > { %1334 = vmatpush.bf16.msrb.mxu0 %v2343_v14  ;;  %v485_v58 = vld.sshfl [vmem:[#allocation1 + $0x30] sm:$0xff pattern:$0x75316420]  ;;  %v486_v59 = vld.sshfl [vmem:[#allocation1 + $0x38] sm:$0xff pattern:$0x75316420]  ;;  %v516_v60 = vpack.c.bf16 %v478_v56, %v477_v54  ;;  %v515_v54 = vpack.c.bf16 %v2633_v52, %v2631_v51 }
  0x2e   : > { %1432 = vmatpush.bf16.msrb.mxu1 %v2351_v21  ;;  %487 = vst [vmem:[#allocation1] ss:$2 sm:$0xff] %v460_v47  ;;  %v518_v0 = vpack.c.bf16 %v486_v59, %v485_v58  ;;  %v734_v14 = vshll.u32 %v699_v48, 16  ;;  %v730_v23 = vrot.slane %v728_v13, 7  ;;  %v2320_v48 = vld [vmem:[#allocation3 + $0x80] sm:$0xff]  ;;  %v2349_v58 = vld [vmem:[#allocation3 + $0x168] sm:$0xff] }
  0x2f   : > { %490 = vst [vmem:[#allocation1 + $0x10] ss:$2 sm:$0xff] %v461_v50  ;;  %v543_v2 = vshrl.u32 %v516_v60, 16  ;;  %v546_v3 = vshll.u32 %v516_v60, 16  ;;  %v2329_v50 = vld [vmem:[#allocation3 + $0xc8] sm:$0xff]  ;;  %v2359_v59 = vld [vmem:[#allocation3 + $0x1b8] sm:$0xff]  ;;  %1033 = vmatpush.bf16.msra.mxu2 %v2320_v48 }
  0x30   : > { %v557_v6 = vshrl.u32 %v518_v0, 16  ;;  %v560_v8 = vshll.u32 %v518_v0, 16  ;;  %v731_v30 = vor.u32 %v730_v23, %v727_v20  ;;  %v481_v41 = vld.sshfl [vmem:[#allocation1 + $0x20] sm:$0xff pattern:$0x75316420]  ;;  %1158 = vmatpush.bf16.msra.mxu3 %v2329_v50  ;;  %v536_v51 = vshrl.u32 %v515_v54, 16 }
  0x31   : > { %1335 = vmatpush.bf16.msrb.mxu0 %v2342_v31  ;;  %v545_v12 = vrot.slane %v543_v2, 7  ;;  %v736_v31 = vrot.slane %v734_v14, 7  ;;  %v482_v44 = vld.sshfl [vmem:[#allocation1 + $0x28] sm:$0xff pattern:$0x75316420] }
  0x32   : > { %1433 = vmatpush.bf16.msrb.mxu1 %v2350_v33  ;;  %v559_v16 = vrot.slane %v557_v6, 7  ;;  %493 = vst [vmem:[#allocation1 + $0x20] ss:$2 sm:$0xff] %v462_v29  ;;  %v517_v15 = vpack.c.bf16 %v482_v44, %v481_v41  ;;  %v538_v23 = vrot.slane %v536_v51, 7  ;;  %v607_v50 = vld [vmem:[#allocation2 + $0x58] sm:$0x77] }
  0x33   : > { %v548_v21 = vor.u32 %v546_v3, %v545_v12  ;;  %1559 = vmatpush.bf16.msrb.mxu2 %v2359_v59 }
  0x34   : > { %v562_v26 = vor.u32 %v560_v8, %v559_v16  ;;  %v553_v41 = vshll.u32 %v517_v15, 16 }
  0x35   : > { %1336 = vmatpush.bf16.msrb.mxu0 %v2341_v40  ;;  %v488_v27 = vld.sshfl [vmem:[#allocation1] sm:$0xff pattern:$0x75316420]  ;;  %v611_v28 = vsel %vm2663_vm13, %v548_v21, %v610_v19  ;;  %v489_v38 = vld.sshfl [vmem:[#allocation1 + $0x8] sm:$0xff pattern:$0x75316420] }
  0x36   : > { %v491_v33 = vld.sshfl [vmem:[#allocation1 + $0x10] sm:$0xff pattern:$0x75316420]  ;;  %v492_v34 = vld.sshfl [vmem:[#allocation1 + $0x18] sm:$0xff pattern:$0x75316420]  ;;  %v617_v36 = vsel %vm2663_vm13, %v562_v26, %v616_v22  ;;  %1434 = vmatpush.bf16.msrb.mxu1 %v2349_v58  ;;  %v519_v16 = vpack.c.bf16 %v489_v38, %v488_v27 }
  0x37   : > { %v520_v39 = vpack.c.bf16 %v492_v34, %v491_v33  ;;  %612 = vst [vmem:[#allocation2 + $0x18] sm:$0x77] %v611_v28  ;;  %v732_v40 = vrot.slane %v731_v30, 2  ;;  %v539_v33 = vshll.u32 %v515_v54, 16 }
  0x38   : > { %618 = vst [vmem:[#allocation2 + $0x20] sm:$0x77] %v617_v36 }
  0x39   : > { %1337 = vmatpush.bf16.msrb.mxu0 %v2340_v46  ;;  %v571_v42 = vshrl.u32 %v520_v39, 16  ;;  %v574_v43 = vshll.u32 %v520_v39, 16  ;;  %v2683_v18 = vsel %vm2677_vm0, %v732_v40, %v736_v31  ;;  %v622_v46 = vld [vmem:[#allocation2 + $0x38] sm:$0x77]  ;;  %v550_v39 = vshrl.u32 %v517_v15, 16 }
  0x3a   : > { %795 = vst [vmem:[#allocation1] ss:$4 sm:$0xff] %v2683_v18  ;;  %v494_v10 = vld.sshfl [vmem:[#allocation1 + $0x20] sm:$0xff pattern:$0x75316420]  ;;  %v564_v40 = vshrl.u32 %v519_v16, 16  ;;  %v541_v38 = vor.u32 %v539_v33, %v538_v23 }
  0x3b   : > { %v573_v45 = vrot.slane %v571_v42, 7  ;;  %v495_v14 = vld.sshfl [vmem:[#allocation1 + $0x28] sm:$0xff pattern:$0x75316420] }
  0x3c   : > { %v521_v32 = vpack.c.bf16 %v495_v14, %v494_v10  ;;  %v566_v58 = vrot.slane %v564_v40, 7  ;;  %v608_v51 = vsel %vm2663_vm13, %v541_v38, %v607_v50  ;;  %v2348_v23 = vld [vmem:[#allocation3 + $0x160] sm:$0xff] }
  0x3d   : > { %v576_v47 = vor.u32 %v574_v43, %v573_v45  ;;  %1338 = vmatpush.bf16.msrb.mxu0 %v2339_v53  ;;  %609 = vst [vmem:[#allocation2 + $0x58] sm:$0x77] %v608_v51  ;;  %1435 = vmatpush.bf16.msrb.mxu1 %v2348_v23 }
  0x3e   : > { %v682_v56 = vld [vmem:[#allocation2 + $0x18] sm:$0x77] }
  0x3f   : > { %v623_v60 = vsel %vm2663_vm13, %v576_v47, %v622_v46  ;;  %v683_v61 = vld [vmem:[#allocation2 + $0x20] sm:$0x77]  ;;  %v690_v62 = vrot.slane %v682_v56, 2  ;;  %v633_v48 = vld [vmem:[#allocation2 + $0x18] sm:$0x33] }
  0x40   : > { %624 = vst [vmem:[#allocation2 + $0x38] sm:$0x77] %v623_v60  ;;  %v691_v63 = vrot.slane %v683_v61, 2  ;;  %v632_v47 = vld [vmem:[#allocation2] sm:$0x33]  ;;  %v567_v60 = vshll.u32 %v519_v16, 16 }
  0x41   : > { %v702_v0 = vsel %vm644_vm6, %v682_v56, %v690_v62  ;;  %v703_v1 = vsel %vm696_vm3, %v682_v56, %v690_v62  ;;  %v552_v56 = vrot.slane %v550_v39, 7  ;;  %v581_v62 = vshll.u32 %v521_v32, 16 }
  0x42   : > { %v705_v52 = vrot.slane %v703_v1, 2  ;;  %v708_v2 = vsel %vm644_vm6, %v683_v61, %v691_v63  ;;  %v709_v3 = vsel %vm696_vm3, %v683_v61, %v691_v63  ;;  %v738_v4 = vshrl.u32 %v702_v0, 16  ;;  %v613_v63 = vld [vmem:[#allocation2 + $0x50] sm:$0x77] }
  0x43   : > { %v711_v5 = vrot.slane %v709_v3, 2  ;;  %v741_v6 = vshll.u32 %v702_v0, 16  ;;  %v751_v8 = vshrl.u32 %v708_v2, 16  ;;  %v754_v9 = vshll.u32 %v708_v2, 16 }
  0x44   : > { %v740_v12 = vrot.slane %v738_v4, 6  ;;  %v747_v13 = vshll.u32 %v705_v52, 16  ;;  %v578_v61 = vshrl.u32 %v521_v32, 16  ;;  %v555_v1 = vor.u32 %v553_v41, %v552_v56  ;;  %v619_v52 = vld [vmem:[#allocation2 + $0x8] sm:$0x77]  ;;  %v2347_v41 = vld [vmem:[#allocation3 + $0x158] sm:$0xff] }
  0x45   : > { %v743_v19 = vrot.slane %v741_v6, 7  ;;  %v753_v20 = vrot.slane %v751_v8, 6  ;;  %v756_v21 = vrot.slane %v754_v9, 7  ;;  %v760_v22 = vshll.u32 %v711_v5, 16  ;;  %v634_v4 = vld [vmem:[#allocation2 + $0x20] sm:$0x33]  ;;  %1436 = vmatpush.bf16.msrb.mxu1 %v2347_v41 }
  0x46   : > { %v749_v26 = vrot.slane %v747_v13, 7  ;;  %v2391_v2 = vunpack.c.h.bf16 %v2656_v11  ;;  %v569_v5 = vor.u32 %v567_v60, %v566_v58  ;;  %v580_v6 = vrot.slane %v578_v61, 7  ;;  %v625_v13 = vld [vmem:[#allocation2 + $0x28] sm:$0x77]  ;;  %v1042_v38 = vld [vmem:[#allocation2 + $0x58] sm:$0x33] }
  0x47   : > { %v684_v24 = vld [vmem:[#allocation2 + $0x38] sm:$0x77]  ;;  %v744_v25 = vor.u32 %v743_v19, %v740_v12  ;;  %v757_v28 = vor.u32 %v756_v21, %v753_v20  ;;  %v762_v30 = vrot.slane %v760_v22, 7  ;;  %v2407_v8 = vunpack.c.h.bf16 %v2629_v49  ;;  %v2328_v22 = vld [vmem:[#allocation3 + $0xc0] sm:$0xff]  ;;  %v2338_v49 = vld [vmem:[#allocation3 + $0x110] sm:$0xff] }
  0x48   : > { %v692_v31 = vrot.slane %v684_v24, 2  ;;  %v640_v9 = vrot.slane %v632_v47, 2  ;;  %v641_v10 = vrot.slane %v633_v48, 2  ;;  %v614_v12 = vsel %vm2663_vm13, %v555_v1, %v613_v63  ;;  %v635_v16 = vld [vmem:[#allocation2 + $0x38] sm:$0x33]  ;;  %1159 = vmatpush.bf16.msra.mxu3 %v2328_v22  ;;  %1339 = vmatpush.bf16.msrb.mxu0 %v2338_v49 }
  0x49   : > { %v745_v34 = vrot.slane %v744_v25, 2  ;;  %v758_v36 = vrot.slane %v757_v28, 2  ;;  %v389_v14 = vmul.f32 %v2391_v2, %v2578_v35  ;;  %v583_v19 = vor.u32 %v581_v62, %v580_v6  ;;  %615 = vst [vmem:[#allocation2 + $0x50] sm:$0x77] %v614_v12  ;;  %v2358_v25 = vld [vmem:[#allocation3 + $0x1b0] sm:$0xff] }
  0x4a   : > { %v714_v29 = vsel %vm644_vm6, %v684_v24, %v692_v31  ;;  %v715_v27 = vsel %vm696_vm3, %v684_v24, %v692_v31  ;;  %v620_v11 = vsel %vm2663_vm13, %v569_v5, %v619_v52  ;;  %v433_v20 = vmul.f32 %v2407_v8, %v2590_v57  ;;  %1560 = vmatpush.bf16.msrb.mxu2 %v2358_v25  ;;  %v1168_v56 = vld [vmem:[#allocation2 + $0x58] sm:$0x77] }
  0x4b   : > { %v717_v42 = vrot.slane %v715_v27, 2  ;;  %v2698_v43 = vsel %vm2677_vm0, %v745_v34, %v749_v26  ;;  %v2702_v44 = vsel %vm2677_vm0, %v758_v36, %v762_v30  ;;  %v764_v45 = vshrl.u32 %v714_v29, 16  ;;  %621 = vst [vmem:[#allocation2 + $0x8] sm:$0x77] %v620_v11  ;;  %v2337_v27 = vld [vmem:[#allocation3 + $0x108] sm:$0xff]  ;;  %v2355_v25 = vld [vmem:[#allocation3 + $0x198] sm:$0xff] }
  0x4c   : > { %v767_v46 = vshll.u32 %v714_v29, 16  ;;  %798 = vst [vmem:[#allocation1 + $0x1] ss:$4 sm:$0xff] %v2698_v43  ;;  %v642_v21 = vrot.slane %v634_v4, 2  ;;  %v626_v35 = vsel %vm2663_vm13, %v583_v19, %v625_v13  ;;  %v403_v26 = vadd.f32 %v2587_v55, %v389_v14  ;;  %1340 = vmatpush.bf16.msrb.mxu0 %v2337_v27  ;;  %v2364_v27 = vld [vmem:[#allocation3 + $0x1e0] sm:$0xff] }
  0x4d   : > { %v766_v53 = vrot.slane %v764_v45, 6  ;;  %v773_v54 = vshll.u32 %v717_v42, 16  ;;  %801 = vst [vmem:[#allocation1 + $0x2] ss:$4 sm:$0xff] %v2702_v44  ;;  %v447_v28 = vadd.f32 %v2599_v7, %v433_v20  ;;  %v643_v57 = vrot.slane %v635_v16, 2  ;;  %v2357_v42 = vld [vmem:[#allocation3 + $0x1a8] sm:$0xff] }
  0x4e   : > { %v769_v59 = vrot.slane %v767_v46, 7  ;;  %v647_v30 = vsel %vm644_vm6, %v632_v47, %v640_v9  ;;  %627 = vst [vmem:[#allocation2 + $0x28] sm:$0x77] %v626_v35  ;;  %v651_v32 = vsel %vm644_vm6, %v633_v48, %v641_v10  ;;  %v655_v33 = vsel %vm644_vm6, %v634_v4, %v642_v21  ;;  %v2367_v45 = vld [vmem:[#allocation3 + $0x1f8] sm:$0xff]  ;;  %v2336_v46 = vld [vmem:[#allocation3 + $0x100] sm:$0xff]  ;;  %1561 = vmatpush.bf16.msrb.mxu2 %v2357_v42  ;;  %v2346_v47 = vld [vmem:[#allocation3 + $0x150] sm:$0xff] }
  0x4f   : > { %v775_v0 = vrot.slane %v773_v54, 7  ;;  %v455_v31 = vmax.f32 %v447_v28, 0.0  ;;  %v659_v55 = vsel %vm644_vm6, %v635_v16, %v643_v57  ;;  %v661_v36 = vrot.slane %v647_v30, 2  ;;  %v2356_v48 = vld [vmem:[#allocation3 + $0x1a0] sm:$0xff]  ;;  %1741 = vmatpush.bf16.msrb.mxu3 %v2367_v45  ;;  %v2366_v54 = vld [vmem:[#allocation3 + $0x1f0] sm:$0xff]  ;;  %1437 = vmatpush.bf16.msrb.mxu1 %v2346_v47  ;;  %v2365_v57 = vld [vmem:[#allocation3 + $0x1e8] sm:$0xff] }
  0x50   : > { %v770_v3 = vor.u32 %v769_v59, %v766_v53  ;;  %v662_v7 = vrot.slane %v651_v32, 2  ;;  %v663_v39 = vrot.slane %v655_v33, 2  ;;  %v664_v29 = vrot.slane %v659_v55, 2  ;;  %v1043_v50 = vld [vmem:[#allocation2 + $0x50] sm:$0x33]  ;;  %1341 = vmatpush.bf16.msrb.mxu0 %v2336_v46  ;;  %v2375_v30 = vld [vmem:[#allocation3 + $0x238] sm:$0xff] }
  0x51   : > { %v463_v34 = vadd.f32 %v455_v31, %v403_v26  ;;  %v1050_v53 = vrot.slane %v1042_v38, 2  ;;  %v1169_v59 = vld [vmem:[#allocation2 + $0x50] sm:$0x77]  ;;  %v944_v61 = vrot.slane %v2683_v18, 2  ;;  %v945_v62 = vrot.slane %v2698_v43, 2  ;;  %v2344_v55 = vld [vmem:[#allocation3 + $0x140] sm:$0xff] }
  0x52   : > { %v771_v15 = vrot.slane %v770_v3, 2  ;;  %v1044_v58 = vld [vmem:[#allocation2 + $0x8] sm:$0x33]  ;;  %v946_v63 = vrot.slane %v2702_v44, 2  ;;  %1562 = vmatpush.bf16.msrb.mxu2 %v2356_v48  ;;  %v1176_v51 = vrot.slane %v1168_v56, 2  ;;  %v1051_v52 = vrot.slane %v1043_v50, 2 }
  0x53   : > { %496 = vst [vmem:[#allocation1 + $0x30] ss:$2 sm:$0xff] %v463_v34  ;;  %v1170_v60 = vld [vmem:[#allocation2 + $0x8] sm:$0x77]  ;;  %v1052_v2 = vrot.slane %v1044_v58, 2  ;;  %1742 = vmatpush.bf16.msrb.mxu3 %v2366_v54  ;;  %v1177_v3 = vrot.slane %v1169_v59, 2  ;;  %v2734_v5 = vsel %vm644_vm6, %v1042_v38, %v1050_v53 }
  0x54   : > { %v2718_v24 = vsel %vm2677_vm0, %v771_v15, %v775_v0  ;;  %v1178_v4 = vrot.slane %v1170_v60, 2  ;;  %v2737_v44 = vsel %vm696_vm3, %v1168_v56, %v1176_v51  ;;  %v1182_v10 = vsel %vm644_vm6, %v1168_v56, %v1176_v51  ;;  %v2374_v38 = vld [vmem:[#allocation3 + $0x230] sm:$0xff] }
  0x55   : > { %804 = vst [vmem:[#allocation1 + $0x3] ss:$4 sm:$0xff] %v2718_v24  ;;  %v947_v0 = vrot.slane %v2718_v24, 2  ;;  %v1171_v1 = vld [vmem:[#allocation2 + $0x28] sm:$0x77]  ;;  %v2741_v12 = vsel %vm644_vm6, %v1043_v50, %v1051_v52  ;;  %v1070_v13 = vrot.slane %v2734_v5, 2  ;;  %v1188_v14 = vsel %vm644_vm6, %v1169_v59, %v1177_v3 }
  0x56   : > { %v1045_v43 = vld [vmem:[#allocation2 + $0x28] sm:$0x33]  ;;  %v1179_v9 = vrot.slane %v1171_v1, 2  ;;  %v1185_v19 = vrot.slane %v2737_v44, 2  ;;  %v1189_v11 = vsel %vm696_vm3, %v1169_v59, %v1177_v3  ;;  %v1194_v20 = vsel %vm644_vm6, %v1170_v60, %v1178_v4  ;;  %1563 = vmatpush.bf16.msrb.mxu2 %v2355_v25  ;;  %v2363_v3 = vld [vmem:[#allocation3 + $0x1d8] sm:$0xff] }
  0x57   : > { %v1053_v16 = vrot.slane %v1045_v43, 2  ;;  %v1064_v21 = vsel %vm644_vm6, %v1044_v58, %v1052_v2  ;;  %v1204_v49 = vshrl.u32 %v1182_v10, 16  ;;  %v1207_v23 = vshll.u32 %v1182_v10, 16  ;;  %v2345_v24 = vld [vmem:[#allocation3 + $0x148] sm:$0xff]  ;;  %1743 = vmatpush.bf16.msrb.mxu3 %v2365_v57  ;;  %v2370_v57 = vld [vmem:[#allocation3 + $0x210] sm:$0xff] }
  0x58   : > { %v1200_v22 = vsel %vm644_vm6, %v1171_v1, %v1179_v9  ;;  %v1071_v35 = vrot.slane %v2741_v12, 2  ;;  %v1217_v26 = vshrl.u32 %v1188_v14, 16  ;;  %v1220_v28 = vshll.u32 %v1188_v14, 16  ;;  %1438 = vmatpush.bf16.msrb.mxu1 %v2345_v24  ;;  %v2353_v2 = vld [vmem:[#allocation3 + $0x188] sm:$0xff]  ;;  %v2362_v12 = vld [vmem:[#allocation3 + $0x1d0] sm:$0xff] }
  0x59   : > { %v1195_v32 = vsel %vm696_vm3, %v1170_v60, %v1178_v4  ;;  %v1230_v33 = vshrl.u32 %v1194_v20, 16  ;;  %v1233_v34 = vshll.u32 %v1194_v20, 16  ;;  %v1072_v42 = vrot.slane %v1064_v21, 2  ;;  %v2373_v4 = vld [vmem:[#allocation3 + $0x228] sm:$0xff] }
  0x5a   : > { %v497_v18 = vld.sshfl [vmem:[#allocation1 + $0x30] sm:$0xff pattern:$0x75316420]  ;;  %v498_v6 = vld.sshfl [vmem:[#allocation1 + $0x38] sm:$0xff pattern:$0x75316420]  ;;  %v1201_v45 = vsel %vm696_vm3, %v1171_v1, %v1179_v9 }
  0x5b   : > { %v522_v15 = vpack.c.bf16 %v498_v6, %v497_v18  ;;  %v1206_v46 = vrot.slane %v1204_v49, 6  ;;  %v1209_v47 = vrot.slane %v1207_v23, 7  ;;  %v1191_v48 = vrot.slane %v1189_v11, 2  ;;  %1744 = vmatpush.bf16.msrb.mxu3 %v2364_v27  ;;  %v2352_v9 = vld [vmem:[#allocation3 + $0x180] sm:$0xff] }
  0x5c   : > { %v805_v40 = vld.sshfl [vmem:[#allocation1] sm:$0xff pattern:$0x73625140]  ;;  %v1219_v50 = vrot.slane %v1217_v26, 6  ;;  %v1222_v53 = vrot.slane %v1220_v28, 7  ;;  %v1197_v58 = vrot.slane %v1195_v32, 2  ;;  %1439 = vmatpush.bf16.msrb.mxu1 %v2344_v55 }
  0x5d   : > { %863 = vmatmul.bf16.vlgmr.msra.gmra.mxu0 %v805_v40  ;;  %870 = vst [vmem:[#allocation1] ss:$4 sm:$0xff] %v661_v36  ;;  %v585_v31 = vshrl.u32 %v522_v15, 16  ;;  %v2354_v36 = vld [vmem:[#allocation3 + $0x190] sm:$0xff]  ;;  %v1243_v40 = vshrl.u32 %v1200_v22, 16  ;;  %v1232_v59 = vrot.slane %v1230_v33, 6  ;;  %v1210_v1 = vor.u32 %v1209_v47, %v1206_v46 }
  0x5e   : > { %873 = vst [vmem:[#allocation1 + $0x1] ss:$4 sm:$0xff] %v662_v7  ;;  %v588_v7 = vshll.u32 %v522_v15, 16  ;;  %1839 = vmatpush.bf16.msra.mxu0 %v2375_v30  ;;  %v1235_v60 = vrot.slane %v1233_v34, 7  ;;  %1564 = vmatpush.bf16.msrb.mxu2 %v2354_v36  ;;  %v1213_v52 = vshll.u32 %v1185_v19, 16  ;;  %v1223_v5 = vor.u32 %v1222_v53, %v1219_v50  ;;  %v2371_v26 = vld [vmem:[#allocation3 + $0x218] sm:$0xff] }
  0x5f   : > { %876 = vst [vmem:[#allocation1 + $0x2] ss:$4 sm:$0xff] %v663_v39  ;;  %v1068_v39 = vsel %vm644_vm6, %v1045_v43, %v1053_v16  ;;  %v587_v41 = vrot.slane %v585_v31, 7  ;;  %v1226_v18 = vshll.u32 %v1191_v48, 16  ;;  %v1239_v43 = vshll.u32 %v1197_v58, 16  ;;  %1745 = vmatpush.bf16.msrb.mxu3 %v2363_v3  ;;  %v2360_v28 = vld [vmem:[#allocation3 + $0x1c0] sm:$0xff] }
  0x60   : > { %879 = vst [vmem:[#allocation1 + $0x3] ss:$4 sm:$0xff] %v664_v29  ;;  %v1246_v29 = vshll.u32 %v1200_v22, 16  ;;  %v1073_v56 = vrot.slane %v1068_v39, 2  ;;  %v1211_v14 = vrot.slane %v1210_v1, 2  ;;  %v1215_v15 = vrot.slane %v1213_v52, 7 }
  0x61   : > { %v590_v54 = vor.u32 %v588_v7, %v587_v41  ;;  %v1224_v16 = vrot.slane %v1223_v5, 2  ;;  %v1228_v19 = vrot.slane %v1226_v18, 7  ;;  %v1241_v17 = vrot.slane %v1239_v43, 7  ;;  %v1575_v30 = vld [vmem:[#allocation2 + $0x18] sm:$0x77] }
  0x62   : > { %v1248_v51 = vrot.slane %v1246_v29, 7  ;;  %1840 = vmatpush.bf16.msra.mxu0 %v2374_v38  ;;  %1565 = vmatpush.bf16.msrb.mxu2 %v2353_v2  ;;  %v1216_v22 = vsel %vm2677_vm0, %v1211_v14, %v1215_v15  ;;  %v1449_v31 = vld [vmem:[#allocation2 + $0x18] sm:$0x33]  ;;  %v1576_v32 = vld [vmem:[#allocation2 + $0x20] sm:$0x77]  ;;  %v1583_v39 = vrot.slane %v1575_v30, 2 }
  0x63   : > { %1746 = vmatpush.bf16.msrb.mxu3 %v2362_v12  ;;  %v1229_v49 = vsel %vm2677_vm0, %v1224_v16, %v1228_v19  ;;  %v1450_v33 = vld [vmem:[#allocation2 + $0x20] sm:$0x33]  ;;  %v1451_v34 = vld [vmem:[#allocation2 + $0x38] sm:$0x33]  ;;  %v1350_v36 = vrot.slane %v1216_v22, 2  ;;  %v1457_v27 = vrot.slane %v1449_v31, 2 }
  0x64   : > { %v1577_v55 = vld [vmem:[#allocation2 + $0x38] sm:$0x77]  ;;  %v1584_v38 = vrot.slane %v1576_v32, 2  ;;  %v1589_v53 = vsel %vm644_vm6, %v1575_v30, %v1583_v39  ;;  %v1590_v52 = vsel %vm696_vm3, %v1575_v30, %v1583_v39 }
  0x65   : > { %v1585_v46 = vrot.slane %v1577_v55, 2  ;;  %v1592_v12 = vrot.slane %v1590_v52, 2 }
  0x66   : > { %1841 = vmatpush.bf16.msra.mxu0 %v2373_v4  ;;  %1566 = vmatpush.bf16.msrb.mxu2 %v2352_v9  ;;  %v1596_v5 = vsel %vm696_vm3, %v1576_v32, %v1584_v38 }
  0x67   : > { %v880_v8 = vld.sshfl [vmem:[#allocation1] sm:$0xff pattern:$0x73625140]  ;;  %v1602_v9 = vsel %vm696_vm3, %v1577_v55, %v1585_v46  ;;  %v1598_v19 = vrot.slane %v1596_v5, 2 }
  0x68   : > { %966 = vst [vmem:[#allocation1] ss:$4 sm:$0xff] %v944_v61  ;;  %938 = vmatmul.bf16.vlgmr.msra.gmra.mxu1 %v880_v8  ;;  %v628_v61 = vld [vmem:[#allocation2 + $0x48] sm:$0x77]  ;;  %v1236_v8 = vor.u32 %v1235_v60, %v1232_v59  ;;  %v1601_v60 = vsel %vm644_vm6, %v1577_v55, %v1585_v46 }
  0x69   : > { %969 = vst [vmem:[#allocation1 + $0x1] ss:$4 sm:$0xff] %v945_v62  ;;  %v629_v6 = vsel %vm2663_vm13, %v590_v54, %v628_v61  ;;  %v1463_v54 = vsel %vm644_vm6, %v1449_v31, %v1457_v27  ;;  %v1637_v18 = vshrl.u32 %v1601_v60, 16  ;;  %v1633_v30 = vshll.u32 %v1598_v19, 16 }
  0x6a   : > { %972 = vst [vmem:[#allocation1 + $0x2] ss:$4 sm:$0xff] %v946_v63  ;;  %v1203_v63 = vrot.slane %v1201_v45, 2  ;;  %v1237_v11 = vrot.slane %v1236_v8, 2  ;;  %v1459_v45 = vrot.slane %v1451_v34, 2  ;;  %v1477_v1 = vrot.slane %v1463_v54, 2 }
  0x6b   : > { %975 = vst [vmem:[#allocation1 + $0x3] ss:$4 sm:$0xff] %v947_v0  ;;  %v1245_v0 = vrot.slane %v1243_v40, 6  ;;  %v1351_v40 = vrot.slane %v1229_v49, 2  ;;  %v2368_v8 = vld [vmem:[#allocation3 + $0x200] sm:$0xff]  ;;  %v1635_v39 = vrot.slane %v1633_v30, 7 }
  0x6c   : > { %v1252_v10 = vshll.u32 %v1203_v63, 16  ;;  %630 = vst [vmem:[#allocation2 + $0x48] sm:$0x77] %v629_v6  ;;  %v1242_v24 = vsel %vm2677_vm0, %v1237_v11, %v1241_v17  ;;  %v1471_v61 = vsel %vm644_vm6, %v1451_v34, %v1459_v45  ;;  %v1611_v63 = vshrl.u32 %v1589_v53, 16 }
  0x6d   : > { %v1249_v44 = vor.u32 %v1248_v51, %v1245_v0  ;;  %v1352_v29 = vrot.slane %v1242_v24, 2  ;;  %v1614_v0 = vshll.u32 %v1589_v53, 16  ;;  %v2369_v51 = vld [vmem:[#allocation3 + $0x208] sm:$0xff]  ;;  %v1640_v6 = vshll.u32 %v1601_v60, 16 }
  0x6e   : > { %v1254_v21 = vrot.slane %v1252_v10, 7  ;;  %v1613_v14 = vrot.slane %v1611_v63, 6  ;;  %v1479_v16 = vrot.slane %v1471_v61, 2 }
  0x6f   : > { %v1250_v20 = vrot.slane %v1249_v44, 2  ;;  %v1616_v15 = vrot.slane %v1614_v0, 7 }
  0x71   : > { %v1255_v25 = vsel %vm2677_vm0, %v1250_v20, %v1254_v21  ;;  %v1604_v21 = vrot.slane %v1602_v9, 2 }
  0x72   : > { %v976_v62 = vld.sshfl [vmem:[#allocation1] sm:$0xff pattern:$0x73625140]  ;;  %v1353_v41 = vrot.slane %v1255_v25, 2 }
  0x73   : > { %1034 = vmatmul.bf16.vlgmr.msra.gmra.mxu2 %v976_v62  ;;  %1092 = vst [vmem:[#allocation1] ss:$4 sm:$0xff] %v1070_v13  ;;  %v2372_v13 = vld [vmem:[#allocation3 + $0x220] sm:$0xff]  ;;  %v1578_v7 = vld [vmem:[#allocation2 + $0x48] sm:$0x77] }
  0x74   : > { %1095 = vst [vmem:[#allocation1 + $0x1] ss:$4 sm:$0xff] %v1071_v35  ;;  %1842 = vmatpush.bf16.msra.mxu0 %v2372_v13  ;;  %v2361_v35 = vld [vmem:[#allocation3 + $0x1c8] sm:$0xff]  ;;  %v1586_v50 = vrot.slane %v1578_v7, 2 }
  0x75   : > { %1098 = vst [vmem:[#allocation1 + $0x2] ss:$4 sm:$0xff] %v1072_v42  ;;  %1747 = vmatpush.bf16.msrb.mxu3 %v2361_v35  ;;  %v1458_v42 = vrot.slane %v1450_v33, 2  ;;  %v1452_v48 = vld [vmem:[#allocation2 + $0x48] sm:$0x33] }
  0x76   : > { %1101 = vst [vmem:[#allocation1 + $0x3] ss:$4 sm:$0xff] %v1073_v56  ;;  %v1595_v56 = vsel %vm644_vm6, %v1576_v32, %v1584_v38  ;;  %v1460_v58 = vrot.slane %v1452_v48, 2  ;;  %v1607_v62 = vsel %vm644_vm6, %v1578_v7, %v1586_v50  ;;  %v1608_v13 = vsel %vm696_vm3, %v1578_v7, %v1586_v50 }
  0x77   : > { %v1467_v59 = vsel %vm644_vm6, %v1450_v33, %v1458_v42  ;;  %v1624_v2 = vshrl.u32 %v1595_v56, 16  ;;  %v1627_v3 = vshll.u32 %v1595_v56, 16  ;;  %v1650_v44 = vshrl.u32 %v1607_v62, 16 }
  0x78   : > { %1843 = vmatpush.bf16.msra.mxu0 %v2371_v26  ;;  %v1478_v4 = vrot.slane %v1467_v59, 2  ;;  %v1475_v43 = vsel %vm644_vm6, %v1452_v48, %v1460_v58  ;;  %v1653_v10 = vshll.u32 %v1607_v62, 16  ;;  %v1617_v26 = vor.u32 %v1616_v15, %v1613_v14 }
  0x79   : > { %1748 = vmatpush.bf16.msrb.mxu3 %v2360_v28  ;;  %v1626_v11 = vrot.slane %v1624_v2, 6  ;;  %v1629_v17 = vrot.slane %v1627_v3, 7  ;;  %v1480_v20 = vrot.slane %v1475_v43, 2  ;;  %v1620_v28 = vshll.u32 %v1592_v12, 16 }
  0x7a   : > { %v1655_v35 = vrot.slane %v1653_v10, 7  ;;  %v1646_v32 = vshll.u32 %v1604_v21, 16  ;;  %v1618_v55 = vrot.slane %v1617_v26, 2 }
  0x7c   : > { %1844 = vmatpush.bf16.msra.mxu0 %v2370_v57  ;;  %v1630_v57 = vor.u32 %v1629_v17, %v1626_v11 }
  0x7d   : > { %v1102_v23 = vld.sshfl [vmem:[#allocation1] sm:$0xff pattern:$0x73625140] }
  0x7e   : > { %1160 = vmatmul.bf16.vlgmr.msra.gmra.mxu3 %v1102_v23  ;;  %1274 = vst [vmem:[#allocation1] ss:$4 sm:$0xff] %v1216_v22  ;;  %v1639_v22 = vrot.slane %v1637_v18, 6  ;;  %v1631_v7 = vrot.slane %v1630_v57, 2 }
  0x7f   : > { %1277 = vst [vmem:[#allocation1 + $0x1] ss:$4 sm:$0xff] %v1229_v49  ;;  %v1642_v49 = vrot.slane %v1640_v6, 7 }
  0x80   : > { %1280 = vst [vmem:[#allocation1 + $0x2] ss:$4 sm:$0xff] %v1242_v24  ;;  %1845 = vmatpush.bf16.msra.mxu0 %v2369_v51  ;;  %v1610_v24 = vrot.slane %v1608_v13, 2  ;;  %v1636_v42 = vsel %vm2677_vm0, %v1631_v7, %v1635_v39 }
  0x81   : > { %1283 = vst [vmem:[#allocation1 + $0x3] ss:$4 sm:$0xff] %v1255_v25  ;;  %v1652_v25 = vrot.slane %v1650_v44, 6  ;;  %v1643_v31 = vor.u32 %v1642_v49, %v1639_v22  ;;  %v1758_v50 = vrot.slane %v1636_v42, 2 }
  0x82   : > { %v1659_v34 = vshll.u32 %v1610_v24, 16 }
  0x83   : > { %v1656_v33 = vor.u32 %v1655_v35, %v1652_v25 }
  0x84   : > { %1846 = vmatpush.bf16.msra.mxu0 %v2368_v8  ;;  %v1661_v38 = vrot.slane %v1659_v34, 7 }
  0x85   : > { %v1657_v27 = vrot.slane %v1656_v33, 2 }
  0x88   : > { %v1284_v47 = vld.sshfl [vmem:[#allocation1] sm:$0xff pattern:$0x73625140] }
  0x89   : > { %1342 = vmatmul.bf16.vlgmr.msrb.gmra.mxu0 %v1284_v47  ;;  %1372 = vst [vmem:[#allocation1] ss:$4 sm:$0xff] %v1350_v36  ;;  %v1622_v36 = vrot.slane %v1620_v28, 7  ;;  %v1662_v47 = vsel %vm2677_vm0, %v1657_v27, %v1661_v38 }
  0x8a   : > { %1375 = vst [vmem:[#allocation1 + $0x1] ss:$4 sm:$0xff] %v1351_v40  ;;  %v1644_v40 = vrot.slane %v1643_v31, 2  ;;  %v1760_v56 = vrot.slane %v1662_v47, 2 }
  0x8b   : > { %1378 = vst [vmem:[#allocation1 + $0x2] ss:$4 sm:$0xff] %v1352_v29  ;;  %v1648_v29 = vrot.slane %v1646_v32, 7 }
  0x8c   : > { %1381 = vst [vmem:[#allocation1 + $0x3] ss:$4 sm:$0xff] %v1353_v41  ;;  %v1623_v41 = vsel %vm2677_vm0, %v1618_v55, %v1622_v36 }
  0x8d   : > { %v1649_v46 = vsel %vm2677_vm0, %v1644_v40, %v1648_v29  ;;  %v1757_v48 = vrot.slane %v1623_v41, 2  ;;  %v1878_v40 = vlaneseq }
  0x8e   : > { %v1759_v53 = vrot.slane %v1649_v46, 2 }
  0x8f   : > { %v1879_v38 = vshrl.u32 %v1878_v40, 7 }
  0x91   : > { %vm1882_vm1 = vcmp.eq.s32.totalorder %v1879_v38, 2  ;;  %vm1881_vm2 = vcmp.eq.s32.totalorder %v1879_v38, 1  ;;  %vm1880_vm3 = vcmp.eq.s32.totalorder %v1879_v38, 0 }
  0x93   : > { %v1382_v23 = vld.sshfl [vmem:[#allocation1] sm:$0xff pattern:$0x73625140] }
  0x94   : > { %1440 = vmatmul.bf16.vlgmr.msrb.gmra.mxu1 %v1382_v23  ;;  %1499 = vst [vmem:[#allocation1] ss:$4 sm:$0xff] %v1477_v1 }
  0x95   : > { %1502 = vst [vmem:[#allocation1 + $0x1] ss:$4 sm:$0xff] %v1478_v4 }
  0x96   : > { %1505 = vst [vmem:[#allocation1 + $0x2] ss:$4 sm:$0xff] %v1479_v16 }
  0x97   : > { %1508 = vst [vmem:[#allocation1 + $0x3] ss:$4 sm:$0xff] %v1480_v20 }
  0x9e   : > { %v1509_v45 = vld.sshfl [vmem:[#allocation1] sm:$0xff pattern:$0x73625140] }
  0x9f   : > { %1567 = vmatmul.bf16.vlgmr.msrb.gmra.mxu2 %v1509_v45  ;;  %1681 = vst [vmem:[#allocation1] ss:$4 sm:$0xff] %v1623_v41 }
  0xa0   : > { %1684 = vst [vmem:[#allocation1 + $0x1] ss:$4 sm:$0xff] %v1636_v42 }
  0xa1   : > { %1687 = vst [vmem:[#allocation1 + $0x2] ss:$4 sm:$0xff] %v1649_v46 }
  0xa2   : > { %1690 = vst [vmem:[#allocation1 + $0x3] ss:$4 sm:$0xff] %v1662_v47 }
  0xa9   : > { %v1691_v54 = vld.sshfl [vmem:[#allocation1] sm:$0xff pattern:$0x73625140] }
  0xaa   : > { %1749 = vmatmul.bf16.vlgmr.msrb.gmra.mxu3 %v1691_v54  ;;  %1779 = vst [vmem:[#allocation1] ss:$4 sm:$0xff] %v1757_v48 }
  0xab   : > { %1782 = vst [vmem:[#allocation1 + $0x1] ss:$4 sm:$0xff] %v1758_v50 }
  0xac   : > { %1785 = vst [vmem:[#allocation1 + $0x2] ss:$4 sm:$0xff] %v1759_v53 }
  0xad   : > { %1788 = vst [vmem:[#allocation1 + $0x3] ss:$4 sm:$0xff] %v1760_v56 }
  0xb4   : > { %v1789_v58 = vld.sshfl [vmem:[#allocation1] sm:$0xff pattern:$0x73625140] }
  0xb5   : > { %1847 = vmatmul.bf16.vlgmr.msra.gmra.mxu0 %v1789_v58 }
  0xda   : > { %v864_v59 = vpop.f32.mrf.mxu0 }
  0xe2   : > { %v866_v37 = vpop.f32.mrf.mxu0 }
  0xe5   : > { %v939_v60 = vpop.f32.mrf.mxu1 }
  0xe6   : > { %v940_v1 = vadd.f32 %v939_v60, %v864_v59 }
  0xed   : > { %v941_v63 = vpop.f32.mrf.mxu1 }
  0xee   : > { %v942_v4 = vadd.f32 %v941_v63, %v866_v37 }
  0xf6   : > { %v1035_v61 = vpop.f32.mrf.mxu2 }
  0xf7   : > { %v1040_v3 = vadd.f32 %v1035_v61, %v940_v1 }
  0xfe   : > { %v1037_v51 = vpop.f32.mrf.mxu2 }
  0xff   : > { %v1041_v8 = vadd.f32 %v1037_v51, %v942_v4 }
 0x101   : > { %v1161_v62 = vpop.f32.mrf.mxu3 }
 0x102   : > { %v1166_v6 = vadd.f32 %v1161_v62, %v1040_v3 }
 0x106   : > { %v1343_v0 = vpop.f32.mrf.mxu0 }
 0x107   : > { %v1348_v44 = vadd.f32 %v1343_v0, %v1166_v6 }
 0x109   : > { %v1163_v52 = vpop.f32.mrf.mxu3 }
 0x10a   : > { %v1167_v43 = vadd.f32 %v1163_v52, %v1041_v8 }
 0x10e   : > { %v1345_v18 = vpop.f32.mrf.mxu0 }
 0x10f   : > { %v1349_v12 = vadd.f32 %v1345_v18, %v1167_v43 }
 0x111   : > { %v1441_v2 = vpop.f32.mrf.mxu1 }
 0x112   : > { %v1446_v15 = vadd.f32 %v1441_v2, %v1348_v44 }
 0x119   : > { %v1443_v10 = vpop.f32.mrf.mxu1 }
 0x11a   : > { %v1447_v16 = vadd.f32 %v1443_v10, %v1349_v12 }
 0x122   : > { %v1568_v5 = vpop.f32.mrf.mxu2 }
 0x123   : > { %v1573_v19 = vadd.f32 %v1568_v5, %v1446_v15 }
 0x12a   : > { %v1570_v13 = vpop.f32.mrf.mxu2 }
 0x12b   : > { %v1574_v11 = vadd.f32 %v1570_v13, %v1447_v16 }
 0x12d   : > { %v1750_v9 = vpop.f32.mrf.mxu3 }
 0x12e   : > { %v1755_v20 = vadd.f32 %v1750_v9, %v1573_v19 }
 0x132   : > { %v1848_v14 = vpop.f32.mrf.mxu0 }
 0x133   : > { %v1853_v49 = vadd.f32 %v1848_v14, %v1755_v20 }
 0x135   : > { %v1752_v17 = vpop.f32.mrf.mxu3 }
 0x136   : > { %v1756_v21 = vadd.f32 %v1752_v17, %v1574_v11 }
 0x13a   : > { %v1850_v22 = vpop.f32.mrf.mxu0 }
 0x13b   : > { %v1854_v23 = vadd.f32 %v1850_v22, %v1756_v21 }
 0x13d   : > { %v2411_v24 = vpack.c.bf16 %v1854_v23, %v1853_v49  ;;  %v1859_v25 = vadd.f32 %v1854_v23, %v1853_v49 }
 0x13f   : > { %2412 = vst [vmem:[%s349_s12] sm:$0xff] %v2411_v24   ;;  %v1860_v35 = vrot.slane %v1859_v25, 4 }
 0x141   : > { %v1861_v26 = vadd.f32 %v1860_v35, %v1859_v25 }
 0x143   : > { %v1862_v28 = vrot.slane %v1861_v26, 2 }
 0x145   : > { %v1863_v57 = vadd.f32 %v1862_v28, %v1861_v26 }
 0x147   : > { %v1864_v30 = vrot.slane %v1863_v57, 1 }
 0x149   : > { %v1865_v31 = vadd.f32 %v1864_v30, %v1863_v57 }
 0x14b   : > { %v1866_v32 = vmul.f32 0.0625, %v1865_v31 }
 0x14d   : > { %v1867_v33 = vsub.f32 %v1853_v49, %v1866_v32  ;;  %v1868_v34 = vsub.f32 %v1854_v23, %v1866_v32 }
 0x14f   : > { %v1869_v55 = vmul.f32 %v1867_v33, %v1867_v33  ;;  %v1870_v36 = vmul.f32 %v1868_v34, %v1868_v34 }
 0x151   : > { %v1871_v7 = vadd.f32 %v1870_v36, %v1869_v55 }
 0x153   : > { %v1872_v39 = vrot.slane %v1871_v7, 4 }
 0x155   : > { %v1873_v29 = vadd.f32 %v1872_v39, %v1871_v7 }
 0x157   : > { %v1874_v27 = vrot.slane %v1873_v29, 2 }
 0x159   : > { %v1875_v41 = vadd.f32 %v1874_v27, %v1873_v29 }
 0x15b   : > { %v1876_v42 = vrot.slane %v1875_v41, 1 }
 0x15d   : > { %v1877_v45 = vadd.f32 %v1876_v42, %v1875_v41 }
 0x15f   : > { %v1883_v46 = vsel %vm1882_vm1, %v1877_v45, 0.0 }
 0x160   : > { %v1884_v47 = vsel %vm1881_vm2, %v1865_v31, %v1883_v46 }
 0x161   : > { %v1885_v48 = vsel %vm1880_vm3, 16.0, %v1884_v47 }
 0x162   : > { %1886 = vst [vmem:[%s353_s15] sm:$0xff] %v1885_v48 }
 0x163 PF: > { %s20_s27 = sadd.s32 1, %s2481_s27  }
 0x164   : > { %p17_p7 = scmp.ge.s32.totalorder %s20_s27, 4  }
 0x166   :  { %19 = sbr.rel (!%p17_p7) target bundleno = 1 (0x1), region = 139 }
 0x16b   :  { %1922 = vsyncpa [#allocation4], 1 }
 0x16c   :  { %1924 = vsyncpa [#allocation4 + $0x1], 1 }

</bundles_post_ra>
